<compile_context>
chip_gen: v5e
topology: v5e:2x2
jax: 0.10.0
libtpu: 0.0.40
codegen_flags: <defaults>
</compile_context>

<pallas_src>
import functools

import jax
import jax.numpy as jnp
from jax.experimental import pallas as pl
from jax.experimental.pallas import tpu as pltpu


# ----------------------------- Pallas kernel ------------------------------ #
def _snapmix_eqloss_kernel(num_classes,
                           x_ref, w_ref, b_ref,        # (TB,F) bf16, (F,C) bf16, (1,C) f32
                           wc_ref,                     # (TB,C) bf16 (0/1 values)
                           ya_ref, yb_ref,             # (TB,1) int32 targets
                           out_a_ref, out_b_ref):      # (1,1) f32 partial NLL sums
    # linear: (TB, F) @ (F, Cpad) + (1, Cpad)  -> MXU, bf16 in / f32 accumulate
    logits = jnp.dot(x_ref[...], w_ref[...],
                     preferred_element_type=jnp.float32) + b_ref[...]

    # valid-class lane mask; padded lanes never contribute to any reduction.
    lane = jax.lax.broadcasted_iota(jnp.int32, logits.shape, 1)
    valid = lane < num_classes

    # numerically-safe exp: shift by per-row max over valid lanes, and clamp the
    # exp argument itself on padded lanes so it can never produce inf.
    m = jnp.max(jnp.where(valid, logits, -1e30), axis=1, keepdims=True)   # (TB,1)
    e = jnp.exp(jnp.where(valid, logits - m, -1e30))                      # (TB,C), padded -> 0

    # one-hot rebuilt in-register from the int32 targets (no HBM one-hot streams)
    oha = lane == ya_ref[...]            # (TB,C) bool via lane-broadcast of (TB,1)
    ohb = lane == yb_ref[...]

    wc = wc_ref[...].astype(jnp.float32)
    # eql_weight * e = (1 - wc + wc*onehot) * e = e - wc*e + onehot*(wc*e)
    # -> share (wc * e) between the a / b branches.
    wce = wc * e
    base = jnp.sum(e - wce, axis=1, keepdims=True)                        # (TB,1)
    sum_a = base + jnp.sum(jnp.where(oha, wce, 0.0), axis=1, keepdims=True)
    sum_b = base + jnp.sum(jnp.where(ohb, wce, 0.0), axis=1, keepdims=True)

    # target logit via the same masks
    tgt_a = jnp.sum(jnp.where(oha, logits, 0.0), axis=1, keepdims=True)
    tgt_b = jnp.sum(jnp.where(ohb, logits, 0.0), axis=1, keepdims=True)

    # nll = -(logits[target] - log(sum_exp)) = log(sum_shifted) + m - logits[target]
    nll_a = jnp.log(sum_a) + m - tgt_a                                    # (TB,1)
    nll_b = jnp.log(sum_b) + m - tgt_b

    # per-tile partial sums; loss_weight / mean(lam) / 1/B are folded in the wrapper.
    out_a_ref[...] = jnp.sum(nll_a, keepdims=True)                        # (1,1)
    out_b_ref[...] = jnp.sum(nll_b, keepdims=True)


def snapmix_eqloss_share_weight(x, w, b, weight_cust, ya, yb, lam_a, lam_b, *,
                                loss_weight=1.0, num_classes=5, block_b=None):
    """x:(B,F) f32  w:(F,Cpad) f32  b:(1,Cpad) f32  weight_cust:(B,Cpad) f32
       ya/yb:(B,) int  lam_*:(B,1) f32.  Returns the scalar SnapMix EQ loss."""
    B, F = x.shape
    Cpad = w.shape[1]
    if block_b is None:
        # Single step for small batches; multiple of 256 keeps the v6e/v7x MXU full.
        block_b = B if B <= 1024 else 512
    assert B % block_b == 0, "batch must be a multiple of the batch tile"
    nb = B // block_b

    # bf16 matmul inputs (f32 accumulate) -> native MXU path, half the DMA bytes.
    x_bf = x.astype(jnp.bfloat16)
    w_bf = w.astype(jnp.bfloat16)
    # weight_cust holds 0/1 -> exact in bf16; upcast inside the kernel.
    wc_bf = weight_cust.astype(jnp.bfloat16)
    ya_i = ya.reshape(B, 1).astype(jnp.int32)
    yb_i = yb.reshape(B, 1).astype(jnp.int32)

    kernel = functools.partial(_snapmix_eqloss_kernel, int(num_classes))

    partial_a, partial_b = pl.pallas_call(
        kernel,
        out_shape=(jax.ShapeDtypeStruct((nb, 1, 1), jnp.float32),
                   jax.ShapeDtypeStruct((nb, 1, 1), jnp.float32)),
        grid_spec=pltpu.PrefetchScalarGridSpec(
            num_scalar_prefetch=0,
            grid=(nb,),
            in_specs=[
                pl.BlockSpec((block_b, F), lambda i: (i, 0)),      # x tile (bf16)
                pl.BlockSpec((F, Cpad), lambda i: (0, 0)),         # w (bf16, resident)
                pl.BlockSpec((1, Cpad), lambda i: (0, 0)),         # bias (f32, resident)
                pl.BlockSpec((block_b, Cpad), lambda i: (i, 0)),   # weight_cust (bf16)
                pl.BlockSpec((block_b, 1), lambda i: (i, 0)),      # ya targets (int32)
                pl.BlockSpec((block_b, 1), lambda i: (i, 0)),      # yb targets (int32)
            ],
            out_specs=[
                pl.BlockSpec((None, 1, 1), lambda i: (i, 0, 0)),   # partial sum nll_a
                pl.BlockSpec((None, 1, 1), lambda i: (i, 0, 0)),   # partial sum nll_b
            ],
        ),
        compiler_params=pltpu.CompilerParams(
            # Independent tiles + per-tile output blocks -> megacore sharding on v7x.
            dimension_semantics=("parallel",)),
        # TODO(synk): for very long grids (huge B) add pipeline_mode=pl.Buffered(3)
        # on the streamed x / weight_cust / target tiles to hide per-DMA latency.
    )(x_bf, w_bf, b, wc_bf, ya_i, yb_i)

    # loss = loss_weight * (mean_nll_a * mean(lam_a) + mean_nll_b * mean(lam_b))
    scale_a = (jnp.float32(loss_weight) / B) * jnp.mean(lam_a)
    scale_b = (jnp.float32(loss_weight) / B) * jnp.mean(lam_b)
    return scale_a * jnp.sum(partial_a) + scale_b * jnp.sum(partial_b)


# --------------------------- plain-JAX reference --------------------------- #
def _reference(x, w, b, weight_cust, ya, yb, lam_a, lam_b, loss_weight=1.0):
    # Mirrors the kernel's bf16 matmul inputs (f32 accumulate) so the check is tight.
    C = w.shape[1]
    one_hot_a = jax.nn.one_hot(ya, C, dtype=jnp.float32)
    one_hot_b = jax.nn.one_hot(yb, C, dtype=jnp.float32)
    xb = x.astype(jnp.bfloat16).astype(jnp.float32)
    wb = w.astype(jnp.bfloat16).astype(jnp.float32)
    logits = xb @ wb + b
    e = jnp.exp(logits)
    eqw_a = 1.0 - weight_cust * (1.0 - one_hot_a)
    eqw_b = 1.0 - weight_cust * (1.0 - one_hot_b)
    sum_a = jnp.sum(eqw_a * e, axis=1, keepdims=True)
    sum_b = jnp.sum(eqw_b * e, axis=1, keepdims=True)
    nll_a = jnp.mean(-(jnp.sum(one_hot_a * logits, axis=1, keepdims=True) - jnp.log(sum_a)))
    nll_b = jnp.mean(-(jnp.sum(one_hot_b * logits, axis=1, keepdims=True) - jnp.log(sum_b)))
    loss = nll_a * jnp.mean(lam_a) + nll_b * jnp.mean(lam_b)
    return loss * loss_weight


# ------------------------------- glue / main ------------------------------- #
if __name__ == "__main__":
    B = 256           # batch -> single 256-row grid step (full MXU M on v6e/v7x)
    IN_FEAT = 256
    NUM_CLASSES = 5
    C_PAD = 128       # pad classes to one lane width (minimum lane-dense width)
    LOSS_WEIGHT = 1.0

    key = jax.random.PRNGKey(0)
    kx, kw, kb, kya, kyb, kprob, kbern, klama = jax.random.split(key, 8)

    # Features going into self.linear
    x = jax.random.normal(kx, (B, IN_FEAT), dtype=jnp.float32)

    # nn.Linear(in_feat, num_classes) params, PyTorch-style uniform init
    bound = 1.0 / jnp.sqrt(jnp.float32(IN_FEAT))
    w_small = jax.random.uniform(kw, (IN_FEAT, NUM_CLASSES), jnp.float32, -bound, bound)
    b_small = jax.random.uniform(kb, (NUM_CLASSES,), jnp.float32, -bound, bound)

    # Pad class dim to 128; padded columns are zero (also masked in-kernel)
    w = jnp.zeros((IN_FEAT, C_PAD), jnp.float32).at[:, :NUM_CLASSES].set(w_small)
    b = jnp.zeros((1, C_PAD), jnp.float32).at[0, :NUM_CLASSES].set(b_small)

    # Targets and SnapMix per-sample lambdas
    ya = jax.random.randint(kya, (B,), 0, NUM_CLASSES)
    yb = jax.random.randint(kyb, (B,), 0, NUM_CLASSES)
    lam_a = jax.random.uniform(klama, (B, 1), jnp.float32)
    lam_b = 1.0 - lam_a

    # customize_func_share: bernoulli with per-class probs, zero col 3 and the
    # target columns ya[i], yb[i] per row.  (JAX RNG instead of torch RNG.)
    # TODO(synk): exact torch RNG draws are not reproduced; semantics match.
    probs = jax.random.uniform(kprob, (NUM_CLASSES,), jnp.float32)
    wc_small = jax.random.bernoulli(kbern, probs[None, :], (B, NUM_CLASSES)).astype(jnp.float32)
    wc_small = wc_small.at[:, 3].set(0.0)
    rows = jnp.arange(B)
    wc_small = wc_small.at[rows, ya].set(0.0)
    wc_small = wc_small.at[rows, yb].set(0.0)
    # padded classes: weight_cust = 1 (reference: eql_weight = 0 there; kernel masks anyway)
    weight_cust = jnp.ones((B, C_PAD), jnp.float32).at[:, :NUM_CLASSES].set(wc_small)

    loss = snapmix_eqloss_share_weight(
        x, w, b, weight_cust, ya, yb, lam_a, lam_b,
        loss_weight=LOSS_WEIGHT, num_classes=NUM_CLASSES)
    loss = jax.block_until_ready(loss)

    ref = _reference(x, w, b, weight_cust, ya, yb, lam_a, lam_b,
                     loss_weight=LOSS_WEIGHT)

    assert jnp.isfinite(loss), "non-finite loss"
    assert jnp.allclose(loss, ref, rtol=1e-4, atol=1e-4), (loss, ref)

    print("KERNEL_OK")
</pallas_src>

<mosaic_0001>
module attributes {stable_mosaic.version = 11 : i64} {
  func.func @_snapmix_eqloss_kernel(%arg0: i32, %arg1: memref<256x256xbf16, #tpu.memory_space<vmem>>, %arg2: memref<256x128xbf16, #tpu.memory_space<vmem>>, %arg3: memref<1x128xf32, #tpu.memory_space<vmem>>, %arg4: memref<256x128xbf16, #tpu.memory_space<vmem>>, %arg5: memref<256x1xi32, #tpu.memory_space<vmem>>, %arg6: memref<256x1xi32, #tpu.memory_space<vmem>>, %arg7: memref<1x1x1xf32, #tpu.memory_space<vmem>>, %arg8: memref<1x1x1xf32, #tpu.memory_space<vmem>>) attributes {dimension_semantics = [#tpu.dimension_semantics<parallel>], iteration_bounds = array<i64: 1>, scalar_prefetch = 0 : i64, scratch_operands = 0 : i64, tpu.core_type = #tpu.core_type<tc>, window_params = [{transform_indices = @transform_0, window_bounds = array<i64: 256, 256>}, {pipeline_mode = #tpu.pipeline_mode<synchronous>, transform_indices = @transform_1, window_bounds = array<i64: 256, 128>}, {pipeline_mode = #tpu.pipeline_mode<synchronous>, transform_indices = @transform_2, window_bounds = array<i64: 1, 128>}, {transform_indices = @transform_3, window_bounds = array<i64: 256, 128>}, {transform_indices = @transform_4, window_bounds = array<i64: 256, 1>}, {transform_indices = @transform_5, window_bounds = array<i64: 256, 1>}, {transform_indices = @transform_6, window_bounds = array<i64: 1, 1, 1>}, {transform_indices = @transform_7, window_bounds = array<i64: 1, 1, 1>}]} {
    %c0 = arith.constant 0 : index
    %c0_0 = arith.constant 0 : index
    %0 = vector.load %arg1[%c0, %c0_0] : memref<256x256xbf16, #tpu.memory_space<vmem>>, vector<256x256xbf16>
    %c0_1 = arith.constant 0 : index
    %c0_2 = arith.constant 0 : index
    %1 = vector.load %arg2[%c0_1, %c0_2] : memref<256x128xbf16, #tpu.memory_space<vmem>>, vector<256x128xbf16>
    %cst = arith.constant dense<0.000000e+00> : vector<256x128xf32>
    %2 = tpu.matmul %0, %1, %cst {dimension_numbers = #tpu.dot_dimension_numbers<[1], [0], [0], [1], [0, 0, 1, 1], [], []>} : vector<256x256xbf16>, vector<256x128xbf16>, vector<256x128xf32> -> vector<256x128xf32>
    %c0_3 = arith.constant 0 : index
    %c0_4 = arith.constant 0 : index
    %3 = vector.load %arg3[%c0_3, %c0_4] : memref<1x128xf32, #tpu.memory_space<vmem>>, vector<1x128xf32>
    %4 = vector.broadcast %3 : vector<1x128xf32> to vector<256x128xf32>
    %5 = arith.addf %2, %4 : vector<256x128xf32>
    %6 = tpu.iota {dimensions = array<i32: 1>} : vector<256x128xi32>
    %c5_i32 = arith.constant 5 : i32
    %7 = vector.broadcast %c5_i32 : i32 to vector<256x128xi32>
    %8 = arith.cmpi slt, %6, %7 : vector<256x128xi32>
    %cst_5 = arith.constant -1.000000e+30 : f32
    %9 = vector.broadcast %cst_5 : f32 to vector<256x128xf32>
    %10 = arith.select %8, %5, %9 : vector<256x128xi1>, vector<256x128xf32>
    %cst_6 = arith.constant dense<0xFF800000> : vector<256xf32>
    %11 = vector.multi_reduction <maximumf>, %10, %cst_6 [1] : vector<256x128xf32> to vector<256xf32>
    %12 = vector.shape_cast %11 : vector<256xf32> to vector<256x1xf32>
    %13 = vector.broadcast %12 : vector<256x1xf32> to vector<256x128xf32>
    %14 = arith.subf %5, %13 : vector<256x128xf32>
    %cst_7 = arith.constant -1.000000e+30 : f32
    %15 = vector.broadcast %cst_7 : f32 to vector<256x128xf32>
    %16 = arith.select %8, %14, %15 : vector<256x128xi1>, vector<256x128xf32>
    %17 = math.exp %16 : vector<256x128xf32>
    %c0_8 = arith.constant 0 : index
    %c0_9 = arith.constant 0 : index
    %18 = vector.load %arg5[%c0_8, %c0_9] : memref<256x1xi32, #tpu.memory_space<vmem>>, vector<256x1xi32>
    %19 = vector.broadcast %18 : vector<256x1xi32> to vector<256x128xi32>
    %20 = arith.cmpi eq, %6, %19 : vector<256x128xi32>
    %c0_10 = arith.constant 0 : index
    %c0_11 = arith.constant 0 : index
    %21 = vector.load %arg6[%c0_10, %c0_11] : memref<256x1xi32, #tpu.memory_space<vmem>>, vector<256x1xi32>
    %22 = vector.broadcast %21 : vector<256x1xi32> to vector<256x128xi32>
    %23 = arith.cmpi eq, %6, %22 : vector<256x128xi32>
    %c0_12 = arith.constant 0 : index
    %c0_13 = arith.constant 0 : index
    %24 = vector.load %arg4[%c0_12, %c0_13] : memref<256x128xbf16, #tpu.memory_space<vmem>>, vector<256x128xbf16>
    %25 = arith.extf %24 : vector<256x128xbf16> to vector<256x128xf32>
    %26 = arith.mulf %25, %17 : vector<256x128xf32>
    %27 = arith.subf %17, %26 : vector<256x128xf32>
    %cst_14 = arith.constant dense<0.000000e+00> : vector<256xf32>
    %28 = vector.multi_reduction <add>, %27, %cst_14 [1] : vector<256x128xf32> to vector<256xf32>
    %29 = vector.shape_cast %28 : vector<256xf32> to vector<256x1xf32>
    %cst_15 = arith.constant 0.000000e+00 : f32
    %30 = vector.broadcast %cst_15 : f32 to vector<256x128xf32>
    %31 = arith.select %20, %26, %30 : vector<256x128xi1>, vector<256x128xf32>
    %cst_16 = arith.constant dense<0.000000e+00> : vector<256xf32>
    %32 = vector.multi_reduction <add>, %31, %cst_16 [1] : vector<256x128xf32> to vector<256xf32>
    %33 = vector.shape_cast %32 : vector<256xf32> to vector<256x1xf32>
    %34 = arith.addf %29, %33 : vector<256x1xf32>
    %cst_17 = arith.constant 0.000000e+00 : f32
    %35 = vector.broadcast %cst_17 : f32 to vector<256x128xf32>
    %36 = arith.select %23, %26, %35 : vector<256x128xi1>, vector<256x128xf32>
    %cst_18 = arith.constant dense<0.000000e+00> : vector<256xf32>
    %37 = vector.multi_reduction <add>, %36, %cst_18 [1] : vector<256x128xf32> to vector<256xf32>
    %38 = vector.shape_cast %37 : vector<256xf32> to vector<256x1xf32>
    %39 = arith.addf %29, %38 : vector<256x1xf32>
    %cst_19 = arith.constant 0.000000e+00 : f32
    %40 = vector.broadcast %cst_19 : f32 to vector<256x128xf32>
    %41 = arith.select %20, %5, %40 : vector<256x128xi1>, vector<256x128xf32>
    %cst_20 = arith.constant dense<0.000000e+00> : vector<256xf32>
    %42 = vector.multi_reduction <add>, %41, %cst_20 [1] : vector<256x128xf32> to vector<256xf32>
    %43 = vector.shape_cast %42 : vector<256xf32> to vector<256x1xf32>
    %cst_21 = arith.constant 0.000000e+00 : f32
    %44 = vector.broadcast %cst_21 : f32 to vector<256x128xf32>
    %45 = arith.select %23, %5, %44 : vector<256x128xi1>, vector<256x128xf32>
    %cst_22 = arith.constant dense<0.000000e+00> : vector<256xf32>
    %46 = vector.multi_reduction <add>, %45, %cst_22 [1] : vector<256x128xf32> to vector<256xf32>
    %47 = vector.shape_cast %46 : vector<256xf32> to vector<256x1xf32>
    %48 = math.log %34 : vector<256x1xf32>
    %49 = arith.addf %48, %12 : vector<256x1xf32>
    %50 = arith.subf %49, %43 : vector<256x1xf32>
    %51 = math.log %39 : vector<256x1xf32>
    %52 = arith.addf %51, %12 : vector<256x1xf32>
    %53 = arith.subf %52, %47 : vector<256x1xf32>
    %54 = vector.shape_cast %50 : vector<256x1xf32> to vector<1x256x1xf32>
    %cst_23 = arith.constant dense<0.000000e+00> : vector<1xf32>
    %55 = vector.multi_reduction <add>, %54, %cst_23 [1, 2] : vector<1x256x1xf32> to vector<1xf32>
    %56 = vector.shape_cast %55 : vector<1xf32> to vector<1x1x1xf32>
    %57 = vector.extract %56[0, 0, 0] : f32 from vector<1x1x1xf32>
    %58 = vector.broadcast %57 : f32 to vector<1x1xf32>
    %c0_24 = arith.constant 0 : index
    %c0_25 = arith.constant 0 : index
    %c0_26 = arith.constant 0 : index
    %59 = vector.load %arg7[%c0_24, %c0_25, %c0_26] : memref<1x1x1xf32, #tpu.memory_space<vmem>>, vector<1x1x1xf32>
    %60 = vector.shape_cast %59 : vector<1x1x1xf32> to vector<1x1xf32>
    %61 = vector.shape_cast %58 : vector<1x1xf32> to vector<1x1x1xf32>
    tpu.vector_store %arg7[%c0_24, %c0_25, %c0_26], %61 {strides = array<i32>} : memref<1x1x1xf32, #tpu.memory_space<vmem>>, vector<1x1x1xf32>,
    %62 = vector.shape_cast %53 : vector<256x1xf32> to vector<1x256x1xf32>
    %cst_27 = arith.constant dense<0.000000e+00> : vector<1xf32>
    %63 = vector.multi_reduction <add>, %62, %cst_27 [1, 2] : vector<1x256x1xf32> to vector<1xf32>
    %64 = vector.shape_cast %63 : vector<1xf32> to vector<1x1x1xf32>
    %65 = vector.extract %64[0, 0, 0] : f32 from vector<1x1x1xf32>
    %66 = vector.broadcast %65 : f32 to vector<1x1xf32>
    %c0_28 = arith.constant 0 : index
    %c0_29 = arith.constant 0 : index
    %c0_30 = arith.constant 0 : index
    %67 = vector.load %arg8[%c0_28, %c0_29, %c0_30] : memref<1x1x1xf32, #tpu.memory_space<vmem>>, vector<1x1x1xf32>
    %68 = vector.shape_cast %67 : vector<1x1x1xf32> to vector<1x1xf32>
    %69 = vector.shape_cast %66 : vector<1x1xf32> to vector<1x1x1xf32>
    tpu.vector_store %arg8[%c0_28, %c0_29, %c0_30], %69 {strides = array<i32>} : memref<1x1x1xf32, #tpu.memory_space<vmem>>, vector<1x1x1xf32>,
    return
  }
  func.func @transform_0(%arg0: i32) -> (i32, i32) {
    %c0_i32 = arith.constant 0 : i32
    %c0_i32_0 = arith.constant 0 : i32
    return %arg0, %c0_i32 : i32, i32
  }
  func.func @transform_1(%arg0: i32) -> (i32, i32) {
    %c0_i32 = arith.constant 0 : i32
    %c0_i32_0 = arith.constant 0 : i32
    %c0_i32_1 = arith.constant 0 : i32
    return %c0_i32, %c0_i32_0 : i32, i32
  }
  func.func @transform_2(%arg0: i32) -> (i32, i32) {
    %c0_i32 = arith.constant 0 : i32
    %c0_i32_0 = arith.constant 0 : i32
    %c0_i32_1 = arith.constant 0 : i32
    return %c0_i32, %c0_i32_0 : i32, i32
  }
  func.func @transform_3(%arg0: i32) -> (i32, i32) {
    %c0_i32 = arith.constant 0 : i32
    %c0_i32_0 = arith.constant 0 : i32
    return %arg0, %c0_i32 : i32, i32
  }
  func.func @transform_4(%arg0: i32) -> (i32, i32) {
    %c0_i32 = arith.constant 0 : i32
    %c0_i32_0 = arith.constant 0 : i32
    return %arg0, %c0_i32 : i32, i32
  }
  func.func @transform_5(%arg0: i32) -> (i32, i32) {
    %c0_i32 = arith.constant 0 : i32
    %c0_i32_0 = arith.constant 0 : i32
    return %arg0, %c0_i32 : i32, i32
  }
  func.func @transform_6(%arg0: i32) -> (i32, i32, i32) {
    %c0_i32 = arith.constant 0 : i32
    %c0_i32_0 = arith.constant 0 : i32
    %c0_i32_1 = arith.constant 0 : i32
    return %arg0, %c0_i32, %c0_i32_0 : i32, i32, i32
  }
  func.func @transform_7(%arg0: i32) -> (i32, i32, i32) {
    %c0_i32 = arith.constant 0 : i32
    %c0_i32_0 = arith.constant 0 : i32
    %c0_i32_1 = arith.constant 0 : i32
    return %arg0, %c0_i32, %c0_i32_0 : i32, i32, i32
  }
}

</mosaic_0001>

<bundles_post_ra>
// kernel: tpu_custom_call.1
= control target key start
LH: loop header
LB: loop body
LE: loop exit
PB: predicated region body
PF: predicated region fallthrough
CT: control target
= control target key end

     0   :  { %13 = vsyncpa [#allocation3], 0  ;;  %v2744_v3 = vmov 0   ;;  %s5210_s0 = inlined_call_operand.vmem [shape: bf16[256,256], index: 0, kind: input, shape index: {}]   ;;  %s5211_s1 = inlined_call_operand.vmem [shape: bf16[256,128], index: 1, kind: input, shape index: {}]   ;;  %s5212_s2 = inlined_call_operand.vmem [shape: f32[1,128], index: 2, kind: input, shape index: {}]   ;;  %s5213_s3 = inlined_call_operand.vmem [shape: bf16[256,128], index: 3, kind: input, shape index: {}]   ;;  %s5214_s4 = inlined_call_operand.vmem [shape: s32[256,1], index: 4, kind: input, shape index: {}]   ;;  %s5215_s5 = inlined_call_operand.vmem [shape: s32[256,1], index: 5, kind: input, shape index: {}]   ;;  %s5216_s6 = inlined_call_operand.hbm [shape: f32[1,1,1], index: 6, kind: output, shape index: {0}]   ;;  %s5217_s7 = inlined_call_operand.hbm [shape: f32[1,1,1], index: 7, kind: output, shape index: {1}]  }
   0x1   :  { %v758_v0 = vld [vmem:[%s5214_s4 + $0x10] sm:$0xff]  ;;  %v757_v1 = vld [vmem:[%s5214_s4 + $0x8] sm:$0xff]  ;;  %v756_v2 = vld [vmem:[%s5214_s4] sm:$0xff]  ;;  %2498 = vset.pattern.permute.xlu1 %v2744_v3  ;;  %2497 = vset.pattern.permute.xlu0 %v2744_v3 }
   0x2   :  { %v2385_v4 = vld [vmem:[%s5211_s1 + $0x38] sm:$0xff]  ;;  %2496 = vset.pattern.permute.xlu2 %v2744_v3  ;;  %795 = vperm.xlu1 %2498, %v758_v0   ;;  %v2384_v6 = vld [vmem:[%s5211_s1 + $0x30] sm:$0xff]  ;;  %v761_v8 = vld [vmem:[%s5214_s4 + $0x28] sm:$0xff] }
   0x3   :  { %v2393_v5 = vld [vmem:[%s5211_s1 + $0x78] sm:$0xff]  ;;  %792 = vperm.xlu0 %2497, %v757_v1   ;;  %789 = vperm.xlu2 %2496, %v756_v2   ;;  %v2392_v7 = vld [vmem:[%s5211_s1 + $0x70] sm:$0xff]  ;;  %v764_v9 = vld [vmem:[%s5214_s4 + $0x40] sm:$0xff] }
   0x4   :  { %351 = vmatpush.bf16.msra.mxu0 %v2385_v4  ;;  %2473 = vmatpush.bf16.msra.mxu2 %v2385_v4  ;;  %v759_v10 = vld [vmem:[%s5214_s4 + $0x18] sm:$0xff]  ;;  %v2383_v11 = vld [vmem:[%s5211_s1 + $0x28] sm:$0xff]  ;;  %v2382_v13 = vld [vmem:[%s5211_s1 + $0x20] sm:$0xff] }
   0x5   :  { %440 = vmatpush.bf16.msra.mxu1 %v2393_v5  ;;  %2481 = vmatpush.bf16.msra.mxu3 %v2393_v5  ;;  %v2391_v12 = vld [vmem:[%s5211_s1 + $0x68] sm:$0xff]  ;;  %v2390_v14 = vld [vmem:[%s5211_s1 + $0x60] sm:$0xff] }
   0x8   :  { %352 = vmatpush.bf16.msra.mxu0 %v2384_v6  ;;  %2474 = vmatpush.bf16.msra.mxu2 %v2384_v6 }
   0x9   :  { %441 = vmatpush.bf16.msra.mxu1 %v2392_v7  ;;  %2482 = vmatpush.bf16.msra.mxu3 %v2392_v7 }
   0xa   :  { %804 = vperm.xlu1 %2498, %v761_v8  }
   0xb   :  { %813 = vperm.xlu0 %2497, %v764_v9   ;;  %798 = vperm.xlu2 %2496, %v759_v10  }
   0xc   :  { %353 = vmatpush.bf16.msra.mxu0 %v2383_v11  ;;  %2475 = vmatpush.bf16.msra.mxu2 %v2383_v11 }
   0xd   :  { %442 = vmatpush.bf16.msra.mxu1 %v2391_v12  ;;  %2483 = vmatpush.bf16.msra.mxu3 %v2391_v12 }
   0xe   :  { %14 = vsyncpa [#allocation5], 0  ;;  %v763_v15 = vld [vmem:[%s5214_s4 + $0x38] sm:$0xff]  ;;  %v760_v17 = vld [vmem:[%s5214_s4 + $0x20] sm:$0xff]  ;;  %s2746_s26 = smov [#allocation4]   ;;  %s2140_s30 = sshll.u32 %s5217_s7, 4  ;;  %s2141_s30 = int_to_ptr.hbm [resolvable:$true] %s2140_s30 }
   0xf   :  { %v767_v16 = vld [vmem:[%s5214_s4 + $0x58] sm:$0xff]  ;;  %v2380_v20 = vld [vmem:[%s5211_s1 + $0x10] sm:$0xff]  ;;  %v2379_v25 = vld [vmem:[%s5211_s1 + $0x8] sm:$0xff]  ;;  %s2138_s27 = sshll.u32 %s2746_s26, 4  ;;  %s2139_s27 = int_to_ptr.vmem [resolvable:$true] %s2138_s27 }
  0x10   :  { %354 = vmatpush.bf16.msra.mxu0 %v2382_v13  ;;  %2476 = vmatpush.bf16.msra.mxu2 %v2382_v13  ;;  %v2381_v18 = vld [vmem:[%s5211_s1 + $0x18] sm:$0xff]  ;;  %v2388_v21 = vld [vmem:[%s5211_s1 + $0x50] sm:$0xff]  ;;  %v2387_v26 = vld [vmem:[%s5211_s1 + $0x48] sm:$0xff] }
  0x11   :  { %443 = vmatpush.bf16.msra.mxu1 %v2390_v14  ;;  %2484 = vmatpush.bf16.msra.mxu3 %v2390_v14  ;;  %v2389_v19 = vld [vmem:[%s5211_s1 + $0x58] sm:$0xff]  ;;  %v766_v22 = vld [vmem:[%s5214_s4 + $0x50] sm:$0xff]  ;;  %v2378_v27 = vld [vmem:[%s5211_s1] sm:$0xff] }
  0x12   :  { %810 = vperm.xlu1 %2498, %v763_v15   ;;  %v770_v23 = vld [vmem:[%s5214_s4 + $0x70] sm:$0xff]  ;;  %v2386_v28 = vld [vmem:[%s5211_s1 + $0x40] sm:$0xff]  ;;  %v2347_v30 = vld [vmem:[%s5210_s0 + $0x4] sm:$0xf0] }
  0x13   :  { %822 = vperm.xlu0 %2497, %v767_v16   ;;  %801 = vperm.xlu2 %2496, %v760_v17   ;;  %v762_v24 = vld [vmem:[%s5214_s4 + $0x30] sm:$0xff]  ;;  %v2156_v29 = vld [vmem:[%s5210_s0] sm:$0xf]  ;;  %v2363_v32 = vld [vmem:[%s5210_s0 + $0x84] sm:$0xf0] }
  0x14   :  { %355 = vmatpush.bf16.msra.mxu0 %v2381_v18  ;;  %2477 = vmatpush.bf16.msra.mxu2 %v2381_v18  ;;  %v2220_v31 = vld [vmem:[%s5210_s0 + $0x80] sm:$0xf]  ;;  %v2346_v33 = vld [vmem:[%s5210_s0 + $0x4] sm:$0xf]  ;;  %v2158_v34 = vld [vmem:[%s5210_s0 + $0x8] sm:$0xf0]  ;;  %v2157_v40 = vor.u32 %v2347_v30, %v2156_v29 }
  0x15   :  { %444 = vmatpush.bf16.msra.mxu1 %v2389_v19  ;;  %2485 = vmatpush.bf16.msra.mxu3 %v2389_v19  ;;  %v2362_v35 = vld [vmem:[%s5210_s0 + $0x84] sm:$0xf]  ;;  %v2222_v36 = vld [vmem:[%s5210_s0 + $0x88] sm:$0xf0]  ;;  %v2221_v41 = vor.u32 %v2363_v32, %v2220_v31  ;;  %v2161_v42 = vor.u32 %v2346_v33, %v2158_v34  ;;  %v2164_v47 = vld [vmem:[%s5210_s0 + $0x10] sm:$0xf] }
  0x16   :  { %v769_v37 = vld [vmem:[%s5214_s4 + $0x68] sm:$0xff]  ;;  %v2225_v43 = vor.u32 %v2362_v35, %v2222_v36  ;;  %v772_v44 = vld [vmem:[%s5214_s4 + $0x80] sm:$0xff]  ;;  %v2349_v48 = vld [vmem:[%s5210_s0 + $0x14] sm:$0xf0] }
  0x17   :  { %v773_v38 = vld [vmem:[%s5214_s4 + $0x88] sm:$0xff]  ;;  %v776_v45 = vld [vmem:[%s5214_s4 + $0xa0] sm:$0xff]  ;;  %v2228_v49 = vld [vmem:[%s5210_s0 + $0x90] sm:$0xf]  ;;  %v2165_v58 = vor.u32 %v2349_v48, %v2164_v47 }
  0x18   :  { %356 = vmatpush.bf16.msra.mxu0 %v2380_v20  ;;  %2478 = vmatpush.bf16.msra.mxu2 %v2380_v20  ;;  %v765_v39 = vld [vmem:[%s5214_s4 + $0x48] sm:$0xff]  ;;  %v768_v46 = vld [vmem:[%s5214_s4 + $0x60] sm:$0xff]  ;;  %v2365_v50 = vld [vmem:[%s5210_s0 + $0x94] sm:$0xf0] }
  0x19   :  { %445 = vmatpush.bf16.msra.mxu1 %v2388_v21  ;;  %2486 = vmatpush.bf16.msra.mxu3 %v2388_v21  ;;  %v2348_v51 = vld [vmem:[%s5210_s0 + $0x14] sm:$0xf]  ;;  %v2166_v52 = vld [vmem:[%s5210_s0 + $0x18] sm:$0xf0]  ;;  %v2229_v59 = vor.u32 %v2365_v50, %v2228_v49  ;;  %v2172_v1 = vld [vmem:[%s5210_s0 + $0x20] sm:$0xf] }
  0x1a   :  { %819 = vperm.xlu1 %2498, %v766_v22   ;;  %v2364_v53 = vld [vmem:[%s5210_s0 + $0x94] sm:$0xf]  ;;  %v2230_v54 = vld [vmem:[%s5210_s0 + $0x98] sm:$0xf0]  ;;  %v2169_v60 = vor.u32 %v2348_v51, %v2166_v52  ;;  %v2351_v2 = vld [vmem:[%s5210_s0 + $0x24] sm:$0xf0] }
  0x1b   :  { %831 = vperm.xlu0 %2497, %v770_v23   ;;  %807 = vperm.xlu2 %2496, %v762_v24   ;;  %v775_v55 = vld [vmem:[%s5214_s4 + $0x98] sm:$0xff]  ;;  %v2233_v61 = vor.u32 %v2364_v53, %v2230_v54  ;;  %v778_v62 = vld [vmem:[%s5214_s4 + $0xb0] sm:$0xff]  ;;  %v2236_v3 = vld [vmem:[%s5210_s0 + $0xa0] sm:$0xf]  ;;  %v2173_v12 = vor.u32 %v2351_v2, %v2172_v1 }
  0x1c   :  { %357 = vmatpush.bf16.msra.mxu0 %v2379_v25  ;;  %2479 = vmatpush.bf16.msra.mxu2 %v2379_v25  ;;  %v779_v56 = vld [vmem:[%s5214_s4 + $0xb8] sm:$0xff]  ;;  %v782_v63 = vld [vmem:[%s5214_s4 + $0xd0] sm:$0xff]  ;;  %v2367_v4 = vld [vmem:[%s5210_s0 + $0xa4] sm:$0xf0] }
  0x1d   :  { %446 = vmatpush.bf16.msra.mxu1 %v2387_v26  ;;  %2487 = vmatpush.bf16.msra.mxu3 %v2387_v26  ;;  %v771_v57 = vld [vmem:[%s5214_s4 + $0x78] sm:$0xff]  ;;  %v774_v0 = vld [vmem:[%s5214_s4 + $0x90] sm:$0xff]  ;;  %v2350_v5 = vld [vmem:[%s5210_s0 + $0x24] sm:$0xf]  ;;  %v2237_v13 = vor.u32 %v2367_v4, %v2236_v3 }
  0x1e   :  { %v2174_v6 = vld [vmem:[%s5210_s0 + $0x28] sm:$0xf0]  ;;  %v2366_v7 = vld [vmem:[%s5210_s0 + $0xa4] sm:$0xf]  ;;  %v2180_v19 = vld [vmem:[%s5210_s0 + $0x30] sm:$0xf] }
  0x1f   :  { %v2238_v8 = vld [vmem:[%s5210_s0 + $0xa8] sm:$0xf0]  ;;  %v2177_v14 = vor.u32 %v2350_v5, %v2174_v6  ;;  %v784_v16 = vld [vmem:[%s5214_s4 + $0xe0] sm:$0xff]  ;;  %v2353_v20 = vld [vmem:[%s5210_s0 + $0x34] sm:$0xf0] }
  0x20   :  { %358 = vmatpush.bf16.msra.mxu0 %v2378_v27  ;;  %2480 = vmatpush.bf16.msra.mxu2 %v2378_v27  ;;  %v781_v9 = vld [vmem:[%s5214_s4 + $0xc8] sm:$0xff]  ;;  %v2241_v15 = vor.u32 %v2366_v7, %v2238_v8  ;;  %v916_v17 = vld [vmem:[%s5215_s5] sm:$0xff]  ;;  %v2244_v21 = vld [vmem:[%s5210_s0 + $0xb0] sm:$0xf]  ;;  %v2181_v30 = vor.u32 %v2353_v20, %v2180_v19 }
  0x21   :  { %447 = vmatpush.bf16.msra.mxu1 %v2386_v28  ;;  %2488 = vmatpush.bf16.msra.mxu3 %v2386_v28  ;;  %v785_v10 = vld [vmem:[%s5214_s4 + $0xe8] sm:$0xff]  ;;  %v780_v18 = vld [vmem:[%s5214_s4 + $0xc0] sm:$0xff]  ;;  %v2369_v22 = vld [vmem:[%s5210_s0 + $0xb4] sm:$0xf0] }
  0x22   :  { %828 = vperm.xlu1 %2498, %v769_v37   ;;  %v777_v11 = vld [vmem:[%s5214_s4 + $0xa8] sm:$0xff]  ;;  %v2352_v23 = vld [vmem:[%s5210_s0 + $0x34] sm:$0xf]  ;;  %v2182_v24 = vld [vmem:[%s5210_s0 + $0x38] sm:$0xf0]  ;;  %v2245_v31 = vor.u32 %v2369_v22, %v2244_v21 }
  0x23   :  { %840 = vperm.xlu0 %2497, %v773_v38   ;;  %816 = vperm.xlu2 %2496, %v765_v39   ;;  %v2368_v25 = vld [vmem:[%s5210_s0 + $0xb4] sm:$0xf]  ;;  %v2246_v26 = vld [vmem:[%s5210_s0 + $0xb8] sm:$0xf0]  ;;  %v2185_v32 = vor.u32 %v2352_v23, %v2182_v24  ;;  %v2188_v37 = vld [vmem:[%s5210_s0 + $0x40] sm:$0xf] }
  0x24   :  { %359 = vmatmul.bf16.vlgmr.msra.gmra.mxu0 %v2157_v40  ;;  %399 = vmatmul.bf16.vlgmr.msra.gmra.mxu2 %v2221_v41  ;;  %v787_v27 = vld [vmem:[%s5214_s4 + $0xf8] sm:$0xff]  ;;  %v2249_v33 = vor.u32 %v2368_v25, %v2246_v26  ;;  %v918_v34 = vld [vmem:[%s5215_s5 + $0x10] sm:$0xff]  ;;  %v2355_v38 = vld [vmem:[%s5210_s0 + $0x44] sm:$0xf0] }
  0x25   :  { %448 = vmatmul.bf16.vlgmr.msra.gmra.mxu1 %v2161_v42  ;;  %488 = vmatmul.bf16.vlgmr.msra.gmra.mxu3 %v2225_v43  ;;  %v919_v28 = vld [vmem:[%s5215_s5 + $0x18] sm:$0xff]  ;;  %v922_v35 = vld [vmem:[%s5215_s5 + $0x30] sm:$0xff]  ;;  %v2252_v39 = vld [vmem:[%s5210_s0 + $0xc0] sm:$0xf]  ;;  %v2189_v48 = vor.u32 %v2355_v38, %v2188_v37  ;;  %v529_v38 = vlaneseq }
  0x26   :  { %v783_v29 = vld [vmem:[%s5214_s4 + $0xd8] sm:$0xff]  ;;  %v786_v36 = vld [vmem:[%s5214_s4 + $0xf0] sm:$0xff]  ;;  %v2371_v40 = vld [vmem:[%s5210_s0 + $0xc4] sm:$0xf0] }
  0x27   :  { %v2354_v41 = vld [vmem:[%s5210_s0 + $0x44] sm:$0xf]  ;;  %v2190_v42 = vld [vmem:[%s5210_s0 + $0x48] sm:$0xf0]  ;;  %v2253_v49 = vor.u32 %v2371_v40, %v2252_v39  ;;  %v923_v1 = vld [vmem:[%s5215_s5 + $0x38] sm:$0xff]  ;;  %v3191_v40 = vand.u32 127, %v529_v38 }
  0x28   :  { %v2370_v43 = vld [vmem:[%s5210_s0 + $0xc4] sm:$0xf]  ;;  %v917_v47 = vld [vmem:[%s5215_s5 + $0x8] sm:$0xff]  ;;  %v2193_v50 = vor.u32 %v2354_v41, %v2190_v42  ;;  %v930_v6 = vld [vmem:[%s5215_s5 + $0x70] sm:$0xff] }
  0x29   :  { %v924_v52 = vld [vmem:[%s5215_s5 + $0x40] sm:$0xff]  ;;  %v934_v7 = vld [vmem:[%s5215_s5 + $0x90] sm:$0xff]  ;;  %v2361_v26 = vld [vmem:[%s5210_s0 + $0x74] sm:$0xf0]  ;;  %vm531_vm0 = vcmp.lt.s32.totalorder %v3191_v40, 5 }
  0x2a   :  { %837 = vperm.xlu1 %2498, %v772_v44   ;;  %v2254_v44 = vld [vmem:[%s5210_s0 + $0xc8] sm:$0xf0]  ;;  %v928_v53 = vld [vmem:[%s5215_s5 + $0x60] sm:$0xff]  ;;  %v926_v8 = vld [vmem:[%s5215_s5 + $0x50] sm:$0xff] }
  0x2b   :  { %849 = vperm.xlu0 %2497, %v776_v45   ;;  %825 = vperm.xlu2 %2496, %v768_v46   ;;  %v921_v45 = vld [vmem:[%s5215_s5 + $0x28] sm:$0xff]  ;;  %v2257_v51 = vor.u32 %v2370_v43, %v2254_v44  ;;  %v920_v54 = vld [vmem:[%s5215_s5 + $0x20] sm:$0xff]  ;;  %v2212_v25 = vld [vmem:[%s5210_s0 + $0x70] sm:$0xf] }
  0x2c   :  { %v925_v46 = vld [vmem:[%s5215_s5 + $0x48] sm:$0xff]  ;;  %v936_v23 = vld [vmem:[%s5215_s5 + $0xa0] sm:$0xff] }
  0x2d   :  { %v932_v24 = vld [vmem:[%s5215_s5 + $0x80] sm:$0xff] }
  0x2e   :  { %v3189_v39 = vld [vmem:[%s5212_s2] ss:$0 sm:$0xff]  ;;  %s2129_s2 = sshll.u32 %s5216_s6, 4  ;;  %s2130_s2 = int_to_ptr.hbm [resolvable:$true] %s2129_s2 }
  0x32   :  { %846 = vperm.xlu1 %2498, %v775_v55   ;;  %v2196_v55 = vld [vmem:[%s5210_s0 + $0x50] sm:$0xf] }
  0x33   :  { %858 = vperm.xlu0 %2497, %v779_v56   ;;  %834 = vperm.xlu2 %2496, %v771_v57   ;;  %v2357_v56 = vld [vmem:[%s5210_s0 + $0x54] sm:$0xf0]  ;;  %v2260_v57 = vld [vmem:[%s5210_s0 + $0xd0] sm:$0xf] }
  0x34   :  { %364 = vmatmul.bf16.gmra.mxu0 %v2165_v58  ;;  %404 = vmatmul.bf16.gmra.mxu2 %v2229_v59  ;;  %v2373_v58 = vld [vmem:[%s5210_s0 + $0xd4] sm:$0xf0]  ;;  %v2356_v59 = vld [vmem:[%s5210_s0 + $0x54] sm:$0xf]  ;;  %v2197_v2 = vor.u32 %v2357_v56, %v2196_v55 }
  0x35   :  { %453 = vmatmul.bf16.gmra.mxu1 %v2169_v60  ;;  %493 = vmatmul.bf16.gmra.mxu3 %v2233_v61  ;;  %v2198_v60 = vld [vmem:[%s5210_s0 + $0x58] sm:$0xf0]  ;;  %v2372_v61 = vld [vmem:[%s5210_s0 + $0xd4] sm:$0xf]  ;;  %v2261_v3 = vor.u32 %v2373_v58, %v2260_v57 }
  0x36   :  { %v2201_v4 = vor.u32 %v2356_v59, %v2198_v60 }
  0x3a   :  { %855 = vperm.xlu1 %2498, %v778_v62   ;;  %v2262_v62 = vld [vmem:[%s5210_s0 + $0xd8] sm:$0xf0] }
  0x3b   :  { %867 = vperm.xlu0 %2497, %v782_v63   ;;  %843 = vperm.xlu2 %2496, %v774_v0   ;;  %v927_v63 = vld [vmem:[%s5215_s5 + $0x58] sm:$0xff]  ;;  %v2265_v5 = vor.u32 %v2372_v61, %v2262_v62  ;;  %v937_v61 = vld [vmem:[%s5215_s5 + $0xa8] sm:$0xff] }
  0x3c   :  { %v931_v0 = vld [vmem:[%s5215_s5 + $0x78] sm:$0xff] }
  0x3d   :  { %v939_v62 = vld [vmem:[%s5215_s5 + $0xb8] sm:$0xff] }
  0x42   :  { %864 = vperm.xlu1 %2498, %v781_v9   ;;  %v2204_v9 = vld [vmem:[%s5210_s0 + $0x60] sm:$0xf] }
  0x43   :  { %876 = vperm.xlu0 %2497, %v785_v10   ;;  %852 = vperm.xlu2 %2496, %v777_v11   ;;  %v2359_v10 = vld [vmem:[%s5210_s0 + $0x64] sm:$0xf0]  ;;  %v2268_v11 = vld [vmem:[%s5210_s0 + $0xe0] sm:$0xf] }
  0x44   :  { %369 = vmatmul.bf16.gmra.mxu0 %v2173_v12  ;;  %409 = vmatmul.bf16.gmra.mxu2 %v2237_v13  ;;  %v2375_v12 = vld [vmem:[%s5210_s0 + $0xe4] sm:$0xf0]  ;;  %v2358_v13 = vld [vmem:[%s5210_s0 + $0x64] sm:$0xf]  ;;  %v2205_v19 = vor.u32 %v2359_v10, %v2204_v9 }
  0x45   :  { %458 = vmatmul.bf16.gmra.mxu1 %v2177_v14  ;;  %498 = vmatmul.bf16.gmra.mxu3 %v2241_v15  ;;  %v2206_v14 = vld [vmem:[%s5210_s0 + $0x68] sm:$0xf0]  ;;  %v2374_v15 = vld [vmem:[%s5210_s0 + $0xe4] sm:$0xf]  ;;  %v2269_v20 = vor.u32 %v2375_v12, %v2268_v11 }
  0x46   :  { %v2209_v21 = vor.u32 %v2358_v13, %v2206_v14 }
  0x4a   :  { %873 = vperm.xlu1 %2498, %v784_v16   ;;  %v2270_v16 = vld [vmem:[%s5210_s0 + $0xe8] sm:$0xf0] }
  0x4b   :  { %949 = vperm.xlu0 %2497, %v916_v17   ;;  %861 = vperm.xlu2 %2496, %v780_v18   ;;  %v933_v17 = vld [vmem:[%s5215_s5 + $0x88] sm:$0xff]  ;;  %v2273_v22 = vor.u32 %v2374_v15, %v2270_v16 }
  0x4c   :  { %v929_v18 = vld [vmem:[%s5215_s5 + $0x68] sm:$0xff] }
  0x52   :  { %882 = vperm.xlu1 %2498, %v787_v27   ;;  %v2276_v27 = vld [vmem:[%s5210_s0 + $0xf0] sm:$0xf] }
  0x53   :  { %958 = vperm.xlu0 %2497, %v919_v28   ;;  %870 = vperm.xlu2 %2496, %v783_v29   ;;  %v2377_v28 = vld [vmem:[%s5210_s0 + $0xf4] sm:$0xf0]  ;;  %v2360_v29 = vld [vmem:[%s5210_s0 + $0x74] sm:$0xf] }
  0x54   :  { %374 = vmatmul.bf16.gmra.mxu0 %v2181_v30  ;;  %414 = vmatmul.bf16.gmra.mxu2 %v2245_v31  ;;  %v2214_v30 = vld [vmem:[%s5210_s0 + $0x78] sm:$0xf0]  ;;  %v2376_v31 = vld [vmem:[%s5210_s0 + $0xf4] sm:$0xf] }
  0x55   :  { %463 = vmatmul.bf16.gmra.mxu1 %v2185_v32  ;;  %503 = vmatmul.bf16.gmra.mxu3 %v2249_v33  ;;  %v2278_v32 = vld [vmem:[%s5210_s0 + $0xf8] sm:$0xf0] }
  0x56   :  { %v935_v33 = vld [vmem:[%s5215_s5 + $0x98] sm:$0xff]  ;;  %v2281_v37 = vor.u32 %v2376_v31, %v2278_v32 }
  0x5a   :  { %955 = vperm.xlu1 %2498, %v918_v34   ;;  %v2213_v34 = vor.u32 %v2361_v26, %v2212_v25 }
  0x5b   :  { %967 = vperm.xlu0 %2497, %v922_v35   ;;  %879 = vperm.xlu2 %2496, %v786_v36   ;;  %v2277_v35 = vor.u32 %v2377_v28, %v2276_v27  ;;  %v2217_v36 = vor.u32 %v2360_v29, %v2214_v30 }
  0x62   :  { %964 = vperm.xlu1 %2498, %v921_v45  }
  0x63   :  { %976 = vperm.xlu0 %2497, %v925_v46   ;;  %952 = vperm.xlu2 %2496, %v917_v47  }
  0x64   :  { %379 = vmatmul.bf16.gmra.mxu0 %v2189_v48  ;;  %419 = vmatmul.bf16.gmra.mxu2 %v2253_v49 }
  0x65   :  { %468 = vmatmul.bf16.gmra.mxu1 %v2193_v50  ;;  %508 = vmatmul.bf16.gmra.mxu3 %v2257_v51 }
  0x6a   :  { %973 = vperm.xlu1 %2498, %v924_v52  }
  0x6b   :  { %985 = vperm.xlu0 %2497, %v928_v53   ;;  %961 = vperm.xlu2 %2496, %v920_v54  }
  0x72   :  { %982 = vperm.xlu1 %2498, %v927_v63   ;;  %v938_v63 = vld [vmem:[%s5215_s5 + $0xb0] sm:$0xff] }
  0x73   :  { %994 = vperm.xlu0 %2497, %v931_v0   ;;  %970 = vperm.xlu2 %2496, %v923_v1  }
  0x74   :  { %384 = vmatmul.bf16.gmra.mxu0 %v2197_v2  ;;  %424 = vmatmul.bf16.gmra.mxu2 %v2261_v3  ;;  %v3227_v0 = vpop.permute.xlu1 %795 }
  0x75   :  { %473 = vmatmul.bf16.gmra.mxu1 %v2201_v4  ;;  %513 = vmatmul.bf16.gmra.mxu3 %v2265_v5  ;;  %v3229_v4 = vpop.permute.xlu2 %789  ;;  %v3241_v13 = vpop.permute.xlu0 %792  ;;  %vm886_vm4 = vcmp.eq.s32.totalorder %v3191_v40, %v3227_v0 }
  0x76   :  { %vm885_vm1 = vcmp.eq.s32.totalorder %v3191_v40, %v3241_v13  ;;  %vm884_vm3 = vcmp.eq.s32.totalorder %v3191_v40, %v3229_v4 }
  0x7a   :  { %991 = vperm.xlu1 %2498, %v930_v6  }
  0x7b   :  { %1003 = vperm.xlu0 %2497, %v934_v7   ;;  %979 = vperm.xlu2 %2496, %v926_v8  }
  0x7c   :  { %v3232_v7 = vpop.permute.xlu1 %804 }
  0x7d   :  { %v3239_v12 = vpop.permute.xlu2 %798  ;;  %vm889_vm6 = vcmp.eq.s32.totalorder %v3191_v40, %v3232_v7 }
  0x7e   :  { %vm887_vm5 = vcmp.eq.s32.totalorder %v3191_v40, %v3239_v12 }
  0x82   :  { %1000 = vperm.xlu1 %2498, %v933_v17  }
  0x83   :  { %988 = vperm.xlu2 %2496, %v929_v18  }
  0x84   :  { %389 = vmatmul.bf16.gmra.mxu0 %v2205_v19  ;;  %429 = vmatmul.bf16.gmra.mxu2 %v2269_v20  ;;  %v3243_v15 = vpop.permute.xlu1 %810 }
  0x85   :  { %478 = vmatmul.bf16.gmra.mxu1 %v2209_v21  ;;  %518 = vmatmul.bf16.gmra.mxu3 %v2273_v22  ;;  %vm5433_vm7 = vcmp.eq.s32.totalorder %v3191_v40, %v3243_v15 }
  0x8a   :  { %1009 = vperm.xlu1 %2498, %v936_v23   ;;  %v3252_v23 = vpop.permute.xlu2 %801 }
  0x8b   :  { %997 = vperm.xlu2 %2496, %v932_v24   ;;  %v3254_v24 = vpop.permute.xlu0 %813  ;;  %vm5447_vm2 = vcmp.eq.s32.totalorder %v3191_v40, %v3252_v23 }
  0x8c   :  { %v3259_v28 = vpop.permute.xlu1 %819  ;;  %vm5475_vm8 = vcmp.eq.s32.totalorder %v3191_v40, %v3254_v24 }
  0x8d   :  { %5488 = vst [vmem:[#allocation14_spill] sm:$0xff] %v3259_v28 }
  0x93   :  { %1006 = vperm.xlu2 %2496, %v935_v33   ;;  %v3278_v38 = vpop.permute.xlu0 %822 }
  0x94   :  { %394 = vmatmul.bf16.gmra.mxu0 %v2213_v34  ;;  %434 = vmatmul.bf16.gmra.mxu2 %v2277_v35  ;;  %v940_v34 = vld [vmem:[%s5215_s5 + $0xc0] sm:$0xff]  ;;  %vm5441_vm9 = vcmp.eq.s32.totalorder %v3191_v40, %v3278_v38 }
  0x95   :  { %483 = vmatmul.bf16.gmra.mxu1 %v2217_v36  ;;  %523 = vmatmul.bf16.gmra.mxu3 %v2281_v37  ;;  %v3276_v37 = vpop.permute.xlu2 %807 }
  0x96   :  { %5491 = vst [vmem:[#allocation17_spill] sm:$0xff] %v3276_v37 }
  0xa1   :  { %v360_v41 = vpop.f32.mrf.mxu0 }
  0xa2   :  { %v361_v42 = vadd.f32 %v3189_v39, %v360_v41  ;;  %v449_v43 = vpop.f32.mrf.mxu1 }
  0xa4   :  { %v3195_v44 = vadd.f32 %v449_v43, %v361_v42  ;;  %v3283_v43 = vpop.permute.xlu1 %828 }
  0xa5   :  { %5492 = vst [vmem:[#allocation18_spill] sm:$0xff] %v3283_v43 }
  0xa6   :  { %5482 = vst [vmem:[#allocation8_spill] sm:$0xff] %v3195_v44  ;;  %v532_v45 = vsel %vm531_vm0, %v3195_v44, -1e+30 }
  0xa7   :  { %v400_v46 = vpop.f32.mrf.mxu2  ;;  %564 = vmax.xlane.f32.xlu0 %v532_v45 }
  0xa8   :  { %v489_v49 = vpop.f32.mrf.mxu3  ;;  %v401_v51 = vadd.f32 %v3189_v39, %v400_v46 }
  0xa9   :  { %v362_v47 = vpop.f32.mrf.mxu0 }
  0xaa   :  { %v363_v48 = vadd.f32 %v3189_v39, %v362_v47  ;;  %v451_v50 = vpop.f32.mrf.mxu1  ;;  %v3207_v54 = vadd.f32 %v489_v49, %v401_v51  ;;  %v3295_v51 = vpop.permute.xlu0 %831 }
  0xab   :  { %5496 = vst [vmem:[#allocation22_spill] sm:$0xff] %v3295_v51  ;;  %v3584_v51 = vld [vmem:[%s5213_s3 + $0x48] sm:$0xff]  }
  0xac   :  { %v3202_v52 = vadd.f32 %v451_v50, %v363_v48  ;;  %5484 = vst [vmem:[#allocation10_spill] sm:$0xff] %v3207_v54  ;;  %v548_v56 = vsel %vm531_vm0, %v3207_v54, -1e+30  ;;  %v3293_v50 = vpop.permute.xlu2 %816 }
  0xad   :  { %5495 = vst [vmem:[#allocation21_spill] sm:$0xff] %v3293_v50 }
  0xae   :  { %5483 = vst [vmem:[#allocation9_spill] sm:$0xff] %v3202_v52  ;;  %v533_v53 = vsel %vm531_vm0, %v3202_v52, -1e+30 }
  0xaf   :  { %566 = vmax.xlane.f32.xlu0 %v533_v53  ;;  %v402_v55 = vpop.f32.mrf.mxu2 }
  0xb0   :  { %v403_v57 = vadd.f32 %v3189_v39, %v402_v55  ;;  %v491_v58 = vpop.f32.mrf.mxu3  ;;  %v3300_v55 = vpop.permute.xlu1 %837 }
  0xb1   :  { %v365_v1 = vpop.f32.mrf.mxu0  ;;  %5497 = vst [vmem:[#allocation23_spill] sm:$0xff] %v3300_v55 }
  0xb2   :  { %v3213_v59 = vadd.f32 %v491_v58, %v403_v57  ;;  %v454_v2 = vpop.f32.mrf.mxu1  ;;  %v366_v16 = vadd.f32 %v3189_v39, %v365_v1  ;;  %v3304_v57 = vpop.permute.xlu0 %840 }
  0xb3   :  { %5499 = vst [vmem:[#allocation25_spill] sm:$0xff] %v3304_v57 }
  0xb4   :  { %596 = vmax.xlane.f32.xlu1 %v548_v56  ;;  %5485 = vst [vmem:[#allocation11_spill] sm:$0xff] %v3213_v59  ;;  %v549_v60 = vsel %vm531_vm0, %v3213_v59, -1e+30  ;;  %v3246_v19 = vadd.f32 %v454_v2, %v366_v16  ;;  %v3302_v56 = vpop.permute.xlu2 %825  ;;  %v941_v2 = vld [vmem:[%s5215_s5 + $0xc8] sm:$0xff] }
  0xb5   :  { %5498 = vst [vmem:[#allocation24_spill] sm:$0xff] %v3302_v56 }
  0xb6   :  { %v534_v22 = vsel %vm531_vm0, %v3246_v19, -1e+30 }
  0xb7   :  { %v405_v3 = vpop.f32.mrf.mxu2 }
  0xb8   :  { %v406_v5 = vadd.f32 %v3189_v39, %v405_v3  ;;  %v494_v6 = vpop.f32.mrf.mxu3  ;;  %v3306_v58 = vpop.permute.xlu1 %846 }
  0xb9   :  { %v367_v8 = vpop.f32.mrf.mxu0  ;;  %5500 = vst [vmem:[#allocation26_spill] sm:$0xff] %v3306_v58 }
  0xba   :  { %v3234_v9 = vadd.f32 %v494_v6, %v406_v5  ;;  %v456_v11 = vpop.f32.mrf.mxu1  ;;  %v368_v25 = vadd.f32 %v3189_v39, %v367_v8 }
  0xbc   :  { %598 = vmax.xlane.f32.xlu2 %v549_v60  ;;  %5486 = vst [vmem:[#allocation12_spill] sm:$0xff] %v3234_v9  ;;  %v550_v10 = vsel %vm531_vm0, %v3234_v9, -1e+30  ;;  %v3264_v30 = vadd.f32 %v456_v11, %v368_v25  ;;  %v942_v60 = vld [vmem:[%s5215_s5 + $0xd0] sm:$0xff] }
  0xbe   :  { %5489 = vst [vmem:[#allocation15_spill] sm:$0xff] %v3264_v30  ;;  %v535_v33 = vsel %vm531_vm0, %v3264_v30, -1e+30 }
  0xbf   :  { %v407_v14 = vpop.f32.mrf.mxu2 }
  0xc0   :  { %v496_v18 = vpop.f32.mrf.mxu3  ;;  %v408_v35 = vadd.f32 %v3189_v39, %v407_v14  ;;  %v3315_v1 = vpop.permute.xlu1 %855 }
  0xc1   :  { %v370_v17 = vpop.f32.mrf.mxu0  ;;  %5503 = vst [vmem:[#allocation29_spill] sm:$0xff] %v3315_v1 }
  0xc2   :  { %v371_v20 = vadd.f32 %v3189_v39, %v370_v17  ;;  %v459_v21 = vpop.f32.mrf.mxu1  ;;  %v3285_v45 = vadd.f32 %v496_v18, %v408_v35 }
  0xc3   :  { %1012 = vperm.xlu0 %2497, %v937_v61   ;;  %v3311_v61 = vpop.permute.xlu2 %834 }
  0xc4   :  { %v3257_v26 = vadd.f32 %v459_v21, %v371_v20  ;;  %5493 = vst [vmem:[#allocation19_spill] sm:$0xff] %v3285_v45  ;;  %v551_v47 = vsel %vm531_vm0, %v3285_v45, -1e+30 }
  0xc5   :  { %5501 = vst [vmem:[#allocation27_spill] sm:$0xff] %v3311_v61 }
  0xc6   :  { %5487 = vst [vmem:[#allocation13_spill] sm:$0xff] %v3257_v26  ;;  %v536_v29 = vsel %vm531_vm0, %v3257_v26, -1e+30 }
  0xc7   :  { %v410_v27 = vpop.f32.mrf.mxu2 }
  0xc8   :  { %v411_v31 = vadd.f32 %v3189_v39, %v410_v27  ;;  %v499_v32 = vpop.f32.mrf.mxu3  ;;  %v3331_v18 = vpop.permute.xlu1 %864 }
  0xc9   :  { %v372_v42 = vpop.f32.mrf.mxu0  ;;  %5507 = vst [vmem:[#allocation33_spill] sm:$0xff] %v3331_v18 }
  0xca   :  { %v3274_v36 = vadd.f32 %v499_v32, %v411_v31  ;;  %v373_v46 = vadd.f32 %v3189_v39, %v372_v42  ;;  %v461_v48 = vpop.f32.mrf.mxu1 }
  0xcc   :  { %5490 = vst [vmem:[#allocation16_spill] sm:$0xff] %v3274_v36  ;;  %v552_v41 = vsel %vm531_vm0, %v3274_v36, -1e+30  ;;  %v3291_v49 = vadd.f32 %v461_v48, %v373_v46 }
  0xcd   :  { %1018 = vperm.xlu1 %2498, %v939_v62   ;;  %v3313_v62 = vpop.permute.xlu0 %849  ;;  %v5695_v12 = vld [vmem:[#allocation13_spill] sm:$0xff] }
  0xce   :  { %5494 = vst [vmem:[#allocation20_spill] sm:$0xff] %v3291_v49  ;;  %v537_v53 = vsel %vm531_vm0, %v3291_v49, -1e+30 }
  0xcf   :  { %5502 = vst [vmem:[#allocation28_spill] sm:$0xff] %v3313_v62 }
  0xd0   :  { %v501_v5 = vpop.f32.mrf.mxu3  ;;  %v3342_v27 = vpop.permute.xlu1 %873 }
  0xd1   :  { %v375_v6 = vpop.f32.mrf.mxu0  ;;  %5511 = vst [vmem:[#allocation37_spill] sm:$0xff] %v3342_v27 }
  0xd2   :  { %v376_v14 = vadd.f32 %v3189_v39, %v375_v6  ;;  %v464_v17 = vpop.f32.mrf.mxu1 }
  0xd4   :  { %1015 = vperm.xlu2 %2496, %v938_v63   ;;  %v412_v63 = vpop.f32.mrf.mxu2  ;;  %v3333_v20 = vadd.f32 %v464_v17, %v376_v14 }
  0xd5   :  { %v413_v3 = vadd.f32 %v3189_v39, %v412_v63  ;;  %v3325_v11 = vpop.permute.xlu0 %858 }
  0xd6   :  { %5506 = vst [vmem:[#allocation32_spill] sm:$0xff] %v3325_v11  ;;  %v538_v21 = vsel %vm531_vm0, %v3333_v20, -1e+30 }
  0xd7   :  { %v3321_v8 = vadd.f32 %v501_v5, %v413_v3  ;;  %5508 = vst [vmem:[#allocation34_spill] sm:$0xff] %v3333_v20 }
  0xd9   :  { %5504 = vst [vmem:[#allocation30_spill] sm:$0xff] %v3321_v8  ;;  %v553_v16 = vsel %vm531_vm0, %v3321_v8, -1e+30  ;;  %v377_v35 = vpop.f32.mrf.mxu0 }
  0xda   :  { %v466_v42 = vpop.f32.mrf.mxu1  ;;  %v378_v14 = vadd.f32 %v3189_v39, %v377_v35 }
  0xdd   :  { %v3340_v25 = vpop.permute.xlu0 %867 }
  0xde   :  { %5510 = vst [vmem:[#allocation36_spill] sm:$0xff] %v3340_v25 }
  0xe1   :  { %v380_v6 = vpop.f32.mrf.mxu0 }
  0xe2   :  { %v381_v17 = vadd.f32 %v3189_v39, %v380_v6 }
  0xe5   :  { %v3346_v32 = vpop.permute.xlu0 %876 }
  0xe6   :  { %5513 = vst [vmem:[#allocation39_spill] sm:$0xff] %v3346_v32 }
  0xed   :  { %600 = vmax.xlane.f32.xlu0 %v550_v10  ;;  %v3323_v10 = vpop.permute.xlu2 %843  ;;  %v3359_v63 = vpop.permute.xlu0 %949 }
  0xee   :  { %5505 = vst [vmem:[#allocation31_spill] sm:$0xff] %v3323_v10 }
  0xef   :  { %5517 = vst [vmem:[#allocation43_spill] sm:$0xff] %v3359_v63 }
  0xf5   :  { %v3382_v35 = vpop.permute.xlu0 %958 }
  0xf6   :  { %5522 = vst [vmem:[#allocation48_spill] sm:$0xff] %v3382_v35 }
  0xf7   :  { %568 = vmax.xlane.f32.xlu1 %v534_v22  ;;  %v3338_v22 = vpop.permute.xlu2 %852 }
  0xf8   :  { %5509 = vst [vmem:[#allocation35_spill] sm:$0xff] %v3338_v22 }
  0xfd   :  { %572 = vmax.xlane.f32.xlu2 %v536_v29  ;;  %v415_v29 = vpop.f32.mrf.mxu2 }
  0xff   :  { %570 = vmax.xlane.f32.xlu1 %v535_v33  ;;  %v3344_v31 = vpop.permute.xlu2 %861  ;;  %v504_v33 = vpop.f32.mrf.mxu3 }
 0x100   :  { %5512 = vst [vmem:[#allocation38_spill] sm:$0xff] %v3344_v31 }
 0x101   :  { %1021 = vperm.xlu0 %2497, %v940_v34   ;;  %v3348_v34 = vpop.permute.xlu1 %882 }
 0x102   :  { %5514 = vst [vmem:[#allocation40_spill] sm:$0xff] %v3348_v34 }
 0x105   :  { %604 = vmax.xlane.f32.xlu2 %v552_v41  ;;  %v416_v41 = vadd.f32 %v3189_v39, %v415_v29  ;;  %v417_v46 = vpop.f32.mrf.mxu2  ;;  %v469_v29 = vpop.f32.mrf.mxu1 }
 0x107   :  { %602 = vmax.xlane.f32.xlu1 %v551_v47  ;;  %v943_v47 = vld [vmem:[%s5215_s5 + $0xd8] sm:$0xff]  ;;  %v3354_v48 = vpop.permute.xlu2 %870 }
 0x108   :  { %5515 = vst [vmem:[#allocation41_spill] sm:$0xff] %v3354_v48 }
 0x109   :  { %v3364_v5 = vpop.permute.xlu1 %955 }
 0x10a   :  { %5518 = vst [vmem:[#allocation44_spill] sm:$0xff] %v3364_v5 }
 0x10d   :  { %574 = vmax.xlane.f32.xlu2 %v537_v53  ;;  %v3356_v53 = vadd.f32 %v504_v33, %v416_v41  ;;  %v3373_v33 = vadd.f32 %v466_v42, %v378_v14  ;;  %v3375_v41 = vadd.f32 %v469_v29, %v381_v17  ;;  %v420_v14 = vpop.f32.mrf.mxu2  ;;  %v471_v31 = vpop.f32.mrf.mxu1 }
 0x10f   :  { %5516 = vst [vmem:[#allocation42_spill] sm:$0xff] %v3356_v53  ;;  %v554_v3 = vsel %vm531_vm0, %v3356_v53, -1e+30 }
 0x110   :  { %5520 = vst [vmem:[#allocation46_spill] sm:$0xff] %v3375_v41 }
 0x115   :  { %v422_v48 = vpop.f32.mrf.mxu2  ;;  %v474_v34 = vpop.f32.mrf.mxu1 }
 0x120   :  { %1027 = vperm.xlu1 %2498, %v942_v60   ;;  %v418_v60 = vadd.f32 %v3189_v39, %v417_v46  ;;  %v539_v46 = vsel %vm531_vm0, %v3373_v33, -1e+30 }
 0x125   :  { %1024 = vperm.xlu2 %2496, %v941_v2   ;;  %v506_v2 = vpop.f32.mrf.mxu3 }
 0x12b   :  { %606 = vmax.xlane.f32.xlu0 %v553_v16  ;;  %v3367_v16 = vadd.f32 %v506_v2, %v418_v60  ;;  %v540_v60 = vsel %vm531_vm0, %v3375_v41, -1e+30  ;;  %v3387_v2 = vpop.permute.xlu1 %964 }
 0x12c   :  { %5523 = vst [vmem:[#allocation49_spill] sm:$0xff] %v3387_v2 }
 0x12d   :  { %5519 = vst [vmem:[#allocation45_spill] sm:$0xff] %v3367_v16  ;;  %v509_v29 = vpop.f32.mrf.mxu3 }
 0x133   :  { %576 = vmax.xlane.f32.xlu0 %v538_v21  ;;  %v555_v21 = vsel %vm531_vm0, %v3367_v16, -1e+30  ;;  %v3393_v6 = vpop.permute.xlu1 %973 }
 0x134   :  { %5526 = vst [vmem:[#allocation52_spill] sm:$0xff] %v3393_v6 }
 0x135   :  { %v511_v2 = vpop.f32.mrf.mxu3 }
 0x147   :  { %1030 = vperm.xlu0 %2497, %v943_v47   ;;  %v3380_v47 = vpop.permute.xlu2 %879 }
 0x148   :  { %5521 = vst [vmem:[#allocation47_spill] sm:$0xff] %v3380_v47  ;;  %v421_v47 = vadd.f32 %v3189_v39, %v420_v14 }
 0x14a   :  { %608 = vmax.xlane.f32.xlu1 %v554_v3  ;;  %v3391_v3 = vpop.permute.xlu0 %967  ;;  %v3408_v6 = vadd.f32 %v509_v29, %v421_v47  ;;  %v425_v29 = vpop.f32.mrf.mxu2 }
 0x14b   :  { %5525 = vst [vmem:[#allocation51_spill] sm:$0xff] %v3391_v3 }
 0x14c   :  { %5530 = vst [vmem:[#allocation56_spill] sm:$0xff] %v3408_v6 }
 0x14e   :  { %610 = vmax.xlane.f32.xlu2 %v555_v21 }
 0x14f   :  { %v3389_v42 = vpop.permute.xlu2 %952 }
 0x150   :  { %5524 = vst [vmem:[#allocation50_spill] sm:$0xff] %v3389_v42  ;;  %v944_v42 = vld [vmem:[%s5215_s5 + $0xe0] sm:$0xff] }
 0x152   :  { %578 = vmax.xlane.f32.xlu1 %v539_v46  ;;  %v3397_v21 = vpop.permute.xlu0 %976  ;;  %v3399_v46 = vpop.permute.xlu1 %982 }
 0x153   :  { %5528 = vst [vmem:[#allocation54_spill] sm:$0xff] %v3397_v21 }
 0x154   :  { %5529 = vst [vmem:[#allocation55_spill] sm:$0xff] %v3399_v46  ;;  %v382_v46 = vpop.f32.mrf.mxu0 }
 0x156   :  { %580 = vmax.xlane.f32.xlu2 %v540_v60  ;;  %v945_v60 = vld [vmem:[%s5215_s5 + $0xe8] sm:$0xff] }
 0x157   :  { %v3395_v17 = vpop.permute.xlu2 %961 }
 0x158   :  { %5527 = vst [vmem:[#allocation53_spill] sm:$0xff] %v3395_v17  ;;  %v556_v17 = vsel %vm531_vm0, %v3408_v6, -1e+30 }
 0x15a   :  { %v3415_v14 = vpop.permute.xlu0 %985  ;;  %v3418_v3 = vpop.permute.xlu1 %991 }
 0x15b   :  { %5532 = vst [vmem:[#allocation58_spill] sm:$0xff] %v3415_v14  ;;  %v514_v14 = vpop.f32.mrf.mxu3 }
 0x15c   :  { %5533 = vst [vmem:[#allocation59_spill] sm:$0xff] %v3418_v3 }
 0x15f   :  { %v3413_v21 = vpop.permute.xlu2 %970 }
 0x160   :  { %5531 = vst [vmem:[#allocation57_spill] sm:$0xff] %v3413_v21 }
 0x162   :  { %v3427_v21 = vpop.permute.xlu0 %994  ;;  %v3429_v35 = vpop.permute.xlu1 %1000 }
 0x163   :  { %5536 = vst [vmem:[#allocation62_spill] sm:$0xff] %v3427_v21 }
 0x164   :  { %5537 = vst [vmem:[#allocation63_spill] sm:$0xff] %v3429_v35 }
 0x167   :  { %v3425_v5 = vpop.permute.xlu2 %979 }
 0x168   :  { %5535 = vst [vmem:[#allocation61_spill] sm:$0xff] %v3425_v5 }
 0x16a   :  { %v3439_v22 = vpop.permute.xlu1 %1009 }
 0x16b   :  { %1036 = vperm.xlu1 %2498, %v945_v60   ;;  %v383_v60 = vadd.f32 %v3189_v39, %v382_v46  ;;  %v385_v46 = vpop.f32.mrf.mxu0  ;;  %5540 = vst [vmem:[#allocation66_spill] sm:$0xff] %v3439_v22  ;;  %v476_v22 = vpop.f32.mrf.mxu1 }
 0x16d   :  { %v3420_v47 = vadd.f32 %v471_v31, %v383_v60  ;;  %v3435_v31 = vpop.permute.xlu0 %1003  ;;  %v3437_v60 = vpop.f32.mrf.mxu3 }
 0x16e   :  { %1033 = vperm.xlu2 %2496, %v944_v42   ;;  %5539 = vst [vmem:[#allocation65_spill] sm:$0xff] %v3435_v31  ;;  %v426_v31 = vadd.f32 %v3189_v39, %v425_v29 }
 0x16f   :  { %5534 = vst [vmem:[#allocation60_spill] sm:$0xff] %v3420_v47  ;;  %v541_v42 = vsel %vm531_vm0, %v3420_v47, -1e+30  ;;  %v3433_v3 = vpop.permute.xlu2 %988 }
 0x170   :  { %5538 = vst [vmem:[#allocation64_spill] sm:$0xff] %v3433_v3  ;;  %v423_v3 = vadd.f32 %v3189_v39, %v422_v48  ;;  %v3454_v61 = vadd.f32 %v514_v14, %v426_v31  ;;  %v386_v48 = vadd.f32 %v3189_v39, %v385_v46 }
 0x171   :  { %612 = vmax.xlane.f32.xlu0 %v556_v17  ;;  %v3431_v17 = vpop.f32.mrf.mxu2 }
 0x172   :  { %v3450_v10 = vpop.xlane.xlu1 %596  ;;  %v3452_v32 = vadd.f32 %v511_v2, %v423_v3  ;;  %5545 = vst [vmem:[#allocation71_spill] sm:$0xff] %v3454_v61  ;;  %v3474_v56 = vadd.f32 %v474_v34, %v386_v48 }
 0x173   :  { %v387_v35 = vpop.f32.mrf.mxu0  ;;  %5543 = vst [vmem:[#allocation69_spill] sm:$0xff] %v3450_v10  ;;  %v479_v1 = vpop.f32.mrf.mxu1 }
 0x174   :  { %5544 = vst [vmem:[#allocation70_spill] sm:$0xff] %v3452_v32  ;;  %v557_v18 = vsel %vm531_vm0, %v3452_v32, -1e+30  ;;  %v388_v14 = vadd.f32 %v3189_v39, %v387_v35  ;;  %v542_v46 = vsel %vm531_vm0, %v3474_v56, -1e+30 }
 0x175   :  { %v3444_v21 = vpop.xlane.xlu0 %564  ;;  %v519_v27 = vpop.f32.mrf.mxu3 }
 0x176   :  { %5541 = vst [vmem:[#allocation67_spill] sm:$0xff] %v3444_v21  ;;  %v3476_v11 = vadd.f32 %v476_v22, %v388_v14 }
 0x177   :  { %v3446_v63 = vpop.permute.xlu2 %997 }
 0x178   :  { %5542 = vst [vmem:[#allocation68_spill] sm:$0xff] %v3446_v63  ;;  %v543_v35 = vsel %vm531_vm0, %v3476_v11, -1e+30 }
 0x179   :  { %582 = vmax.xlane.f32.xlu0 %v541_v42  ;;  %v946_v42 = vld [vmem:[%s5215_s5 + $0xf0] sm:$0xff]  ;;  %v430_v5 = vpop.f32.mrf.mxu2 }
 0x17a   :  { %v3467_v25 = vpop.permute.xlu1 %1018 }
 0x17b   :  { %5547 = vst [vmem:[#allocation73_spill] sm:$0xff] %v3467_v25  ;;  %v390_v2 = vpop.f32.mrf.mxu0  ;;  %v481_v50 = vpop.f32.mrf.mxu1 }
 0x17d   :  { %v3465_v29 = vpop.xlane.xlu0 %566  ;;  %v3472_v31 = vpop.f32.mrf.mxu3 }
 0x17e   :  { %5546 = vst [vmem:[#allocation72_spill] sm:$0xff] %v3465_v29 }
 0x17f   :  { %v3469_v3 = vpop.permute.xlu2 %1006 }
 0x180   :  { %5548 = vst [vmem:[#allocation74_spill] sm:$0xff] %v3469_v3  ;;  %v628_v3 = vsub.f32 %v3195_v44, %v3444_v21 }
 0x181   :  { %v3462_v63 = vpop.f32.mrf.mxu2 }
 0x185   :  { %v3482_v25 = vpop.permute.xlu0 %1012 }
 0x186   :  { %5549 = vst [vmem:[#allocation75_spill] sm:$0xff] %v3482_v25 }
 0x187   :  { %v3491_v22 = vpop.xlane.xlu2 %598 }
 0x188   :  { %5552 = vst [vmem:[#allocation78_spill] sm:$0xff] %v3491_v22 }
 0x189   :  { %v435_v34 = vpop.f32.mrf.mxu2 }
 0x18d   :  { %1039 = vperm.xlu0 %2497, %v946_v42   ;;  %v558_v42 = vsel %vm531_vm0, %v3454_v61, -1e+30  ;;  %v3499_v58 = vpop.xlane.xlu0 %600 }
 0x18e   :  { %5553 = vst [vmem:[#allocation79_spill] sm:$0xff] %v3499_v58 }
 0x18f   :  { %v3507_v55 = vpop.permute.xlu2 %1015 }
 0x190   :  { %5556 = vst [vmem:[#allocation82_spill] sm:$0xff] %v3507_v55  ;;  %v3526_v55 = vld [vmem:[%s5213_s3] sm:$0xff]  }
 0x191   :  { %v437_v62 = vpop.f32.mrf.mxu2 }
 0x195   :  { %614 = vmax.xlane.f32.xlu1 %v557_v18  ;;  %v431_v18 = vadd.f32 %v3189_v39, %v430_v5  ;;  %v392_v5 = vpop.f32.mrf.mxu0 }
 0x196   :  { %v393_v25 = vadd.f32 %v3189_v39, %v392_v5 }
 0x197   :  { %616 = vmax.xlane.f32.xlu2 %v558_v42  ;;  %v3484_v42 = vpop.xlane.xlu1 %568  ;;  %v3489_v48 = vadd.f32 %v519_v27, %v431_v18  ;;  %v660_v27 = vsel %vm531_vm0, %v628_v3, -1e+30  ;;  %v3515_v3 = vpop.permute.xlu0 %1021  ;;  %v5688_v4 = vld [vmem:[#allocation82_spill] sm:$0xff] }
 0x198   :  { %5550 = vst [vmem:[#allocation76_spill] sm:$0xff] %v3484_v42  ;;  %v3503_v18 = vadd.f32 %v481_v50, %v393_v25  ;;  %v692_v37 = vmul.f32 1.442695, %v660_v27  ;;  %v428_v25 = vadd.f32 %v3189_v39, %v3431_v17 }
 0x199   :  { %5551 = vst [vmem:[#allocation77_spill] sm:$0xff] %v3489_v48  ;;  %v560_v14 = vsel %vm531_vm0, %v3489_v48, -1e+30 }
 0x19a   :  { %5554 = vst [vmem:[#allocation80_spill] sm:$0xff] %v3503_v18  ;;  %v545_v21 = vsel %vm531_vm0, %v3503_v18, -1e+30  ;;  %2500 = vpow2.f32 %v692_v37 }
 0x19b   :  { %5557 = vst [vmem:[#allocation83_spill] sm:$0xff] %v3515_v3 }
 0x19d   :  { %584 = vmax.xlane.f32.xlu1 %v542_v46  ;;  %v524_v46 = vpop.f32.mrf.mxu3 }
 0x19f   :  { %586 = vmax.xlane.f32.xlu2 %v543_v35  ;;  %v3505_v35 = vpop.xlane.xlu1 %570 }
 0x1a0   :  { %5555 = vst [vmem:[#allocation81_spill] sm:$0xff] %v3505_v35  ;;  %v631_v5 = vsub.f32 %v3264_v30, %v3505_v35  ;;  %v3528_v35 = vpop.xlane.xlu2 %572  ;;  %v2501_v17 = vpop.eup %2500 }
 0x1a1   :  { %5559 = vst [vmem:[#allocation85_spill] sm:$0xff] %v3528_v35  ;;  %v3543_v30 = vpop.xlane.xlu0 %606 }
 0x1a2   :  { %v663_v50 = vsel %vm531_vm0, %v631_v5, -1e+30  ;;  %v2396_v5 = vunpack.c.l.bf16 %v3526_v55  ;;  %5561 = vst [vmem:[#allocation87_spill] sm:$0xff] %v3543_v30 }
 0x1a5   :  { %620 = vmax.xlane.f32.xlu1 %v560_v14  ;;  %v438_v14 = vadd.f32 %v3189_v39, %v437_v62  ;;  %v526_v44 = vpop.f32.mrf.mxu3  ;;  %v698_v62 = vmul.f32 1.442695, %v663_v50  ;;  %v391_v50 = vadd.f32 %v3189_v39, %v390_v2  ;;  %v3559_v2 = vld [vmem:[%s5213_s3 + $0x8] sm:$0xff]  }
 0x1a7   :  { %v3521_v27 = vadd.f32 %v526_v44, %v438_v14  ;;  %v3537_v44 = vadd.f32 %v3437_v60, %v428_v25  ;;  %v947_v14 = vld [vmem:[%s5215_s5 + $0xf8] sm:$0xff]  ;;  %2502 = vpow2.f32 %v698_v62  ;;  %v3550_v60 = vmul.f32 %v2501_v17, %v2396_v5  ;;  %v3552_v25 = vpop.f32.mrf.mxu0 }
 0x1a8   :  { %v649_v62 = vsub.f32 %v3321_v8, %v3543_v30  ;;  %v3565_v5 = vpop.xlane.xlu2 %604 }
 0x1a9   :  { %5558 = vst [vmem:[#allocation84_spill] sm:$0xff] %v3521_v27  ;;  %v563_v37 = vsel %vm531_vm0, %v3521_v27, -1e+30  ;;  %v559_v3 = vsel %vm531_vm0, %v3537_v44, -1e+30  ;;  %v1172_v57 = vsub.f32 %v2501_v17, %v3550_v60  ;;  %v3579_v8 = vpop.xlane.xlu0 %576 }
 0x1aa   :  { %5560 = vst [vmem:[#allocation86_spill] sm:$0xff] %v3537_v44  ;;  %v681_v17 = vsel %vm531_vm0, %v649_v62, -1e+30  ;;  %v634_v62 = vsub.f32 %v3333_v20, %v3579_v8 }
 0x1ab   :  { %5563 = vst [vmem:[#allocation89_spill] sm:$0xff] %v3565_v5 }
 0x1ac   :  { %5564 = vst [vmem:[#allocation90_spill] sm:$0xff] %v3579_v8 }
 0x1ad   :  { %590 = vmax.xlane.f32.xlu1 %v545_v21  ;;  %v646_v21 = vsub.f32 %v3234_v9, %v3499_v58  ;;  %v3554_v9 = vadd.f32 %v479_v1, %v391_v50  ;;  %v436_v50 = vadd.f32 %v3189_v39, %v435_v34  ;;  %v734_v34 = vmul.f32 1.442695, %v681_v17 }
 0x1af   :  { %v678_v58 = vsel %vm531_vm0, %v646_v21, -1e+30  ;;  %5562 = vst [vmem:[#allocation88_spill] sm:$0xff] %v3554_v9  ;;  %v2503_v21 = vpop.eup %2502  ;;  %v544_v1 = vsel %vm531_vm0, %v3554_v9, -1e+30 }
 0x1b5   :  { %626 = vmax.xlane.f32.xlu1 %v563_v37  ;;  %v728_v37 = vmul.f32 1.442695, %v678_v58  ;;  %v3570_v58 = vpop.f32.mrf.mxu1 }
 0x1b7   :  { %618 = vmax.xlane.f32.xlu0 %v559_v3  ;;  %1042 = vperm.xlu2 %2496, %v947_v14   ;;  %v2401_v3 = vunpack.c.h.bf16 %v3559_v2  ;;  %v629_v14 = vsub.f32 %v3202_v52, %v3465_v29  ;;  %2504 = vpow2.f32 %v728_v37  ;;  %v397_v37 = vpop.f32.mrf.mxu0 }
 0x1b8   :  { %2506 = vpow2.f32 %v734_v34 }
 0x1b9   :  { %v3577_v30 = vmul.f32 %v2503_v21, %v2401_v3  ;;  %v661_v29 = vsel %vm531_vm0, %v629_v14, -1e+30  ;;  %v645_v14 = vsub.f32 %v3213_v59, %v3491_v22 }
 0x1ba   :  { %v694_v43 = vmul.f32 1.442695, %v661_v29 }
 0x1bb   :  { %v1175_v3 = vsub.f32 %v2503_v21, %v3577_v30  ;;  %v666_v21 = vsel %vm531_vm0, %v634_v62, -1e+30  ;;  %v677_v29 = vsel %vm531_vm0, %v645_v14, -1e+30  ;;  %v2397_v14 = vunpack.c.h.bf16 %v3526_v55 }
 0x1bc   :  { %2508 = vpow2.f32 %v694_v43  ;;  %v704_v22 = vmul.f32 1.442695, %v666_v21  ;;  %v3630_v21 = vld [vmem:[%s5213_s3 + $0x18] sm:$0xff]  }
 0x1bd   :  { %1204 = vadd.xlane.f32.xlu1 %v1172_v57  ;;  %v3588_v57 = vadd.f32 %v524_v46, %v436_v50  ;;  %v2505_v52 = vpop.eup %2504  ;;  %v398_v46 = vadd.f32 %v3189_v39, %v397_v37  ;;  %v3600_v50 = vpop.xlane.xlu2 %574  ;;  %v3613_v37 = vld [vmem:[%s5213_s3 + $0x50] sm:$0xff]  }
 0x1be   :  { %5566 = vst [vmem:[#allocation92_spill] sm:$0xff] %v3600_v50  ;;  %v486_v17 = vpop.f32.mrf.mxu1  ;;  %v2507_v62 = vpop.eup %2506  ;;  %2510 = vpow2.f32 %v704_v22  ;;  %v2408_v22 = vunpack.c.l.bf16 %v3630_v21 }
 0x1bf   :  { %588 = vmax.xlane.f32.xlu0 %v544_v1  ;;  %5565 = vst [vmem:[#allocation91_spill] sm:$0xff] %v3588_v57  ;;  %v2432_v1 = vunpack.c.l.bf16 %v3584_v51  ;;  %v562_v28 = vsel %vm531_vm0, %v3588_v57, -1e+30  ;;  %v3608_v20 = vadd.f32 %v486_v17, %v398_v46 }
 0x1c1   :  { %v3604_v8 = vmul.f32 %v2505_v52, %v2432_v1  ;;  %v547_v43 = vsel %vm531_vm0, %v3608_v20, -1e+30  ;;  %v633_v1 = vsub.f32 %v3291_v49, %v3600_v50 }
 0x1c2   :  { %v2509_v46 = vpop.eup %2508 }
 0x1c3   :  { %v1190_v34 = vsub.f32 %v2505_v52, %v3604_v8  ;;  %v3634_v50 = vmul.f32 %v2509_v46, %v2397_v14 }
 0x1c5   :  { %1210 = vadd.xlane.f32.xlu1 %v1175_v3  ;;  %v2437_v3 = vunpack.c.h.bf16 %v3613_v37  ;;  %v3625_v52 = vpop.permute.xlu2 %1024  ;;  %v1173_v59 = vsub.f32 %v2509_v46, %v3634_v50 }
 0x1c6   :  { %5567 = vst [vmem:[#allocation93_spill] sm:$0xff] %v3625_v52 }
 0x1c7   :  { %624 = vmax.xlane.f32.xlu0 %v562_v28  ;;  %v726_v28 = vmul.f32 1.442695, %v677_v29  ;;  %v3623_v17 = vmul.f32 %v2507_v62, %v2437_v3  ;;  %v665_v29 = vsel %vm531_vm0, %v633_v1, -1e+30 }
 0x1c8   :  { %v702_v3 = vmul.f32 1.442695, %v665_v29  ;;  %v433_v29 = vadd.f32 %v3189_v39, %v3462_v63 }
 0x1c9   :  { %2512 = vpow2.f32 %v726_v28  ;;  %v1193_v55 = vsub.f32 %v2507_v62, %v3623_v17  ;;  %v3641_v28 = vld [vmem:[%s5213_s3 + $0x40] sm:$0xff]   ;;  %v630_v62 = vsub.f32 %v3246_v19, %v3484_v42  ;;  %v3667_v42 = vpop.permute.xlu0 %1030 }
 0x1ca   :  { %v2429_v1 = vunpack.c.h.bf16 %v3641_v28  ;;  %2514 = vpow2.f32 %v702_v3  ;;  %v3672_v3 = vld [vmem:[%s5213_s3 + $0x10] sm:$0xff]  }
 0x1cd   :  { %1240 = vadd.xlane.f32.xlu1 %v1190_v34  ;;  %v2511_v34 = vpop.eup %2510  ;;  %v3653_v52 = vpop.xlane.xlu2 %610 }
 0x1ce   :  { %v3649_v49 = vmul.f32 %v2511_v34, %v2408_v22  ;;  %5568 = vst [vmem:[#allocation94_spill] sm:$0xff] %v3653_v52  ;;  %v644_v22 = vsub.f32 %v3207_v54, %v3450_v10 }
 0x1cf   :  { %594 = vmax.xlane.f32.xlu0 %v547_v43  ;;  %v648_v43 = vsub.f32 %v3274_v36, %v3565_v5  ;;  %v2513_v14 = vpop.eup %2512 }
 0x1d0   :  { %v3657_v46 = vmul.f32 %v2513_v14, %v2429_v1  ;;  %v1178_v36 = vsub.f32 %v2511_v34, %v3649_v49  ;;  %v651_v1 = vsub.f32 %v3367_v16, %v3653_v52 }
 0x1d1   :  { %v680_v5 = vsel %vm531_vm0, %v648_v43, -1e+30 }
 0x1d2   :  { %v732_v63 = vmul.f32 1.442695, %v680_v5  ;;  %v1189_v34 = vsub.f32 %v2513_v14, %v3657_v46  ;;  %v396_v5 = vadd.f32 %v3189_v39, %v3552_v25 }
 0x1d4   :  { %2516 = vpow2.f32 %v732_v63  ;;  %v3694_v39 = vadd.f32 %v3570_v58, %v396_v5 }
 0x1d5   :  { %1246 = vadd.xlane.f32.xlu1 %v1193_v55  ;;  %v662_v55 = vsel %vm531_vm0, %v630_v62, -1e+30  ;;  %v2515_v62 = vpop.eup %2514  ;;  %v3691_v52 = vpop.xlane.xlu2 %580 }
 0x1d6   :  { %v696_v43 = vmul.f32 1.442695, %v662_v55  ;;  %v676_v55 = vsel %vm531_vm0, %v644_v22, -1e+30  ;;  %5571 = vst [vmem:[#allocation97_spill] sm:$0xff] %v3691_v52  ;;  %v632_v22 = vsub.f32 %v3257_v26, %v3528_v35  ;;  %v636_v58 = vsub.f32 %v3375_v41, %v3691_v52 }
 0x1d7   :  { %1206 = vadd.xlane.f32.xlu0 %v1173_v59  ;;  %v3663_v59 = vadd.f32 %v3472_v31, %v433_v29  ;;  %v2405_v31 = vunpack.c.h.bf16 %v3672_v3  ;;  %v3680_v29 = vpop.xlane.xlu1 %602  ;;  %v724_v25 = vmul.f32 1.442695, %v676_v55  ;;  %v546_v5 = vsel %vm531_vm0, %v3694_v39, -1e+30 }
 0x1d8   :  { %5570 = vst [vmem:[#allocation96_spill] sm:$0xff] %v3680_v29  ;;  %2518 = vpow2.f32 %v696_v43  ;;  %v1269_v43 = vsel %vm885_vm1, %v3634_v50, 0.0 }
 0x1d9   :  { %5569 = vst [vmem:[#allocation95_spill] sm:$0xff] %v3663_v59  ;;  %v561_v10 = vsel %vm531_vm0, %v3663_v59, -1e+30  ;;  %v3689_v14 = vmul.f32 %v2515_v62, %v2405_v31 }
 0x1da   :  { %v2517_v55 = vpop.eup %2516 }
 0x1db   :  { %v1177_v31 = vsub.f32 %v2515_v62, %v3689_v14  ;;  %v664_v62 = vsel %vm531_vm0, %v632_v22, -1e+30  ;;  %v3738_v22 = vld [vmem:[%s5213_s3 + $0x58] sm:$0xff]  }
 0x1dd   :  { %1216 = vadd.xlane.f32.xlu1 %v1178_v36  ;;  %v683_v36 = vsel %vm531_vm0, %v651_v1, -1e+30  ;;  %v2436_v1 = vunpack.c.l.bf16 %v3613_v37 }
 0x1de   :  { %v2519_v35 = vpop.eup %2518 }
 0x1df   :  { %1238 = vadd.xlane.f32.xlu0 %v1189_v34  ;;  %v3716_v16 = vpop.permute.xlu1 %1027 }
 0x1e0   :  { %622 = vmax.xlane.f32.xlu2 %v561_v10  ;;  %v738_v10 = vmul.f32 1.442695, %v683_v36  ;;  %v2400_v36 = vunpack.c.l.bf16 %v3559_v2  ;;  %5573 = vst [vmem:[#allocation99_spill] sm:$0xff] %v3716_v16 }
 0x1e2   :  { %2520 = vpow2.f32 %v738_v10  ;;  %v3726_v2 = vmul.f32 %v2519_v35, %v2400_v36 }
 0x1e3   :  { %2522 = vpow2.f32 %v724_v25 }
 0x1e4   :  { %v3700_v63 = vpop.xlane.xlu0 %612 }
 0x1e5   :  { %5572 = vst [vmem:[#allocation98_spill] sm:$0xff] %v3700_v63  ;;  %v652_v34 = vsub.f32 %v3408_v6, %v3700_v63  ;;  %1302 = vadd.xlane.f32.xlu1 %v1269_v43  ;;  %v668_v43 = vsel %vm531_vm0, %v636_v58, -1e+30  ;;  %v3724_v63 = vmul.f32 %v2517_v55, %v2436_v1  ;;  %v2441_v58 = vunpack.c.h.bf16 %v3738_v22 }
 0x1e7   :  { %v684_v37 = vsel %vm531_vm0, %v652_v34, -1e+30  ;;  %1214 = vadd.xlane.f32.xlu0 %v1177_v31  ;;  %v3731_v34 = vld [vmem:[%s5213_s3 + $0x60] sm:$0xff]   ;;  %v700_v31 = vmul.f32 1.442695, %v664_v62  ;;  %v1192_v1 = vsub.f32 %v2517_v55, %v3724_v63  ;;  %v1174_v62 = vsub.f32 %v2519_v35, %v3726_v2  ;;  %v3749_v54 = vpop.xlane.xlu1 %608 }
 0x1e8   :  { %v740_v52 = vmul.f32 1.442695, %v684_v37  ;;  %592 = vmax.xlane.f32.xlu2 %v546_v5  ;;  %v708_v5 = vmul.f32 1.442695, %v668_v43  ;;  %v2521_v36 = vpop.eup %2520  ;;  %v647_v37 = vsub.f32 %v3285_v45, %v3680_v29  ;;  %v2428_v43 = vunpack.c.l.bf16 %v3641_v28  ;;  %5575 = vst [vmem:[#allocation101_spill] sm:$0xff] %v3749_v54 }
 0x1e9   :  { %v2523_v6 = vpop.eup %2522  ;;  %v3755_v26 = vmul.f32 %v2521_v36, %v2441_v58 }
 0x1ea   :  { %2524 = vpow2.f32 %v740_v52  ;;  %v2444_v52 = vunpack.c.l.bf16 %v3731_v34  ;;  %v679_v35 = vsel %vm531_vm0, %v647_v37, -1e+30  ;;  %v3759_v28 = vmul.f32 %v2523_v6, %v2428_v43 }
 0x1eb   :  { %2526 = vpow2.f32 %v708_v5  ;;  %v1195_v5 = vsub.f32 %v2521_v36, %v3755_v26 }
 0x1ec   :  { %v3733_v10 = vpop.xlane.xlu0 %582  ;;  %2528 = vpow2.f32 %v700_v31  ;;  %v650_v31 = vsub.f32 %v3356_v53, %v3749_v54  ;;  %v1188_v37 = vsub.f32 %v2523_v6, %v3759_v28 }
 0x1ed   :  { %5574 = vst [vmem:[#allocation100_spill] sm:$0xff] %v3733_v10  ;;  %v637_v25 = vsub.f32 %v3420_v47, %v3733_v10 }
 0x1ee   :  { %v682_v36 = vsel %vm531_vm0, %v650_v31, -1e+30  ;;  %v3790_v31 = vpop.permute.xlu2 %1033 }
 0x1ef   :  { %v669_v10 = vsel %vm531_vm0, %v637_v25, -1e+30  ;;  %1244 = vadd.xlane.f32.xlu0 %v1192_v1  ;;  %v2461_v25 = vld [vmem:[%s5213_s3 + $0x20] sm:$0xff]   ;;  %v3770_v45 = vpop.xlane.xlu1 %578 }
 0x1f0   :  { %v2525_v55 = vpop.eup %2524  ;;  %v710_v47 = vmul.f32 1.442695, %v669_v10  ;;  %1208 = vadd.xlane.f32.xlu2 %v1174_v62  ;;  %v730_v10 = vmul.f32 1.442695, %v679_v35  ;;  %v2412_v58 = vunpack.c.l.bf16 %v2461_v25  ;;  %5576 = vst [vmem:[#allocation102_spill] sm:$0xff] %v3770_v45 }
 0x1f1   :  { %v3753_v41 = vmul.f32 %v2525_v55, %v2444_v52  ;;  %v2413_v52 = vunpack.c.h.bf16 %v2461_v25  ;;  %v2527_v62 = vpop.eup %2526 }
 0x1f2   :  { %2530 = vpow2.f32 %v710_v47  ;;  %v2404_v47 = vunpack.c.l.bf16 %v3672_v3  ;;  %v2529_v43 = vpop.eup %2528  ;;  %v3774_v35 = vmul.f32 %v2527_v62, %v2412_v58  ;;  %v2433_v58 = vunpack.c.h.bf16 %v3584_v51 }
 0x1f3   :  { %v1196_v1 = vsub.f32 %v2525_v55, %v3753_v41  ;;  %2532 = vpow2.f32 %v730_v10 }
 0x1f4   :  { %v3778_v25 = vmul.f32 %v2529_v43, %v2404_v47  ;;  %v1180_v3 = vsub.f32 %v2527_v62, %v3774_v35 }
 0x1f5   :  { %1252 = vadd.xlane.f32.xlu1 %v1196_v1  ;;  %v736_v1 = vmul.f32 1.442695, %v682_v36 }
 0x1f6   :  { %v1272_v51 = vsel %vm5447_vm2, %v3778_v25, 0.0 }
 0x1f7   :  { %1250 = vadd.xlane.f32.xlu0 %v1195_v5  ;;  %v635_v5 = vsub.f32 %v3373_v33, %v3770_v45  ;;  %v3786_v10 = vpop.permute.xlu1 %1036  ;;  %2534 = vpow2.f32 %v736_v1 }
 0x1f8   :  { %v2531_v29 = vpop.eup %2530  ;;  %1236 = vadd.xlane.f32.xlu2 %v1188_v37  ;;  %5577 = vst [vmem:[#allocation103_spill] sm:$0xff] %v3786_v10 }
 0x1f9   :  { %v3772_v55 = vmul.f32 %v2531_v29, %v2413_v52  ;;  %v1176_v52 = vsub.f32 %v2529_v43, %v3778_v25  ;;  %v2533_v37 = vpop.eup %2532  ;;  %v1268_v43 = vsel %vm884_vm3, %v3550_v60, 0.0 }
 0x1fa   :  { %v3792_v47 = vmul.f32 %v2533_v37, %v2433_v58 }
 0x1fb   :  { %v1181_v6 = vsub.f32 %v2531_v29, %v3772_v55  ;;  %v667_v29 = vsel %vm531_vm0, %v635_v5, -1e+30 }
 0x1fc   :  { %v706_v62 = vmul.f32 1.442695, %v667_v29  ;;  %v1191_v36 = vsub.f32 %v2533_v37, %v3792_v47 }
 0x1fd   :  { %1222 = vadd.xlane.f32.xlu1 %v1181_v6  ;;  %v2440_v6 = vunpack.c.l.bf16 %v3738_v22  ;;  %v2535_v1 = vpop.eup %2534 }
 0x1fe   :  { %2536 = vpow2.f32 %v706_v62  ;;  %v3825_v62 = vld [vmem:[%s5213_s3 + $0x68] sm:$0xff]  }
 0x1ff   :  { %1220 = vadd.xlane.f32.xlu0 %v1180_v3 }
 0x200   :  { %1212 = vadd.xlane.f32.xlu2 %v1176_v52  ;;  %v3812_v52 = vmul.f32 %v2535_v1, %v2440_v6 }
 0x205   :  { %1308 = vadd.xlane.f32.xlu1 %v1272_v51  ;;  %v1194_v51 = vsub.f32 %v2535_v1, %v3812_v52  ;;  %v2448_v1 = vunpack.c.l.bf16 %v3825_v62 }
 0x207   :  { %1300 = vadd.xlane.f32.xlu0 %v1268_v43  ;;  %v2409_v43 = vunpack.c.h.bf16 %v3630_v21 }
 0x208   :  { %1242 = vadd.xlane.f32.xlu2 %v1191_v36  ;;  %v3808_v3 = vpop.xlane.xlu1 %614  ;;  %v2537_v36 = vpop.eup %2536 }
 0x209   :  { %5578 = vst [vmem:[#allocation104_spill] sm:$0xff] %v3808_v3  ;;  %v653_v37 = vsub.f32 %v3452_v32, %v3808_v3 }
 0x20a   :  { %v3810_v5 = vpop.xlane.xlu2 %616 }
 0x20b   :  { %5579 = vst [vmem:[#allocation105_spill] sm:$0xff] %v3810_v5  ;;  %v654_v58 = vsub.f32 %v3454_v61, %v3810_v5  ;;  %v685_v6 = vsel %vm531_vm0, %v653_v37, -1e+30  ;;  %v3831_v5 = vmul.f32 %v2537_v36, %v2409_v43 }
 0x20d   :  { %v686_v29 = vsel %vm531_vm0, %v654_v58, -1e+30  ;;  %v1179_v45 = vsub.f32 %v2537_v36, %v3831_v5 }
 0x20e   :  { %v744_v22 = vmul.f32 1.442695, %v686_v29 }
 0x210   :  { %1248 = vadd.xlane.f32.xlu2 %v1194_v51  ;;  %2538 = vpow2.f32 %v744_v22  ;;  %v3833_v29 = vpop.xlane.xlu1 %584  ;;  %v742_v22 = vmul.f32 1.442695, %v685_v6 }
 0x211   :  { %5581 = vst [vmem:[#allocation107_spill] sm:$0xff] %v3833_v29  ;;  %v638_v54 = vsub.f32 %v3474_v56, %v3833_v29 }
 0x212   :  { %v3829_v58 = vpop.xlane.xlu2 %586 }
 0x213   :  { %5580 = vst [vmem:[#allocation106_spill] sm:$0xff] %v3829_v58  ;;  %v639_v21 = vsub.f32 %v3476_v11, %v3829_v58  ;;  %v2462_v58 = vld [vmem:[%s5213_s3 + $0x28] sm:$0xff]  }
 0x214   :  { %v2417_v61 = vunpack.c.h.bf16 %v2462_v58  ;;  %v2416_v32 = vunpack.c.l.bf16 %v2462_v58 }
 0x215   :  { %v671_v51 = vsel %vm531_vm0, %v639_v21, -1e+30  ;;  %v670_v21 = vsel %vm531_vm0, %v638_v54, -1e+30 }
 0x216   :  { %v2539_v3 = vpop.eup %2538  ;;  %v714_v37 = vmul.f32 1.442695, %v671_v51  ;;  %v712_v29 = vmul.f32 1.442695, %v670_v21 }
 0x217   :  { %v3843_v43 = vmul.f32 %v2539_v3, %v2448_v1  ;;  %v1270_v1 = vsel %vm886_vm4, %v3726_v2, 0.0 }
 0x218   :  { %1218 = vadd.xlane.f32.xlu2 %v1179_v45  ;;  %2540 = vpow2.f32 %v714_v37  ;;  %v2445_v45 = vunpack.c.h.bf16 %v3731_v34  ;;  %v3863_v37 = vpop.permute.xlu0 %1039 }
 0x219   :  { %v1198_v6 = vsub.f32 %v2539_v3, %v3843_v43  ;;  %2542 = vpow2.f32 %v742_v22  ;;  %v3860_v22 = vpop.xlane.xlu1 %620  ;;  %5583 = vst [vmem:[#allocation109_spill] sm:$0xff] %v3863_v37 }
 0x21a   :  { %5582 = vst [vmem:[#allocation108_spill] sm:$0xff] %v3860_v22  ;;  %2544 = vpow2.f32 %v712_v29  ;;  %v656_v34 = vsub.f32 %v3489_v48, %v3860_v22 }
 0x21b   :  { %1256 = vadd.xlane.f32.xlu0 %v1198_v6 }
 0x21e   :  { %v2541_v51 = vpop.eup %2540 }
 0x21f   :  { %v2543_v36 = vpop.eup %2542  ;;  %v3858_v3 = vmul.f32 %v2541_v51, %v2417_v61  ;;  %v688_v61 = vsel %vm531_vm0, %v656_v34, -1e+30 }
 0x220   :  { %1304 = vadd.xlane.f32.xlu2 %v1270_v1  ;;  %v3865_v6 = vmul.f32 %v2543_v36, %v2445_v45  ;;  %v2545_v53 = vpop.eup %2544 }
 0x221   :  { %v1183_v54 = vsub.f32 %v2541_v51, %v3858_v3  ;;  %v1271_v51 = vsel %vm887_vm5, %v3577_v30, 0.0  ;;  %v3880_v45 = vmul.f32 %v2545_v53, %v2416_v32  ;;  %v3882_v1 = vpop.xlane.xlu1 %590 }
 0x222   :  { %v1197_v21 = vsub.f32 %v2543_v36, %v3865_v6  ;;  %5585 = vst [vmem:[#allocation111_spill] sm:$0xff] %v3882_v1  ;;  %v748_v36 = vmul.f32 1.442695, %v688_v61  ;;  %v641_v34 = vsub.f32 %v3503_v18, %v3882_v1  ;;  %v2463_v1 = vld [vmem:[%s5213_s3 + $0x30] sm:$0xff]  }
 0x223   :  { %1226 = vadd.xlane.f32.xlu0 %v1183_v54  ;;  %v1182_v22 = vsub.f32 %v2545_v53, %v3880_v45 }
 0x224   :  { %v673_v32 = vsel %vm531_vm0, %v641_v34, -1e+30 }
 0x228   :  { %1254 = vadd.xlane.f32.xlu2 %v1197_v21 }
 0x22a   :  { %v3874_v29 = vpop.xlane.xlu0 %618 }
 0x22b   :  { %5584 = vst [vmem:[#allocation110_spill] sm:$0xff] %v3874_v29  ;;  %v655_v58 = vsub.f32 %v3537_v44, %v3874_v29  ;;  %1306 = vadd.xlane.f32.xlu0 %v1271_v51  ;;  %v2449_v51 = vunpack.c.h.bf16 %v3825_v62  ;;  %v1273_v62 = vsel %vm889_vm6, %v3689_v14, 0.0 }
 0x22d   :  { %v687_v54 = vsel %vm531_vm0, %v655_v58, -1e+30  ;;  %v3901_v58 = vld [vmem:[%s5213_s3 + $0x70] sm:$0xff]  }
 0x22e   :  { %v746_v21 = vmul.f32 1.442695, %v687_v54  ;;  %v718_v54 = vmul.f32 1.442695, %v673_v32  ;;  %v2452_v34 = vunpack.c.l.bf16 %v3901_v58 }
 0x230   :  { %1224 = vadd.xlane.f32.xlu2 %v1182_v22  ;;  %2546 = vpow2.f32 %v746_v21 }
 0x231   :  { %2548 = vpow2.f32 %v748_v36 }
 0x232   :  { %v3893_v48 = vpop.xlane.xlu0 %588 }
 0x233   :  { %5586 = vst [vmem:[#allocation112_spill] sm:$0xff] %v3893_v48  ;;  %v640_v61 = vsub.f32 %v3554_v9, %v3893_v48  ;;  %v3922_v48 = vpop.xlane.xlu1 %626 }
 0x234   :  { %5588 = vst [vmem:[#allocation114_spill] sm:$0xff] %v3922_v48 }
 0x235   :  { %v672_v53 = vsel %vm531_vm0, %v640_v61, -1e+30 }
 0x236   :  { %v2547_v22 = vpop.eup %2546  ;;  %v716_v36 = vmul.f32 1.442695, %v672_v53 }
 0x237   :  { %v2549_v21 = vpop.eup %2548  ;;  %v3912_v29 = vmul.f32 %v2547_v22, %v2449_v51  ;;  %v2420_v51 = vunpack.c.l.bf16 %v2463_v1 }
 0x238   :  { %1310 = vadd.xlane.f32.xlu2 %v1273_v62  ;;  %2550 = vpow2.f32 %v716_v36  ;;  %v3917_v53 = vmul.f32 %v2549_v21, %v2452_v34  ;;  %v2421_v62 = vunpack.c.h.bf16 %v2463_v1 }
 0x239   :  { %v1199_v32 = vsub.f32 %v2547_v22, %v3912_v29  ;;  %2552 = vpow2.f32 %v718_v54  ;;  %v659_v54 = vsub.f32 %v3521_v27, %v3922_v48 }
 0x23a   :  { %v3915_v61 = vpop.xlane.xlu0 %624  ;;  %v1200_v34 = vsub.f32 %v2549_v21, %v3917_v53 }
 0x23b   :  { %5587 = vst [vmem:[#allocation113_spill] sm:$0xff] %v3915_v61  ;;  %v658_v44 = vsub.f32 %v3588_v57, %v3915_v61  ;;  %1258 = vadd.xlane.f32.xlu1 %v1199_v32  ;;  %v691_v32 = vsel %vm531_vm0, %v659_v54, -1e+30 }
 0x23c   :  { %v754_v1 = vmul.f32 1.442695, %v691_v32 }
 0x23d   :  { %v690_v36 = vsel %vm531_vm0, %v658_v44, -1e+30 }
 0x23e   :  { %v2551_v22 = vpop.eup %2550  ;;  %v752_v18 = vmul.f32 1.442695, %v690_v36 }
 0x23f   :  { %v2553_v37 = vpop.eup %2552  ;;  %v3931_v10 = vmul.f32 %v2551_v22, %v2420_v51 }
 0x240   :  { %1260 = vadd.xlane.f32.xlu2 %v1200_v34  ;;  %v3938_v44 = vmul.f32 %v2553_v37, %v2421_v62  ;;  %2554 = vpow2.f32 %v752_v18  ;;  %v2464_v62 = vld [vmem:[%s5213_s3 + $0x38] sm:$0xff]  }
 0x241   :  { %v1184_v9 = vsub.f32 %v2551_v22, %v3931_v10  ;;  %v2472_v22 = vld [vmem:[%s5213_s3 + $0x78] sm:$0xff]   ;;  %2556 = vpow2.f32 %v754_v1  ;;  %v1276_v1 = vsel %vm5475_vm8, %v3774_v35, 0.0  ;;  %s2745_s3 = smov [#allocation2]  }
 0x242   :  { %v3936_v61 = vpop.xlane.xlu0 %594  ;;  %v1185_v51 = vsub.f32 %v2553_v37, %v3938_v44  ;;  %v2456_v54 = vunpack.c.l.bf16 %v2472_v22  ;;  %v2457_v37 = vunpack.c.h.bf16 %v2472_v22  ;;  %s2127_s24 = sshll.u32 %s2745_s3, 4  ;;  %s2128_s24 = int_to_ptr.vmem [resolvable:$true] %s2127_s24 }
 0x243   :  { %5589 = vst [vmem:[#allocation115_spill] sm:$0xff] %v3936_v61  ;;  %v643_v48 = vsub.f32 %v3608_v20, %v3936_v61  ;;  %1228 = vadd.xlane.f32.xlu1 %v1184_v9  ;;  %v1275_v9 = vsel %vm5433_vm7, %v3831_v5, 0.0 }
 0x245   :  { %v675_v21 = vsel %vm531_vm0, %v643_v48, -1e+30  ;;  %v3954_v48 = vpop.permute.xlu2 %1042 }
 0x246   :  { %v722_v36 = vmul.f32 1.442695, %v675_v21  ;;  %v2555_v34 = vpop.eup %2554  ;;  %5590 = vst [vmem:[#allocation116_spill] sm:$0xff] %v3954_v48  ;;  %v3979_v48 = vpop.xlane.xlu1 %1204 }
 0x247   :  { %v3956_v18 = vmul.f32 %v2555_v34, %v2456_v54  ;;  %v2557_v32 = vpop.eup %2556  ;;  %5594 = vst [vmem:[#allocation120_spill] sm:$0xff] %v3979_v48  ;;  %v5611_v48 = vld [vmem:[#allocation26_spill] sm:$0xff] }
 0x248   :  { %1230 = vadd.xlane.f32.xlu2 %v1185_v51  ;;  %2558 = vpow2.f32 %v722_v36  ;;  %v2425_v51 = vunpack.c.h.bf16 %v2464_v62  ;;  %v3968_v54 = vmul.f32 %v2557_v32, %v2457_v37 }
 0x249   :  { %5591 = vst [vmem:[#allocation117_spill] sm:$0xff] %v3956_v18  ;;  %v1202_v21 = vsub.f32 %v2555_v34, %v3956_v18 }
 0x24a   :  { %5592 = vst [vmem:[#allocation118_spill] sm:$0xff] %v3968_v54  ;;  %v1203_v57 = vsub.f32 %v2557_v32, %v3968_v54 }
 0x24b   :  { %1314 = vadd.xlane.f32.xlu1 %v1275_v9 }
 0x24e   :  { %v2559_v36 = vpop.eup %2558 }
 0x24f   :  { %v3974_v61 = vmul.f32 %v2559_v36, %v2425_v51  ;;  %v2453_v51 = vunpack.c.h.bf16 %v3901_v58  ;;  %v3999_v58 = vpop.xlane.xlu1 %1210 }
 0x250   :  { %1316 = vadd.xlane.f32.xlu2 %v1276_v1  ;;  %5598 = vst [vmem:[#allocation123_spill] sm:$0xff] %v3999_v58  ;;  %v5605_v58 = vld [vmem:[#allocation23_spill] sm:$0xff] }
 0x251   :  { %v1187_v34 = vsub.f32 %v2559_v36, %v3974_v61  ;;  %vm5392_vm14 = vcmp.eq.s32.totalorder %v3191_v40, %v5605_v58  ;;  %v5610_v58 = vld [vmem:[#allocation28_spill] sm:$0xff] }
 0x253   :  { %1264 = vadd.xlane.f32.xlu1 %v1202_v21  ;;  %v3970_v9 = vpop.xlane.xlu2 %622 }
 0x254   :  { %5593 = vst [vmem:[#allocation119_spill] sm:$0xff] %v3970_v9  ;;  %v657_v22 = vsub.f32 %v3663_v59, %v3970_v9 }
 0x256   :  { %v689_v27 = vsel %vm531_vm0, %v657_v22, -1e+30 }
 0x257   :  { %v750_v1 = vmul.f32 1.442695, %v689_v27 }
 0x258   :  { %1266 = vadd.xlane.f32.xlu2 %v1203_v57  ;;  %v1279_v57 = vsel %vm5441_vm9, %v3858_v3, 0.0 }
 0x259   :  { %2560 = vpow2.f32 %v750_v1  ;;  %v5597_v1 = vld [vmem:[#allocation14_spill] sm:$0xff] }
 0x25a   :  { %vm5408_vm10 = vcmp.eq.s32.totalorder %v3191_v40, %v5597_v1 }
 0x25b   :  { %1234 = vadd.xlane.f32.xlu1 %v1187_v34  ;;  %v3982_v37 = vpop.xlane.xlu2 %592  ;;  %v1278_v34 = vsel %vm5408_vm10, %v3880_v45, 0.0 }
 0x25c   :  { %5595 = vst [vmem:[#allocation121_spill] sm:$0xff] %v3982_v37  ;;  %v642_v21 = vsub.f32 %v3694_v39, %v3982_v37  ;;  %v5601_v37 = vld [vmem:[#allocation22_spill] sm:$0xff] }
 0x25d   :  { %vm5432_vm12 = vcmp.eq.s32.totalorder %v3191_v40, %v5601_v37 }
 0x25e   :  { %v674_v22 = vsel %vm531_vm0, %v642_v21, -1e+30  ;;  %vm5400_vm0 = vcmp.eq.s32.totalorder %v3191_v40, %v5610_v58  ;;  %v5616_v58 = vld [vmem:[#allocation29_spill] sm:$0xff] }
 0x25f   :  { %v2561_v27 = vpop.eup %2560  ;;  %v720_v32 = vmul.f32 1.442695, %v674_v22 }
 0x260   :  { %1322 = vadd.xlane.f32.xlu2 %v1279_v57  ;;  %v3995_v36 = vmul.f32 %v2561_v27, %v2453_v51  ;;  %v2424_v57 = vunpack.c.l.bf16 %v2464_v62 }
 0x261   :  { %2562 = vpow2.f32 %v720_v32  ;;  %v5600_v32 = vld [vmem:[#allocation18_spill] sm:$0xff] }
 0x262   :  { %5596 = vst [vmem:[#allocation122_spill] sm:$0xff] %v3995_v36  ;;  %v1201_v21 = vsub.f32 %v2561_v27, %v3995_v36  ;;  %vm5393_vm11 = vcmp.eq.s32.totalorder %v3191_v40, %v5600_v32  ;;  %v5615_v32 = vld [vmem:[#allocation32_spill] sm:$0xff] }
 0x263   :  { %1320 = vadd.xlane.f32.xlu1 %v1278_v34  ;;  %v4006_v22 = vpop.xlane.xlu2 %1208  ;;  %v1281_v59 = vsel %vm5393_vm11, %v3938_v44, 0.0 }
 0x264   :  { %5599 = vst [vmem:[#allocation124_spill] sm:$0xff] %v4006_v22  ;;  %1262 = vadd.xlane.f32.xlu0 %v1201_v21  ;;  %v4025_v21 = vpop.xlane.xlu1 %1240  ;;  %v1284_v22 = vsel %vm5392_vm14, %v3759_v28, 0.0  ;;  %vm5398_vm14 = vcmp.eq.s32.totalorder %v3191_v40, %v5611_v48 }
 0x265   :  { %5603 = vst [vmem:[#allocation125_spill] sm:$0xff] %v4025_v21 }
 0x267   :  { %v2563_v51 = vpop.eup %2562 }
 0x268   :  { %v4008_v9 = vmul.f32 %v2563_v51, %v2424_v57  ;;  %v5604_v57 = vld [vmem:[#allocation25_spill] sm:$0xff] }
 0x269   :  { %vm5402_vm13 = vcmp.eq.s32.totalorder %v3191_v40, %v5604_v57 }
 0x26a   :  { %v1282_v27 = vsel %vm5432_vm12, %v4008_v9, 0.0  ;;  %v1186_v62 = vsub.f32 %v2563_v51, %v4008_v9  ;;  %v5606_v51 = vld [vmem:[#allocation17_spill] sm:$0xff] }
 0x26b   :  { %1326 = vadd.xlane.f32.xlu1 %v1281_v59  ;;  %v4023_v34 = vpop.xlane.xlu2 %1236  ;;  %1328 = vadd.xlane.f32.xlu2 %v1282_v27  ;;  %v1285_v59 = vsel %vm5402_vm13, %v3657_v46, 0.0  ;;  %vm890_vm15 = vcmp.eq.s32.totalorder %v3191_v40, %v5606_v51  ;;  %v5702_v51 = vld [vmem:[#allocation46_spill] sm:$0xff] }
 0x26c   :  { %5602 = vst [vmem:[#allocation22_spill] sm:$0xff] %v4023_v34  ;;  %1232 = vadd.xlane.f32.xlu0 %v1186_v62  ;;  %v1274_v62 = vsel %vm890_vm15, %v3649_v49, 0.0  ;;  %v4047_v21 = vpop.xlane.xlu1 %1246  ;;  %v4049_v34 = vpop.xlane.xlu0 %1206 }
 0x26d   :  { %5608 = vst [vmem:[#allocation126_spill] sm:$0xff] %v4047_v21 }
 0x26e   :  { %5609 = vst [vmem:[#allocation127_spill] sm:$0xff] %v4049_v34 }
 0x273   :  { %1332 = vadd.xlane.f32.xlu1 %v1284_v22  ;;  %v4041_v27 = vpop.xlane.xlu2 %1212  ;;  %1334 = vadd.xlane.f32.xlu2 %v1285_v59  ;;  %v1287_v22 = vsel %vm5398_vm14, %v3792_v47, 0.0  ;;  %v1288_v59 = vsel %vm5400_vm0, %v3724_v63, 0.0  ;;  %vm5411_vm14 = vcmp.eq.s32.totalorder %v3191_v40, %v5615_v32  ;;  %vm5406_vm0 = vcmp.eq.s32.totalorder %v3191_v40, %v5616_v58  ;;  %v5620_v58 = vld [vmem:[#allocation36_spill] sm:$0xff] }
 0x274   :  { %5607 = vst [vmem:[#allocation17_spill] sm:$0xff] %v4041_v27  ;;  %1312 = vadd.xlane.f32.xlu0 %v1274_v62  ;;  %v5612_v62 = vld [vmem:[#allocation21_spill] sm:$0xff]  ;;  %v4071_v48 = vpop.xlane.xlu1 %1216  ;;  %v4077_v34 = vpop.xlane.xlu0 %1238 }
 0x275   :  { %vm5464_vm11 = vcmp.eq.s32.totalorder %v3191_v40, %v5612_v62  ;;  %5614 = vst [vmem:[#allocation128_spill] sm:$0xff] %v4071_v48  ;;  %v5621_v48 = vld [vmem:[#allocation33_spill] sm:$0xff] }
 0x276   :  { %v1277_v27 = vsel %vm5464_vm11, %v3772_v55, 0.0  ;;  %5617 = vst [vmem:[#allocation129_spill] sm:$0xff] %v4077_v34  ;;  %vm5414_vm10 = vcmp.eq.s32.totalorder %v3191_v40, %v5621_v48 }
 0x27b   :  { %1338 = vadd.xlane.f32.xlu1 %v1287_v22  ;;  %v4065_v21 = vpop.xlane.xlu2 %1242  ;;  %1340 = vadd.xlane.f32.xlu2 %v1288_v59  ;;  %v1290_v22 = vsel %vm5406_vm0, %v3812_v52, 0.0  ;;  %v5618_v59 = vld [vmem:[#allocation24_spill] sm:$0xff]  ;;  %vm5416_vm0 = vcmp.eq.s32.totalorder %v3191_v40, %v5620_v58  ;;  %v5627_v58 = vld [vmem:[#allocation37_spill] sm:$0xff] }
 0x27c   :  { %5613 = vst [vmem:[#allocation21_spill] sm:$0xff] %v4065_v21  ;;  %1318 = vadd.xlane.f32.xlu0 %v1277_v27  ;;  %v1291_v27 = vsel %vm5411_vm14, %v3755_v26, 0.0  ;;  %vm5439_vm13 = vcmp.eq.s32.totalorder %v3191_v40, %v5618_v59  ;;  %v4099_v32 = vpop.xlane.xlu1 %1302 }
 0x27d   :  { %v1280_v34 = vsel %vm5439_vm13, %v3931_v10, 0.0  ;;  %5622 = vst [vmem:[#allocation130_spill] sm:$0xff] %v4099_v32  ;;  %v5626_v32 = vld [vmem:[#allocation39_spill] sm:$0xff] }
 0x283   :  { %1344 = vadd.xlane.f32.xlu1 %v1290_v22  ;;  %v4089_v21 = vpop.xlane.xlu2 %1248  ;;  %1346 = vadd.xlane.f32.xlu2 %v1291_v27  ;;  %v1293_v22 = vsel %vm5414_vm10, %v3865_v6, 0.0  ;;  %v1294_v27 = vsel %vm5416_vm0, %v3843_v43, 0.0  ;;  %vm5425_vm10 = vcmp.eq.s32.totalorder %v3191_v40, %v5626_v32  ;;  %vm5423_vm0 = vcmp.eq.s32.totalorder %v3191_v40, %v5627_v58  ;;  %v5633_v32 = vld [vmem:[#allocation40_spill] sm:$0xff] }
 0x284   :  { %5619 = vst [vmem:[#allocation24_spill] sm:$0xff] %v4089_v21  ;;  %1324 = vadd.xlane.f32.xlu0 %v1280_v34  ;;  %v5623_v21 = vld [vmem:[#allocation27_spill] sm:$0xff]  ;;  %v4111_v34 = vpop.xlane.xlu0 %1214  ;;  %v4123_v1 = vpop.xlane.xlu1 %1252 }
 0x285   :  { %vm5419_vm14 = vcmp.eq.s32.totalorder %v3191_v40, %v5623_v21  ;;  %5624 = vst [vmem:[#allocation27_spill] sm:$0xff] %v4111_v34  ;;  %v5632_v34 = vld [vmem:[#allocation43_spill] sm:$0xff] }
 0x286   :  { %v1283_v48 = vsel %vm5419_vm14, %v3974_v61, 0.0  ;;  %5628 = vst [vmem:[#allocation132_spill] sm:$0xff] %v4123_v1 }
 0x28b   :  { %1350 = vadd.xlane.f32.xlu1 %v1293_v22  ;;  %v4113_v57 = vpop.xlane.xlu2 %1218  ;;  %1352 = vadd.xlane.f32.xlu2 %v1294_v27  ;;  %v1296_v22 = vsel %vm5423_vm0, %v3917_v53, 0.0  ;;  %v1297_v27 = vsel %vm5425_vm10, %v3995_v36, 0.0  ;;  %vm1044_vm0 = vcmp.eq.s32.totalorder %v3191_v40, %v5632_v34  ;;  %vm5431_vm10 = vcmp.eq.s32.totalorder %v3191_v40, %v5633_v32  ;;  %v5634_v36 = vld [vmem:[#allocation35_spill] sm:$0xff] }
 0x28c   :  { %5625 = vst [vmem:[#allocation131_spill] sm:$0xff] %v4113_v57  ;;  %1330 = vadd.xlane.f32.xlu0 %v1283_v48  ;;  %v5629_v57 = vld [vmem:[#allocation31_spill] sm:$0xff]  ;;  %v4141_v58 = vpop.xlane.xlu0 %1244 }
 0x28d   :  { %vm5427_vm14 = vcmp.eq.s32.totalorder %v3191_v40, %v5629_v57  ;;  %5631 = vst [vmem:[#allocation134_spill] sm:$0xff] %v4141_v58 }
 0x28e   :  { %v1286_v1 = vsel %vm5427_vm14, %v3604_v8, 0.0  ;;  %vm5438_vm14 = vcmp.eq.s32.totalorder %v3191_v40, %v5634_v36  ;;  %v5643_v36 = vld [vmem:[#allocation51_spill] sm:$0xff] }
 0x28f   :  { %v1289_v58 = vsel %vm5438_vm14, %v3623_v17, 0.0  ;;  %vm1050_vm14 = vcmp.eq.s32.totalorder %v3191_v40, %v5643_v36 }
 0x293   :  { %1356 = vadd.xlane.f32.xlu1 %v1296_v22  ;;  %v4135_v48 = vpop.xlane.xlu2 %1304  ;;  %1358 = vadd.xlane.f32.xlu2 %v1297_v27  ;;  %v1299_v22 = vsel %vm5431_vm10, %v3968_v54, 0.0  ;;  %v1396_v27 = vsel %vm1044_vm0, %v3550_v60, 0.0  ;;  %v5638_v54 = vld [vmem:[#allocation48_spill] sm:$0xff] }
 0x294   :  { %5630 = vst [vmem:[#allocation133_spill] sm:$0xff] %v4135_v48  ;;  %1336 = vadd.xlane.f32.xlu0 %v1286_v1  ;;  %v4163_v48 = vpop.xlane.xlu1 %1222  ;;  %v4165_v32 = vpop.xlane.xlu0 %1250  ;;  %vm1047_vm10 = vcmp.eq.s32.totalorder %v3191_v40, %v5638_v54  ;;  %v5639_v60 = vld [vmem:[#allocation44_spill] sm:$0xff] }
 0x295   :  { %5636 = vst [vmem:[#allocation135_spill] sm:$0xff] %v4163_v48  ;;  %vm5469_vm12 = vcmp.eq.s32.totalorder %v3191_v40, %v5639_v60 }
 0x296   :  { %5637 = vst [vmem:[#allocation136_spill] sm:$0xff] %v4165_v32 }
 0x29b   :  { %1362 = vadd.xlane.f32.xlu1 %v1299_v22  ;;  %v4157_v1 = vpop.xlane.xlu2 %1254  ;;  %1428 = vadd.xlane.f32.xlu2 %v1396_v27  ;;  %v5640_v22 = vld [vmem:[#allocation38_spill] sm:$0xff]  ;;  %v1398_v27 = vsel %vm5469_vm12, %v3726_v2, 0.0  ;;  %v5644_v2 = vld [vmem:[#allocation49_spill] sm:$0xff] }
 0x29c   :  { %5635 = vst [vmem:[#allocation43_spill] sm:$0xff] %v4157_v1  ;;  %1342 = vadd.xlane.f32.xlu0 %v1289_v58  ;;  %vm5444_vm7 = vcmp.eq.s32.totalorder %v3191_v40, %v5640_v22  ;;  %v1399_v58 = vsel %vm1047_vm10, %v3577_v30, 0.0  ;;  %v4187_v48 = vpop.xlane.xlu1 %1308  ;;  %vm5445_vm13 = vcmp.eq.s32.totalorder %v3191_v40, %v5644_v2  ;;  %v4193_v57 = vpop.xlane.xlu0 %1220  ;;  %v5646_v30 = vld [vmem:[#allocation41_spill] sm:$0xff] }
 0x29d   :  { %v1292_v32 = vsel %vm5444_vm7, %v3753_v41, 0.0  ;;  %5642 = vst [vmem:[#allocation44_spill] sm:$0xff] %v4187_v48  ;;  %vm5450_vm9 = vcmp.eq.s32.totalorder %v3191_v40, %v5646_v30  ;;  %v5649_v48 = vld [vmem:[#allocation54_spill] sm:$0xff] }
 0x29e   :  { %5645 = vst [vmem:[#allocation51_spill] sm:$0xff] %v4193_v57  ;;  %v1295_v22 = vsel %vm5450_vm9, %v3912_v29, 0.0  ;;  %vm5452_vm7 = vcmp.eq.s32.totalorder %v3191_v40, %v5649_v48  ;;  %v5651_v57 = vld [vmem:[#allocation47_spill] sm:$0xff] }
 0x29f   :  { %vm5456_vm2 = vcmp.eq.s32.totalorder %v3191_v40, %v5651_v57 }
 0x2a3   :  { %1432 = vadd.xlane.f32.xlu1 %v1398_v27  ;;  %v4181_v1 = vpop.xlane.xlu2 %1224  ;;  %1434 = vadd.xlane.f32.xlu2 %v1399_v58  ;;  %v1401_v27 = vsel %vm5445_vm13, %v3689_v14, 0.0  ;;  %v5650_v14 = vld [vmem:[#allocation52_spill] sm:$0xff] }
 0x2a4   :  { %5641 = vst [vmem:[#allocation48_spill] sm:$0xff] %v4181_v1  ;;  %1348 = vadd.xlane.f32.xlu0 %v1292_v32  ;;  %v1402_v32 = vsel %vm1050_vm14, %v3649_v49, 0.0  ;;  %vm5451_vm13 = vcmp.eq.s32.totalorder %v3191_v40, %v5650_v14 }
 0x2a5   :  { %v1404_v49 = vsel %vm5451_vm13, %v3774_v35, 0.0  ;;  %v5654_v35 = vld [vmem:[#allocation58_spill] sm:$0xff] }
 0x2a6   :  { %vm5459_vm9 = vcmp.eq.s32.totalorder %v3191_v40, %v5654_v35 }
 0x2ab   :  { %1438 = vadd.xlane.f32.xlu1 %v1401_v27  ;;  %v4205_v58 = vpop.xlane.xlu2 %1310  ;;  %1440 = vadd.xlane.f32.xlu2 %v1402_v32  ;;  %v4227_v27 = vpop.xlane.xlu0 %1300 }
 0x2ac   :  { %5647 = vst [vmem:[#allocation49_spill] sm:$0xff] %v4205_v58  ;;  %1354 = vadd.xlane.f32.xlu0 %v1295_v22  ;;  %v1405_v22 = vsel %vm5452_vm7, %v3772_v55, 0.0  ;;  %v5655_v58 = vld [vmem:[#allocation55_spill] sm:$0xff]  ;;  %v5656_v55 = vld [vmem:[#allocation50_spill] sm:$0xff] }
 0x2ad   :  { %vm5458_vm13 = vcmp.eq.s32.totalorder %v3191_v40, %v5655_v58  ;;  %vm1045_vm7 = vcmp.eq.s32.totalorder %v3191_v40, %v5656_v55  ;;  %v5691_v55 = vld [vmem:[#allocation93_spill] sm:$0xff] }
 0x2ae   :  { %v4211_v1 = vpop.xlane.xlu1 %1258  ;;  %v1397_v57 = vsel %vm1045_vm7, %v3634_v50, 0.0 }
 0x2af   :  { %5648 = vst [vmem:[#allocation137_spill] sm:$0xff] %v4211_v1  ;;  %v1298_v1 = vsel %vm5456_vm2, %v3956_v18, 0.0  ;;  %v5661_v18 = vld [vmem:[#allocation59_spill] sm:$0xff] }
 0x2b3   :  { %1444 = vadd.xlane.f32.xlu1 %v1404_v49  ;;  %v4229_v32 = vpop.xlane.xlu2 %1260  ;;  %1446 = vadd.xlane.f32.xlu2 %v1405_v22  ;;  %v1407_v49 = vsel %vm5458_vm13, %v3858_v3, 0.0  ;;  %v4251_v22 = vpop.xlane.xlu0 %1256  ;;  %v5660_v3 = vld [vmem:[#allocation62_spill] sm:$0xff]  ;;  %vm5462_vm13 = vcmp.eq.s32.totalorder %v3191_v40, %v5661_v18 }
 0x2b4   :  { %5652 = vst [vmem:[#allocation54_spill] sm:$0xff] %v4229_v32  ;;  %1360 = vadd.xlane.f32.xlu0 %v1298_v1  ;;  %v1408_v1 = vsel %vm5459_vm9, %v3931_v10, 0.0  ;;  %vm5463_vm2 = vcmp.eq.s32.totalorder %v3191_v40, %v5660_v3  ;;  %v5662_v10 = vld [vmem:[#allocation53_spill] sm:$0xff] }
 0x2b5   :  { %5657 = vst [vmem:[#allocation58_spill] sm:$0xff] %v4251_v22  ;;  %vm1048_vm9 = vcmp.eq.s32.totalorder %v3191_v40, %v5662_v10  ;;  %v1411_v50 = vsel %vm5463_vm2, %v3974_v61, 0.0  ;;  %v5668_v61 = vld [vmem:[#allocation57_spill] sm:$0xff]  ;;  %v5699_v10 = vld [vmem:[#allocation34_spill] sm:$0xff] }
 0x2b6   :  { %v4235_v30 = vpop.xlane.xlu1 %1228  ;;  %vm1051_vm11 = vcmp.eq.s32.totalorder %v3191_v40, %v5668_v61  ;;  %v1624_v54 = vsel %vm1048_vm9, %v5695_v12, 0.0  ;;  %v1530_v7 = vsel %vm890_vm15, %v5699_v10, 0.0  ;;  %v5706_v61 = vld [vmem:[#allocation60_spill] sm:$0xff]  ;;  %vm5713_vm15 = vcmp.eq.s32.totalorder %v3191_v40, %v5644_v2 }
 0x2b7   :  { %5653 = vst [vmem:[#allocation52_spill] sm:$0xff] %v4235_v30  ;;  %v1627_v36 = vsel %vm1051_vm11, %v3373_v33, 0.0 }
 0x2bb   :  { %1450 = vadd.xlane.f32.xlu1 %v1407_v49  ;;  %v4253_v32 = vpop.xlane.xlu2 %1230  ;;  %1452 = vadd.xlane.f32.xlu2 %v1408_v1  ;;  %v1410_v49 = vsel %vm5462_vm13, %v4008_v9, 0.0  ;;  %v1400_v1 = vsel %vm1048_vm9, %v3778_v25, 0.0  ;;  %v4281_v22 = vpop.xlane.xlu0 %1226  ;;  %v5666_v9 = vld [vmem:[#allocation65_spill] sm:$0xff]  ;;  %vm5708_vm9 = vcmp.eq.s32.totalorder %v3191_v40, %v5649_v48 }
 0x2bc   :  { %5658 = vst [vmem:[#allocation55_spill] sm:$0xff] %v4253_v32  ;;  %1430 = vadd.xlane.f32.xlu0 %v1397_v57  ;;  %vm5468_vm13 = vcmp.eq.s32.totalorder %v3191_v40, %v5666_v9 }
 0x2bd   :  { %5664 = vst [vmem:[#allocation59_spill] sm:$0xff] %v4281_v22  ;;  %v1414_v25 = vsel %vm5468_vm13, %v3604_v8, 0.0  ;;  %v5673_v8 = vld [vmem:[#allocation61_spill] sm:$0xff] }
 0x2be   :  { %v4259_v30 = vpop.xlane.xlu1 %1314  ;;  %vm5479_vm12 = vcmp.eq.s32.totalorder %v3191_v40, %v5673_v8 }
 0x2bf   :  { %5659 = vst [vmem:[#allocation50_spill] sm:$0xff] %v4259_v30  ;;  %v5667_v30 = vld [vmem:[#allocation63_spill] sm:$0xff] }
 0x2c0   :  { %vm5467_vm2 = vcmp.eq.s32.totalorder %v3191_v40, %v5667_v30 }
 0x2c3   :  { %1456 = vadd.xlane.f32.xlu1 %v1410_v49  ;;  %v4275_v57 = vpop.xlane.xlu2 %1316  ;;  %1458 = vadd.xlane.f32.xlu2 %v1411_v50  ;;  %v1413_v49 = vsel %vm5467_vm2, %v3657_v46, 0.0  ;;  %v1403_v50 = vsel %vm1051_vm11, %v3831_v5, 0.0  ;;  %v4307_v22 = vpop.xlane.xlu0 %1306  ;;  %v5671_v46 = vld [vmem:[#allocation66_spill] sm:$0xff]  ;;  %vm5711_vm11 = vcmp.eq.s32.totalorder %v3191_v40, %v5673_v8  ;;  %v5715_v8 = vld [vmem:[#allocation88_spill] sm:$0xff] }
 0x2c4   :  { %5663 = vst [vmem:[#allocation62_spill] sm:$0xff] %v4275_v57  ;;  %1436 = vadd.xlane.f32.xlu0 %v1400_v1  ;;  %vm5472_vm2 = vcmp.eq.s32.totalorder %v3191_v40, %v5671_v46  ;;  %v5672_v57 = vld [vmem:[#allocation75_spill] sm:$0xff] }
 0x2c5   :  { %vm5474_vm13 = vcmp.eq.s32.totalorder %v3191_v40, %v5672_v57  ;;  %v1416_v5 = vsel %vm5472_vm2, %v3724_v63, 0.0  ;;  %v5676_v63 = vld [vmem:[#allocation73_spill] sm:$0xff]  ;;  %v5677_v46 = vld [vmem:[#allocation83_spill] sm:$0xff] }
 0x2c6   :  { %v4283_v32 = vpop.xlane.xlu1 %1264  ;;  %vm5477_vm2 = vcmp.eq.s32.totalorder %v3191_v40, %v5676_v63 }
 0x2c7   :  { %5665 = vst [vmem:[#allocation53_spill] sm:$0xff] %v4283_v32 }
 0x2cb   :  { %1462 = vadd.xlane.f32.xlu1 %v1413_v49  ;;  %1464 = vadd.xlane.f32.xlu2 %v1414_v25  ;;  %v4303_v1 = vpop.xlane.xlu2 %1266  ;;  %v1417_v49 = vsel %vm5474_vm13, %v3623_v17, 0.0  ;;  %v1406_v25 = vsel %vm5479_vm12, %v3880_v45, 0.0  ;;  %vm5478_vm13 = vcmp.eq.s32.totalorder %v3191_v40, %v5677_v46  ;;  %v5678_v17 = vld [vmem:[#allocation64_spill] sm:$0xff]  ;;  %v1419_v45 = vsel %vm5477_vm2, %v3755_v26, 0.0 }
 0x2cc   :  { %5669 = vst [vmem:[#allocation65_spill] sm:$0xff] %v4303_v1  ;;  %1442 = vadd.xlane.f32.xlu0 %v1403_v50  ;;  %vm1057_vm8 = vcmp.eq.s32.totalorder %v3191_v40, %v5678_v17  ;;  %vm5480_vm2 = vcmp.eq.s32.totalorder %v3191_v40, %v3716_v16  ;;  %v5680_v26 = vld [vmem:[#allocation68_spill] sm:$0xff] }
 0x2cd   :  { %vm1060_vm12 = vcmp.eq.s32.totalorder %v3191_v40, %v5680_v26  ;;  %v5684_v16 = vld [vmem:[#allocation8_spill] sm:$0xff] }
 0x2ce   :  { %v4305_v32 = vpop.xlane.xlu1 %1234  ;;  %v5733_v26 = vld [vmem:[#allocation12_spill] sm:$0xff] }
 0x2cf   :  { %5670 = vst [vmem:[#allocation63_spill] sm:$0xff] %v4305_v32 }
 0x2d3   :  { %1468 = vadd.xlane.f32.xlu1 %v1416_v5  ;;  %1470 = vadd.xlane.f32.xlu2 %v1417_v49  ;;  %v4327_v50 = vpop.xlane.xlu2 %1322  ;;  %v1420_v5 = vsel %vm5478_vm13, %v3753_v41, 0.0  ;;  %v1409_v49 = vsel %vm1057_vm8, %v3938_v44, 0.0  ;;  %vm1071_vm13 = vcmp.eq.s32.totalorder %v3191_v40, %v3667_v42  ;;  %v1422_v41 = vsel %vm5480_vm2, %v3843_v43, 0.0  ;;  %v5683_v43 = vld [vmem:[#allocation74_spill] sm:$0xff] }
 0x2d4   :  { %1448 = vadd.xlane.f32.xlu0 %v1406_v25  ;;  %v1423_v44 = vsel %vm1071_vm13, %v3912_v29, 0.0  ;;  %vm1063_vm2 = vcmp.eq.s32.totalorder %v3191_v40, %v5683_v43  ;;  %v1524_v29 = vsel %vm884_vm3, %v5684_v16, 0.0  ;;  %vm1066_vm3 = vcmp.eq.s32.totalorder %v3191_v40, %v5688_v4 }
 0x2d6   :  { %v4329_v1 = vpop.xlane.xlu1 %1320 }
 0x2d7   :  { %5674 = vst [vmem:[#allocation57_spill] sm:$0xff] %v4329_v1  ;;  %v4331_v32 = vpop.xlane.xlu0 %1262 }
 0x2d8   :  { %5675 = vst [vmem:[#allocation75_spill] sm:$0xff] %v4331_v32 }
 0x2db   :  { %1474 = vadd.xlane.f32.xlu1 %v1419_v45  ;;  %1476 = vadd.xlane.f32.xlu2 %v1420_v5  ;;  %v1412_v45 = vsel %vm1060_vm12, %v3759_v28, 0.0 }
 0x2dc   :  { %1454 = vadd.xlane.f32.xlu0 %v1409_v49 }
 0x2de   :  { %v4351_v25 = vpop.xlane.xlu1 %1326  ;;  %v4353_v32 = vpop.xlane.xlu2 %1328 }
 0x2df   :  { %5679 = vst [vmem:[#allocation61_spill] sm:$0xff] %v4351_v25  ;;  %v4355_v1 = vpop.xlane.xlu0 %1232 }
 0x2e3   :  { %1480 = vadd.xlane.f32.xlu1 %v1422_v41  ;;  %1482 = vadd.xlane.f32.xlu2 %v1423_v44  ;;  %v5685_v41 = vld [vmem:[#allocation9_spill] sm:$0xff]  ;;  %v1415_v44 = vsel %vm1063_vm2, %v3792_v47, 0.0  ;;  %v1526_v47 = vsel %vm886_vm4, %v3246_v19, 0.0  ;;  %vm1072_vm4 = vcmp.eq.s32.totalorder %v3191_v40, %v3790_v31 }
 0x2e4   :  { %1460 = vadd.xlane.f32.xlu0 %v1412_v45  ;;  %v1525_v28 = vsel %vm885_vm1, %v5685_v41, 0.0  ;;  %v1621_v13 = vsel %vm1045_vm7, %v5685_v41, 0.0  ;;  %vm1069_vm1 = vcmp.eq.s32.totalorder %v3191_v40, %v5691_v55  ;;  %v5692_v41 = vld [vmem:[#allocation15_spill] sm:$0xff]  ;;  %vm5707_vm7 = vcmp.eq.s32.totalorder %v3191_v40, %v5612_v62 }
 0x2e5   :  { %v1527_v0 = vsel %vm887_vm5, %v5692_v41, 0.0  ;;  %vm5703_vm5 = vcmp.eq.s32.totalorder %v3191_v40, %v3254_v24  ;;  %v1533_v24 = vsel %vm5707_vm7, %v5706_v61, 0.0  ;;  %v1630_v62 = vsel %vm5711_vm11, %v3474_v56, 0.0 }
 0x2e6   :  { %v4375_v5 = vpop.xlane.xlu1 %1332  ;;  %v4377_v49 = vpop.xlane.xlu2 %1334  ;;  %vm5720_vm7 = vcmp.eq.s32.totalorder %v3191_v40, %v5601_v37 }
 0x2e7   :  { %5681 = vst [vmem:[#allocation73_spill] sm:$0xff] %v4375_v5  ;;  %v4379_v25 = vpop.xlane.xlu0 %1312 }
 0x2e8   :  { %5682 = vst [vmem:[#allocation83_spill] sm:$0xff] %v4377_v49 }
 0x2eb   :  { %1556 = vadd.xlane.f32.xlu1 %v1524_v29  ;;  %1558 = vadd.xlane.f32.xlu2 %v1525_v28  ;;  %v1418_v29 = vsel %vm1066_vm3, %v3812_v52, 0.0  ;;  %v1623_v52 = vsel %vm1047_vm10, %v5692_v41, 0.0  ;;  %v5696_v41 = vld [vmem:[#allocation20_spill] sm:$0xff]  ;;  %vm5709_vm10 = vcmp.eq.s32.totalorder %v3191_v40, %v3252_v23 }
 0x2ec   :  { %1466 = vadd.xlane.f32.xlu0 %v1415_v44  ;;  %v1625_v23 = vsel %vm5713_vm15, %v5696_v41, 0.0  ;;  %vm5730_vm15 = vcmp.eq.s32.totalorder %v3191_v40, %v5655_v58  ;;  %v5738_v58 = vld [vmem:[#allocation130_spill] sm:$0xff] }
 0x2ee   :  { %v4395_v45 = vpop.xlane.xlu1 %1338  ;;  %v4397_v49 = vpop.xlane.xlu2 %1340 }
 0x2ef   :  { %5686 = vst [vmem:[#allocation64_spill] sm:$0xff] %v4395_v45  ;;  %v4399_v5 = vpop.xlane.xlu0 %1318 }
 0x2f0   :  { %5687 = vst [vmem:[#allocation68_spill] sm:$0xff] %v4397_v49 }
 0x2f3   :  { %1654 = vadd.xlane.f32.xlu1 %v1621_v13  ;;  %1560 = vadd.xlane.f32.xlu2 %v1526_v47  ;;  %v1421_v13 = vsel %vm1069_vm1, %v3865_v6, 0.0  ;;  %v1529_v6 = vsel %vm889_vm6, %v5696_v41, 0.0  ;;  %vm5704_vm6 = vcmp.eq.s32.totalorder %v3191_v40, %v5639_v60 }
 0x2f4   :  { %1472 = vadd.xlane.f32.xlu0 %v1418_v29 }
 0x2f6   :  { %v4415_v28 = vpop.xlane.xlu1 %1344  ;;  %v4417_v44 = vpop.xlane.xlu2 %1346 }
 0x2f7   :  { %5689 = vst [vmem:[#allocation74_spill] sm:$0xff] %v4415_v28  ;;  %v4419_v49 = vpop.xlane.xlu0 %1324 }
 0x2f8   :  { %5690 = vst [vmem:[#allocation8_spill] sm:$0xff] %v4417_v44 }
 0x2fb   :  { %1562 = vadd.xlane.f32.xlu1 %v1527_v0  ;;  %1658 = vadd.xlane.f32.xlu2 %v1623_v52  ;;  %v1424_v0 = vsel %vm1072_vm4, %v3917_v53, 0.0  ;;  %v1620_v53 = vsel %vm1044_vm0, %v5684_v16, 0.0  ;;  %v1622_v16 = vsel %vm5704_vm6, %v3246_v19, 0.0  ;;  %v1528_v19 = vsel %vm5709_vm10, %v5695_v12, 0.0 }
 0x2fc   :  { %1478 = vadd.xlane.f32.xlu0 %v1421_v13  ;;  %vm5716_vm0 = vcmp.eq.s32.totalorder %v3191_v40, %v5618_v59  ;;  %vm5718_vm6 = vcmp.eq.s32.totalorder %v3191_v40, %v3243_v15  ;;  %v5719_v59 = vld [vmem:[#allocation80_spill] sm:$0xff]  ;;  %vm5723_vm10 = vcmp.eq.s32.totalorder %v3191_v40, %v5660_v3 }
 0x2fd   :  { %v1531_v2 = vsel %vm5718_vm6, %v3373_v33, 0.0  ;;  %v1635_v17 = vsel %vm5723_vm10, %v3608_v20, 0.0  ;;  %vm1972_vm10 = vcmask 7168  }
 0x2fe   :  { %v4435_v47 = vpop.xlane.xlu1 %1350  ;;  %v4437_v29 = vpop.xlane.xlu2 %1352 }
 0x2ff   :  { %5693 = vst [vmem:[#allocation9_spill] sm:$0xff] %v4435_v47  ;;  %v4439_v44 = vpop.xlane.xlu0 %1330 }
 0x300   :  { %5694 = vst [vmem:[#allocation82_spill] sm:$0xff] %v4437_v29 }
 0x303   :  { %1660 = vadd.xlane.f32.xlu1 %v1624_v54  ;;  %1566 = vadd.xlane.f32.xlu2 %v1529_v6  ;;  %v1626_v54 = vsel %vm1050_vm14, %v5699_v10, 0.0  ;;  %v1532_v10 = vsel %vm5703_vm5, %v5702_v51, 0.0  ;;  %vm5712_vm14 = vcmp.eq.s32.totalorder %v3191_v40, %v3278_v38  ;;  %v1536_v38 = vsel %vm5716_vm0, %v5715_v8, 0.0 }
 0x304   :  { %1484 = vadd.xlane.f32.xlu0 %v1424_v0  ;;  %v1535_v48 = vsel %vm5712_vm14, %v3476_v11, 0.0  ;;  %vm5717_vm5 = vcmp.eq.s32.totalorder %v3191_v40, %v5654_v35  ;;  %v1538_v35 = vsel %vm5720_vm7, %v3694_v39, 0.0  ;;  %vm5736_vm0 = vcmp.eq.s32.totalorder %v3191_v40, %v5666_v9 }
 0x305   :  { %vm5750_vm7 = vcmp.eq.s32.totalorder %v3191_v40, %v5661_v18 }
 0x306   :  { %v4455_v52 = vpop.xlane.xlu1 %1356  ;;  %v4457_v13 = vpop.xlane.xlu2 %1358 }
 0x307   :  { %5697 = vst [vmem:[#allocation93_spill] sm:$0xff] %v4455_v52  ;;  %v4459_v29 = vpop.xlane.xlu0 %1336 }
 0x308   :  { %5698 = vst [vmem:[#allocation15_spill] sm:$0xff] %v4457_v13 }
 0x30b   :  { %1568 = vadd.xlane.f32.xlu1 %v1530_v7  ;;  %1664 = vadd.xlane.f32.xlu2 %v1626_v54 }
 0x30c   :  { %1652 = vadd.xlane.f32.xlu0 %v1620_v53  ;;  %v1629_v53 = vsel %vm5708_vm9, %v5706_v61, 0.0  ;;  %vm5721_vm9 = vcmp.eq.s32.totalorder %v3191_v40, %v5650_v14  ;;  %v5724_v14 = vld [vmem:[#allocation14_spill] sm:$0xff] }
 0x30d   :  { %v1628_v15 = vsel %vm5721_vm9, %v5702_v51, 0.0  ;;  %vm5725_vm11 = vcmp.eq.s32.totalorder %v3191_v40, %v5724_v14  ;;  %vm5756_vm9 = vcmp.eq.s32.totalorder %v3191_v40, %v5672_v57 }
 0x30e   :  { %v4473_v6 = vpop.xlane.xlu1 %1362  ;;  %v4475_v0 = vpop.xlane.xlu2 %1428  ;;  %v1534_v51 = vsel %vm5725_vm11, %v3474_v56, 0.0  ;;  %v1631_v56 = vsel %vm5730_vm15, %v3476_v11, 0.0  ;;  %vm5774_vm15 = vcmp.eq.s32.totalorder %v3191_v40, %v5676_v63 }
 0x30f   :  { %5700 = vst [vmem:[#allocation13_spill] sm:$0xff] %v4473_v6  ;;  %v4477_v13 = vpop.xlane.xlu0 %1342 }
 0x310   :  { %5701 = vst [vmem:[#allocation20_spill] sm:$0xff] %v4477_v13  ;;  %v5797_v13 = vld [vmem:[#allocation135_spill] sm:$0xff] }
 0x313   :  { %1666 = vadd.xlane.f32.xlu1 %v1627_v36  ;;  %1572 = vadd.xlane.f32.xlu2 %v1532_v10 }
 0x314   :  { %1656 = vadd.xlane.f32.xlu0 %v1622_v16 }
 0x316   :  { %v4491_v34 = vpop.xlane.xlu1 %1432  ;;  %v4493_v7 = vpop.xlane.xlu2 %1434 }
 0x317   :  { %v4495_v54 = vpop.xlane.xlu0 %1348 }
 0x318   :  { %5705 = vst [vmem:[#allocation34_spill] sm:$0xff] %v4495_v54  ;;  %v5754_v54 = vld [vmem:[#allocation35_spill] sm:$0xff] }
 0x31b   :  { %1574 = vadd.xlane.f32.xlu1 %v1533_v24  ;;  %1670 = vadd.xlane.f32.xlu2 %v1629_v53  ;;  %v1632_v24 = vsel %vm5717_vm5, %v5715_v8, 0.0 }
 0x31c   :  { %1564 = vadd.xlane.f32.xlu0 %v1528_v19 }
 0x31e   :  { %v4509_v60 = vpop.xlane.xlu1 %1438  ;;  %v4511_v36 = vpop.xlane.xlu2 %1440 }
 0x31f   :  { %v4513_v10 = vpop.xlane.xlu0 %1354 }
 0x320   :  { %5710 = vst [vmem:[#allocation46_spill] sm:$0xff] %v4513_v10 }
 0x323   :  { %1672 = vadd.xlane.f32.xlu1 %v1630_v62  ;;  %1578 = vadd.xlane.f32.xlu2 %v1535_v48  ;;  %v1633_v62 = vsel %vm1057_vm8, %v5719_v59, 0.0  ;;  %vm5722_vm8 = vcmp.eq.s32.totalorder %v3191_v40, %v5623_v21  ;;  %v5726_v21 = vld [vmem:[#allocation10_spill] sm:$0xff] }
 0x324   :  { %1662 = vadd.xlane.f32.xlu0 %v1625_v23  ;;  %v1539_v37 = vsel %vm5722_vm8, %v3608_v20, 0.0  ;;  %v1636_v3 = vsel %vm1060_vm12, %v5726_v21, 0.0  ;;  %v5727_v20 = vld [vmem:[#allocation11_spill] sm:$0xff] }
 0x326   :  { %v4527_v12 = vpop.xlane.xlu1 %1444  ;;  %v4529_v16 = vpop.xlane.xlu2 %1446 }
 0x327   :  { %v4531_v61 = vpop.xlane.xlu0 %1360 }
 0x328   :  { %5714 = vst [vmem:[#allocation60_spill] sm:$0xff] %v4531_v61 }
 0x32b   :  { %1580 = vadd.xlane.f32.xlu1 %v1536_v38  ;;  %1676 = vadd.xlane.f32.xlu2 %v1632_v24 }
 0x32c   :  { %1570 = vadd.xlane.f32.xlu0 %v1531_v2  ;;  %v5728_v2 = vld [vmem:[#allocation25_spill] sm:$0xff] }
 0x32d   :  { %vm5729_vm14 = vcmp.eq.s32.totalorder %v3191_v40, %v5728_v2  ;;  %v5739_v2 = vld [vmem:[#allocation18_spill] sm:$0xff] }
 0x32e   :  { %v4545_v41 = vpop.xlane.xlu1 %1450  ;;  %v4547_v53 = vpop.xlane.xlu2 %1452  ;;  %vm5740_vm5 = vcmp.eq.s32.totalorder %v3191_v40, %v5739_v2  ;;  %v5749_v2 = vld [vmem:[#allocation133_spill] sm:$0xff] }
 0x32f   :  { %v1431_v19 = vpop.xlane.xlu0 %1430 }
 0x333   :  { %1678 = vadd.xlane.f32.xlu1 %v1633_v62  ;;  %1584 = vadd.xlane.f32.xlu2 %v1538_v35  ;;  %v1541_v62 = vsel %vm5729_vm14, %v5727_v20, 0.0  ;;  %vm5768_vm14 = vcmp.eq.s32.totalorder %v3191_v40, %v5667_v30 }
 0x334   :  { %1668 = vadd.xlane.f32.xlu0 %v1628_v15 }
 0x336   :  { %v4561_v33 = vpop.xlane.xlu1 %1456  ;;  %v4563_v48 = vpop.xlane.xlu2 %1458 }
 0x337   :  { %v4565_v23 = vpop.xlane.xlu0 %1436 }
 0x33b   :  { %1586 = vadd.xlane.f32.xlu1 %v1539_v37  ;;  %1682 = vadd.xlane.f32.xlu2 %v1635_v17  ;;  %v5734_v17 = vld [vmem:[#allocation31_spill] sm:$0xff] }
 0x33c   :  { %1576 = vadd.xlane.f32.xlu0 %v1534_v51  ;;  %vm5735_vm12 = vcmp.eq.s32.totalorder %v3191_v40, %v5734_v17  ;;  %v1638_v51 = vsel %vm5736_vm0, %v5733_v26, 0.0 }
 0x33d   :  { %v1542_v14 = vsel %vm5735_vm12, %v5733_v26, 0.0  ;;  %v5744_v26 = vld [vmem:[#allocation19_spill] sm:$0xff] }
 0x33e   :  { %v4579_v8 = vpop.xlane.xlu1 %1462  ;;  %v4581_v38 = vpop.xlane.xlu2 %1464 }
 0x33f   :  { %v4583_v24 = vpop.xlane.xlu0 %1442 }
 0x343   :  { %1684 = vadd.xlane.f32.xlu1 %v1636_v3  ;;  %1590 = vadd.xlane.f32.xlu2 %v1541_v62  ;;  %v5737_v3 = vld [vmem:[#allocation127_spill] sm:$0xff]  ;;  %v1537_v62 = vsel %vm5740_vm5, %v5719_v59, 0.0  ;;  %v5746_v59 = vld [vmem:[#allocation28_spill] sm:$0xff]  ;;  %vm5783_vm5 = vcmp.eq.s32.totalorder %v3191_v40, %v5677_v46 }
 0x344   :  { %1674 = vadd.xlane.f32.xlu0 %v1631_v56  ;;  %v1365_v11 = vadd.f32 %v5738_v58, %v5737_v3  ;;  %v5741_v56 = vld [vmem:[#allocation120_spill] sm:$0xff]  ;;  %vm5747_vm6 = vcmp.eq.s32.totalorder %v3191_v40, %v5746_v59 }
 0x345   :  { %v1364_v6 = vadd.f32 %v4227_v27, %v5741_v56  ;;  %v5748_v27 = vld [vmem:[#allocation124_spill] sm:$0xff] }
 0x346   :  { %v4597_v35 = vpop.xlane.xlu1 %1468  ;;  %v4599_v15 = vpop.xlane.xlu2 %1470  ;;  %2564 = vlog2.f32 %v1365_v11  ;;  %v1493_v11 = vadd.f32 %v1431_v19, %v5737_v3  ;;  %v5757_v19 = vld [vmem:[#allocation123_spill] sm:$0xff] }
 0x347   :  { %5731 = vst [vmem:[#allocation88_spill] sm:$0xff] %v4597_v35  ;;  %v4601_v37 = vpop.xlane.xlu0 %1448  ;;  %2566 = vlog2.f32 %v1364_v6  ;;  %v1634_v6 = vsel %vm5750_vm7, %v3694_v39, 0.0  ;;  %v1367_v3 = vadd.f32 %v4307_v22, %v5757_v19  ;;  %v5794_v35 = vld [vmem:[#allocation71_spill] sm:$0xff] }
 0x348   :  { %5732 = vst [vmem:[#allocation80_spill] sm:$0xff] %v4599_v15 }
 0x34b   :  { %1592 = vadd.xlane.f32.xlu1 %v1542_v14  ;;  %1688 = vadd.xlane.f32.xlu2 %v1638_v51  ;;  %v1639_v14 = vsel %vm1063_vm2, %v5744_v26, 0.0  ;;  %v5745_v51 = vld [vmem:[#allocation16_spill] sm:$0xff]  ;;  %vm5755_vm2 = vcmp.eq.s32.totalorder %v3191_v40, %v5754_v54 }
 0x34c   :  { %1582 = vadd.xlane.f32.xlu0 %v1537_v62  ;;  %v1544_v58 = vsel %vm5747_vm6, %v5745_v51, 0.0  ;;  %v1366_v62 = vadd.f32 %v5749_v2, %v5748_v27  ;;  %v2565_v43 = vpop.eup %2564  ;;  %v5753_v2 = vld [vmem:[#allocation30_spill] sm:$0xff] }
 0x34d   :  { %v2567_v52 = vpop.eup %2566  ;;  %v1545_v39 = vsel %vm5755_vm2, %v5753_v2, 0.0  ;;  %v1641_v18 = vsel %vm5756_vm9, %v5753_v2, 0.0 }
 0x34e   :  { %v4619_v17 = vpop.xlane.xlu1 %1474  ;;  %v4621_v61 = vpop.xlane.xlu2 %1476  ;;  %2568 = vlog2.f32 %v1366_v62  ;;  %v5758_v62 = vld [vmem:[#allocation23_spill] sm:$0xff] }
 0x34f   :  { %5742 = vst [vmem:[#allocation14_spill] sm:$0xff] %v4619_v17  ;;  %v4623_v9 = vpop.xlane.xlu0 %1454  ;;  %2570 = vlog2.f32 %v1493_v11  ;;  %vm5759_vm8 = vcmp.eq.s32.totalorder %v3191_v40, %v5758_v62  ;;  %v5760_v11 = vld [vmem:[#allocation67_spill] sm:$0xff]  ;;  %v5775_v17 = vld [vmem:[#allocation117_spill] sm:$0xff] }
 0x350   :  { %5743 = vst [vmem:[#allocation10_spill] sm:$0xff] %v4621_v61  ;;  %2572 = vlog2.f32 %v1367_v3  ;;  %v5763_v62 = vld [vmem:[#allocation103_spill] sm:$0xff] }
 0x351   :  { %vm1073_vm11 = vcmp.eq.s32.totalorder %v3191_v40, %v5763_v62 }
 0x353   :  { %1690 = vadd.xlane.f32.xlu1 %v1639_v14  ;;  %1596 = vadd.xlane.f32.xlu2 %v1544_v58  ;;  %v1719_v14 = vmul.f32 0.6931472, %v2565_v43  ;;  %v1717_v58 = vmul.f32 0.6931472, %v2567_v52  ;;  %v1540_v52 = vsel %vm5759_vm8, %v5726_v21, 0.0 }
 0x354   :  { %1680 = vadd.xlane.f32.xlu0 %v1634_v6  ;;  %v1495_v6 = vadd.f32 %v4493_v7, %v5757_v19  ;;  %v2569_v54 = vpop.eup %2568 }
 0x355   :  { %v1780_v43 = vadd.f32 %v1717_v58, %v5760_v11  ;;  %v2571_v2 = vpop.eup %2570  ;;  %v1721_v7 = vmul.f32 0.6931472, %v2569_v54  ;;  %v1637_v54 = vsel %vm5768_vm14, %v5727_v20, 0.0 }
 0x356   :  { %v4640_v10 = vpop.xlane.xlu1 %1480  ;;  %v4642_v47 = vpop.xlane.xlu2 %1482  ;;  %2574 = vlog2.f32 %v1495_v6  ;;  %v1847_v21 = vmul.f32 0.6931472, %v2571_v2  ;;  %v5769_v2 = vld [vmem:[#allocation17_spill] sm:$0xff] }
 0x357   :  { %5751 = vst [vmem:[#allocation11_spill] sm:$0xff] %v4640_v10  ;;  %v4644_v59 = vpop.xlane.xlu0 %1460  ;;  %v2573_v4 = vpop.eup %2572 }
 0x358   :  { %5752 = vst [vmem:[#allocation25_spill] sm:$0xff] %v4642_v47  ;;  %v5761_v47 = vld [vmem:[#allocation72_spill] sm:$0xff] }
 0x359   :  { %v1781_v57 = vadd.f32 %v1719_v14, %v5761_v47 }
 0x35b   :  { %1598 = vadd.xlane.f32.xlu1 %v1545_v39  ;;  %1694 = vadd.xlane.f32.xlu2 %v1641_v18 }
 0x35c   :  { %1588 = vadd.xlane.f32.xlu0 %v1540_v52  ;;  %v5764_v52 = vld [vmem:[#allocation42_spill] sm:$0xff] }
 0x35d   :  { %v1642_v3 = vsel %vm1066_vm3, %v5764_v52, 0.0 }
 0x35e   :  { %v1557_v10 = vpop.xlane.xlu1 %1556  ;;  %v1559_v22 = vpop.xlane.xlu2 %1558 }
 0x35f   :  { %v1812_v39 = vsub.f32 %v1780_v43, %v1557_v10  ;;  %v1813_v18 = vsub.f32 %v1781_v57, %v1559_v22  ;;  %v4664_v28 = vpop.xlane.xlu0 %1466  ;;  %v5765_v10 = vld [vmem:[#allocation122_spill] sm:$0xff]  ;;  %v5766_v57 = vld [vmem:[#allocation27_spill] sm:$0xff]  ;;  %v5767_v22 = vld [vmem:[#allocation49_spill] sm:$0xff] }
 0x360   :  { %5762 = vst [vmem:[#allocation12_spill] sm:$0xff] %v4664_v28  ;;  %v1425_v43 = vsel %vm1073_vm11, %v5765_v10, 0.0  ;;  %v1369_v6 = vadd.f32 %v5767_v22, %v5766_v57  ;;  %v2575_v10 = vpop.eup %2574  ;;  %v1723_v22 = vmul.f32 0.6931472, %v2573_v4  ;;  %v5777_v4 = vld [vmem:[#allocation26_spill] sm:$0xff]  ;;  %v1497_v42 = vadd.f32 %v4509_v60, %v5766_v57  ;;  %v5816_v60 = vld [vmem:[#allocation52_spill] sm:$0xff] }
 0x361   :  { %v1973_v19 = vsel %vm1972_vm10, %v1812_v39, 0.0  ;;  %v1974_v58 = vsel %vm1972_vm10, %v1813_v18, 0.0  ;;  %v1496_v39 = vadd.f32 %v4565_v23, %v5769_v2  ;;  %v4687_v18 = vadd.f32 %v1847_v21, %v5761_v47  ;;  %v5772_v23 = vld [vmem:[#allocation109_spill] sm:$0xff] }
 0x362   :  { %v1975_v14 = vadd.f32 %v1974_v58, %v1973_v19  ;;  %v5770_v19 = vld [vmem:[#allocation76_spill] sm:$0xff]  ;;  %2576 = vlog2.f32 %v1369_v6  ;;  %vm1074_vm3 = vcmp.eq.s32.totalorder %v3191_v40, %v5772_v23  ;;  %v1851_v47 = vmul.f32 0.6931472, %v2575_v10 }
 0x363   :  { %1696 = vadd.xlane.f32.xlu1 %v1642_v3  ;;  %1486 = vadd.xlane.f32.xlu2 %v1425_v43  ;;  %v1782_v58 = vadd.f32 %v1721_v7, %v5770_v19  ;;  %2578 = vlog2.f32 %v1496_v39  ;;  %vm5778_vm12 = vcmp.eq.s32.totalorder %v3191_v40, %v5777_v4  ;;  %v1504_v31 = vadd.f32 %v4547_v53, %v5816_v60 }
 0x364   :  { %1686 = vadd.xlane.f32.xlu0 %v1637_v54  ;;  %v5773_v54 = vld [vmem:[#allocation45_spill] sm:$0xff] }
 0x365   :  { %v1643_v6 = vsel %vm5774_vm15, %v5773_v54, 0.0 }
 0x366   :  { %v4690_v61 = vpop.xlane.xlu1 %1654  ;;  %v1561_v3 = vpop.xlane.xlu2 %1560 }
 0x367   :  { %v1814_v30 = vsub.f32 %v1782_v58, %v1561_v3  ;;  %v4694_v20 = vpop.xlane.xlu0 %1472  ;;  %v1426_v58 = vsel %vm1074_vm3, %v5775_v17, 0.0  ;;  %v5776_v3 = vld [vmem:[#allocation128_spill] sm:$0xff] }
 0x368   :  { %5771 = vst [vmem:[#allocation31_spill] sm:$0xff] %v4694_v20  ;;  %v1370_v39 = vadd.f32 %v4379_v25, %v5776_v3  ;;  %v1498_v10 = vadd.f32 %v4511_v36, %v5776_v3  ;;  %v2577_v63 = vpop.eup %2576  ;;  %v5781_v3 = vld [vmem:[#allocation116_spill] sm:$0xff] }
 0x369   :  { %v1976_v21 = vsel %vm1972_vm10, %v1814_v30, 0.0  ;;  %v1492_v30 = vadd.f32 %v4475_v0, %v5741_v56  ;;  %v2579_v25 = vpop.eup %2578  ;;  %vm1075_vm0 = vcmp.eq.s32.totalorder %v3191_v40, %v5781_v3  ;;  %v1727_v0 = vmul.f32 0.6931472, %v2577_v63  ;;  %v5787_v63 = vld [vmem:[#allocation66_spill] sm:$0xff]  ;;  %v5838_v3 = vld [vmem:[#allocation57_spill] sm:$0xff] }
 0x36a   :  { %v1977_v7 = vadd.f32 %v1976_v21, %v1975_v14  ;;  %v1543_v14 = vsel %vm5778_vm12, %v5744_v26, 0.0  ;;  %v5779_v21 = vld [vmem:[#allocation81_spill] sm:$0xff]  ;;  %2580 = vlog2.f32 %v1370_v39  ;;  %v1853_v56 = vmul.f32 0.6931472, %v2579_v25  ;;  %v5786_v26 = vld [vmem:[#allocation62_spill] sm:$0xff] }
 0x36b   :  { %1698 = vadd.xlane.f32.xlu1 %v1643_v6  ;;  %1488 = vadd.xlane.f32.xlu2 %v1426_v58  ;;  %v1783_v17 = vadd.f32 %v1723_v22, %v5779_v21  ;;  %v4719_v43 = vadd.f32 %v1851_v47, %v5779_v21  ;;  %2582 = vlog2.f32 %v1498_v10  ;;  %v5784_v21 = vld [vmem:[#allocation118_spill] sm:$0xff]  ;;  %vm5788_vm6 = vcmp.eq.s32.totalorder %v3191_v40, %v5787_v63 }
 0x36c   :  { %1594 = vadd.xlane.f32.xlu0 %v1543_v14  ;;  %2584 = vlog2.f32 %v1492_v30  ;;  %v5782_v14 = vld [vmem:[#allocation56_spill] sm:$0xff]  ;;  %v5789_v30 = vld [vmem:[#allocation131_spill] sm:$0xff]  ;;  %v1373_v63 = vadd.f32 %v4399_v5, %v5797_v13 }
 0x36d   :  { %v1644_v39 = vsel %vm5783_vm5, %v5782_v14, 0.0  ;;  %v1499_v25 = vadd.f32 %v4583_v24, %v5789_v30 }
 0x36e   :  { %v1563_v6 = vpop.xlane.xlu1 %1562  ;;  %v4721_v58 = vpop.xlane.xlu2 %1658 }
 0x36f   :  { %v1815_v4 = vsub.f32 %v1783_v17, %v1563_v6  ;;  %v4725_v36 = vpop.xlane.xlu0 %1478  ;;  %v1427_v17 = vsel %vm1075_vm0, %v5784_v21, 0.0  ;;  %v5785_v6 = vld [vmem:[#allocation51_spill] sm:$0xff] }
 0x370   :  { %5780 = vst [vmem:[#allocation127_spill] sm:$0xff] %v4725_v36  ;;  %v1372_v10 = vadd.f32 %v5786_v26, %v5785_v6  ;;  %v2581_v46 = vpop.eup %2580  ;;  %v5791_v36 = vld [vmem:[#allocation92_spill] sm:$0xff] }
 0x371   :  { %v1978_v22 = vsel %vm1972_vm10, %v1815_v4, 0.0  ;;  %v1494_v4 = vadd.f32 %v4491_v34, %v5748_v27  ;;  %v4754_v26 = vadd.f32 %v1727_v0, %v5791_v36  ;;  %v1729_v27 = vmul.f32 0.6931472, %v2581_v46 }
 0x372   :  { %v4730_v47 = vadd.f32 %v1978_v22, %v1977_v7  ;;  %v1640_v7 = vsel %vm5788_vm6, %v5745_v51, 0.0  ;;  %v5790_v22 = vld [vmem:[#allocation85_spill] sm:$0xff]  ;;  %2586 = vlog2.f32 %v1372_v10  ;;  %v5795_v10 = vld [vmem:[#allocation36_spill] sm:$0xff] }
 0x373   :  { %1700 = vadd.xlane.f32.xlu1 %v1644_v39  ;;  %1490 = vadd.xlane.f32.xlu2 %v1427_v17  ;;  %v4751_v21 = vadd.f32 %v1853_v56, %v5790_v22  ;;  %v2583_v39 = vpop.eup %2582  ;;  %2588 = vlog2.f32 %v1499_v25  ;;  %vm5796_vm7 = vcmp.eq.s32.totalorder %v3191_v40, %v5795_v10  ;;  %v5798_v25 = vld [vmem:[#allocation29_spill] sm:$0xff]  ;;  %v5801_v10 = vld [vmem:[#allocation90_spill] sm:$0xff] }
 0x374   :  { %1692 = vadd.xlane.f32.xlu0 %v1640_v7  ;;  %v2585_v51 = vpop.eup %2584  ;;  %2590 = vlog2.f32 %v1494_v4  ;;  %v1857_v0 = vmul.f32 0.6931472, %v2583_v39  ;;  %v5793_v7 = vld [vmem:[#allocation70_spill] sm:$0xff]  ;;  %v1550_v24 = vsel %vm5796_vm7, %v5794_v35, 0.0  ;;  %vm5799_vm2 = vcmp.eq.s32.totalorder %v3191_v40, %v5798_v25  ;;  %v5800_v39 = vld [vmem:[#allocation44_spill] sm:$0xff] }
 0x375   :  { %v1845_v56 = vmul.f32 0.6931472, %v2585_v51  ;;  %v1645_v15 = vsel %vm1069_vm1, %v5793_v7, 0.0  ;;  %v1546_v46 = vsel %vm5799_vm2, %v5764_v52, 0.0  ;;  %v1501_v4 = vadd.f32 %v4529_v16, %v5797_v13  ;;  %v5812_v16 = vld [vmem:[#allocation77_spill] sm:$0xff] }
 0x376   :  { %v4756_v17 = vpop.xlane.xlu1 %1660  ;;  %v4758_v20 = vpop.xlane.xlu2 %1566  ;;  %v1368_v51 = vadd.f32 %v5800_v39, %v5769_v2  ;;  %v4788_v5 = vadd.f32 %v1857_v0, %v5801_v10  ;;  %2592 = vlog2.f32 %v1373_v63  ;;  %v5802_v39 = vld [vmem:[#allocation86_spill] sm:$0xff]  ;;  %v5805_v63 = vsub.f32 %v4687_v18, %v4690_v61  ;;  %v5809_v18 = vld [vmem:[#allocation48_spill] sm:$0xff] }
 0x377   :  { %v4764_v34 = vpop.xlane.xlu0 %1484  ;;  %v1908_v52 = vadd.f32 %v1845_v56, %v5760_v11  ;;  %2594 = vlog2.f32 %v1501_v4  ;;  %v1647_v4 = vsel %vm1071_vm13, %v5802_v39, 0.0  ;;  %v5822_v53 = vsub.f32 %v4751_v21, %v4756_v17 }
 0x378   :  { %5792 = vst [vmem:[#allocation130_spill] sm:$0xff] %v4764_v34  ;;  %v2587_v55 = vpop.eup %2586  ;;  %v4785_v34 = vadd.f32 %v1729_v27, %v5801_v10  ;;  %2596 = vlog2.f32 %v1368_v51  ;;  %v5803_v10 = vld [vmem:[#allocation41_spill] sm:$0xff]  ;;  %v2049_v56 = vsel %vm1972_vm10, %v5805_v63, 0.0 }
 0x379   :  { %v1733_v0 = vmul.f32 0.6931472, %v2587_v55  ;;  %vm5804_vm1 = vcmp.eq.s32.totalorder %v3191_v40, %v5803_v10  ;;  %v5806_v55 = vld [vmem:[#allocation59_spill] sm:$0xff] }
 0x37a   :  { %v1551_v28 = vsel %vm5804_vm1, %v5802_v39, 0.0  ;;  %v1375_v51 = vadd.f32 %v4327_v50, %v5806_v55  ;;  %v5811_v50 = vld [vmem:[#allocation97_spill] sm:$0xff] }
 0x37b   :  { %1702 = vadd.xlane.f32.xlu1 %v1645_v15  ;;  %1608 = vadd.xlane.f32.xlu2 %v1550_v24  ;;  %v2589_v15 = vpop.eup %2588 }
 0x37c   :  { %1600 = vadd.xlane.f32.xlu0 %v1546_v46  ;;  %v2591_v25 = vpop.eup %2590  ;;  %v1859_v46 = vmul.f32 0.6931472, %v2589_v15  ;;  %2598 = vlog2.f32 %v1375_v51  ;;  %v5814_v51 = vld [vmem:[#allocation39_spill] sm:$0xff] }
 0x37d   :  { %v1849_v11 = vmul.f32 0.6931472, %v2591_v25  ;;  %v1502_v25 = vadd.f32 %v4601_v37, %v5809_v18  ;;  %vm5815_vm13 = vcmp.eq.s32.totalorder %v3191_v40, %v5814_v51 }
 0x37e   :  { %v4790_v24 = vpop.xlane.xlu1 %1568  ;;  %v4792_v45 = vpop.xlane.xlu2 %1664 }
 0x37f   :  { %v1653_v2 = vpop.xlane.xlu0 %1652  ;;  %2600 = vlog2.f32 %v1502_v25  ;;  %v1376_v25 = vadd.f32 %v4419_v49, %v5816_v60  ;;  %v5820_v49 = vld [vmem:[#allocation50_spill] sm:$0xff] }
 0x380   :  { %v1940_v27 = vsub.f32 %v1908_v52, %v1653_v2  ;;  %v5807_v52 = vld [vmem:[#allocation32_spill] sm:$0xff]  ;;  %v2593_v2 = vpop.eup %2592  ;;  %2602 = vlog2.f32 %v1497_v42 }
 0x381   :  { %vm5808_vm9 = vcmp.eq.s32.totalorder %v3191_v40, %v5807_v52  ;;  %2604 = vlog2.f32 %v1376_v25 }
 0x382   :  { %v2048_v13 = vsel %vm1972_vm10, %v1940_v27, 0.0  ;;  %v1547_v61 = vsel %vm5808_vm9, %v5773_v54, 0.0  ;;  %v5810_v27 = vld [vmem:[#allocation102_spill] sm:$0xff]  ;;  %v1910_v54 = vadd.f32 %v1849_v11, %v5770_v19  ;;  %v1648_v19 = vsel %vm1072_vm4, %v5812_v16, 0.0  ;;  %v5813_v11 = vld [vmem:[#allocation95_spill] sm:$0xff] }
 0x383   :  { %v2050_v15 = vadd.f32 %v2049_v56, %v2048_v13  ;;  %1610 = vadd.xlane.f32.xlu1 %v1551_v28  ;;  %1706 = vadd.xlane.f32.xlu2 %v1647_v4  ;;  %v4823_v39 = vadd.f32 %v1859_v46, %v5810_v27  ;;  %v4826_v13 = vadd.f32 %v1733_v0, %v5811_v50  ;;  %v2595_v28 = vpop.eup %2594  ;;  %v1735_v0 = vmul.f32 0.6931472, %v2593_v2  ;;  %v5817_v2 = vld [vmem:[#allocation38_spill] sm:$0xff] }
 0x384   :  { %1602 = vadd.xlane.f32.xlu0 %v1547_v61  ;;  %v2597_v56 = vpop.eup %2596  ;;  %v1863_v4 = vmul.f32 0.6931472, %v2595_v28  ;;  %v1553_v37 = vsel %vm5815_vm13, %v5813_v11, 0.0  ;;  %vm5818_vm8 = vcmp.eq.s32.totalorder %v3191_v40, %v5817_v2  ;;  %v5819_v28 = vsub.f32 %v4719_v43, %v4721_v58 }
 0x385   :  { %v1725_v52 = vmul.f32 0.6931472, %v2597_v56  ;;  %v1548_v42 = vsel %vm5818_vm8, %v5782_v14, 0.0  ;;  %v2055_v43 = vsel %vm1972_vm10, %v5822_v53, 0.0  ;;  %2606 = vlog2.f32 %v1504_v31 }
 0x386   :  { %v4828_v10 = vpop.xlane.xlu1 %1666  ;;  %v4830_v63 = vpop.xlane.xlu2 %1572  ;;  %v2053_v56 = vsel %vm1972_vm10, %v5819_v28, 0.0  ;;  %v1378_v31 = vadd.f32 %v4353_v32, %v4355_v1  ;;  %v5829_v53 = vsub.f32 %v4754_v26, %v4758_v20  ;;  %v1500_v32 = vadd.f32 %v4527_v12, %v5785_v6 }
 0x387   :  { %v1657_v57 = vpop.xlane.xlu0 %1656  ;;  %v1784_v51 = vadd.f32 %v1725_v52, %v5790_v22  ;;  %v5824_v22 = vld [vmem:[#allocation47_spill] sm:$0xff] }
 0x388   :  { %v1942_v46 = vsub.f32 %v1910_v54, %v1657_v57  ;;  %v2599_v57 = vpop.eup %2598  ;;  %vm5825_vm4 = vcmp.eq.s32.totalorder %v3191_v40, %v5824_v22  ;;  %v1982_v23 = vsel %vm1972_vm10, %v5829_v53, 0.0 }
 0x389   :  { %v2601_v14 = vpop.eup %2600  ;;  %v1739_v17 = vmul.f32 0.6931472, %v2599_v57  ;;  %v5826_v57 = vld [vmem:[#allocation33_spill] sm:$0xff] }
 0x38a   :  { %v2051_v61 = vsel %vm1972_vm10, %v1942_v46, 0.0  ;;  %vm5827_vm14 = vcmp.eq.s32.totalorder %v3191_v40, %v5826_v57  ;;  %v5833_v57 = vld [vmem:[#allocation84_spill] sm:$0xff] }
 0x38b   :  { %v2052_v54 = vadd.f32 %v2051_v61, %v2050_v15  ;;  %1708 = vadd.xlane.f32.xlu1 %v1648_v19  ;;  %1614 = vadd.xlane.f32.xlu2 %v1553_v37  ;;  %v1371_v15 = vadd.f32 %v5820_v49, %v5789_v30  ;;  %v5821_v37 = vld [vmem:[#allocation100_spill] sm:$0xff]  ;;  %v2603_v30 = vpop.eup %2602  ;;  %v5823_v49 = vld [vmem:[#allocation91_spill] sm:$0xff] }
 0x38c   :  { %1604 = vadd.xlane.f32.xlu0 %v1548_v42  ;;  %v4861_v61 = vadd.f32 %v1735_v0, %v5821_v37  ;;  %v4864_v19 = vadd.f32 %v1863_v4, %v5821_v37  ;;  %v1865_v42 = vmul.f32 0.6931472, %v2601_v14  ;;  %v1855_v28 = vmul.f32 0.6931472, %v2603_v30  ;;  %v5828_v37 = vld [vmem:[#allocation55_spill] sm:$0xff] }
 0x38d   :  { %v2054_v46 = vadd.f32 %v2053_v56, %v2052_v54  ;;  %2608 = vlog2.f32 %v1371_v15  ;;  %v1554_v52 = vsel %vm5825_vm4, %v5823_v49, 0.0  ;;  %v1650_v25 = vsel %vm1074_vm3, %v5823_v49, 0.0 }
 0x38e   :  { %v4870_v58 = vpop.xlane.xlu1 %1574  ;;  %v4872_v60 = vpop.xlane.xlu2 %1670  ;;  %v1505_v14 = vadd.f32 %v4623_v9, %v5828_v37  ;;  %v5832_v9 = vsub.f32 %v4785_v34, %v4790_v24  ;;  %v1913_v49 = vadd.f32 %v1855_v28, %v5791_v36  ;;  %2610 = vlog2.f32 %v1378_v31  ;;  %v5834_v31 = vld [vmem:[#allocation99_spill] sm:$0xff] }
 0x38f   :  { %v1821_v0 = vsub.f32 %v4861_v61, %v4870_v58  ;;  %v1949_v4 = vsub.f32 %v4864_v19, %v4872_v60  ;;  %v1565_v54 = vpop.xlane.xlu0 %1564  ;;  %v2056_v2 = vadd.f32 %v2055_v43, %v2054_v46  ;;  %v1549_v46 = vsel %vm5827_vm14, %v5793_v7, 0.0  ;;  %v2605_v43 = vpop.eup %2604 }
 0x390   :  { %v1816_v21 = vsub.f32 %v1784_v51, %v1565_v54  ;;  %v5830_v51 = vld [vmem:[#allocation107_spill] sm:$0xff]  ;;  %v5831_v54 = vld [vmem:[#allocation106_spill] sm:$0xff]  ;;  %v2607_v7 = vpop.eup %2606  ;;  %v1984_v20 = vsel %vm1972_vm10, %v5832_v9, 0.0  ;;  %2612 = vlog2.f32 %v1505_v14  ;;  %v1741_v24 = vmul.f32 0.6931472, %v2605_v43 }
 0x391   :  { %v4904_v30 = vadd.f32 %v1865_v42, %v5830_v51  ;;  %2614 = vlog2.f32 %v1500_v32  ;;  %v1651_v36 = vsel %vm1075_vm0, %v5833_v57, 0.0  ;;  %vm5835_vm3 = vcmp.eq.s32.totalorder %v3191_v40, %v5834_v31  ;;  %v5836_v14 = vld [vmem:[#allocation63_spill] sm:$0xff] }
 0x392   :  { %v1980_v56 = vsel %vm1972_vm10, %v1816_v21, 0.0  ;;  %v4907_v21 = vadd.f32 %v1739_v17, %v5831_v54  ;;  %v1379_v53 = vadd.f32 %v4439_v44, %v5836_v14  ;;  %v5840_v44 = vsub.f32 %v4823_v39, %v4828_v10 }
 0x393   :  { %v1981_v15 = vadd.f32 %v1980_v56, %v4730_v47  ;;  %1616 = vadd.xlane.f32.xlu1 %v1554_v52  ;;  %1712 = vadd.xlane.f32.xlu2 %v1650_v25  ;;  %v2609_v12 = vpop.eup %2608  ;;  %v1869_v52 = vmul.f32 0.6931472, %v2607_v7  ;;  %v5839_v7 = vld [vmem:[#allocation112_spill] sm:$0xff] }
 0x394   :  { %1606 = vadd.xlane.f32.xlu0 %v1549_v46  ;;  %v1731_v25 = vmul.f32 0.6931472, %v2609_v12  ;;  %v1646_v46 = vsel %vm5835_vm3, %v5794_v35, 0.0  ;;  %v2611_v32 = vpop.eup %2610  ;;  %v4940_v9 = vadd.f32 %v1741_v24, %v5839_v7  ;;  %2616 = vlog2.f32 %v1379_v53 }
 0x395   :  { %v1983_v47 = vadd.f32 %v1982_v23, %v1981_v15  ;;  %v5837_v23 = vsub.f32 %v4788_v5, %v4792_v45  ;;  %v2061_v45 = vsel %vm1972_vm10, %v5840_v44, 0.0  ;;  %v1745_v39 = vmul.f32 0.6931472, %v2611_v32  ;;  %v5844_v32 = vld [vmem:[#allocation111_spill] sm:$0xff] }
 0x396   :  { %v4913_v26 = vpop.xlane.xlu1 %1672  ;;  %v4915_v56 = vpop.xlane.xlu2 %1578  ;;  %v1787_v12 = vadd.f32 %v1731_v25, %v5810_v27  ;;  %v5841_v27 = vld [vmem:[#allocation37_spill] sm:$0xff]  ;;  %v1503_v53 = vadd.f32 %v4545_v41, %v5806_v55 }
 0x397   :  { %v1950_v6 = vsub.f32 %v4904_v30, %v4913_v26  ;;  %v1823_v17 = vsub.f32 %v4907_v21, %v4915_v56  ;;  %v1663_v42 = vpop.xlane.xlu0 %1662  ;;  %v1985_v22 = vadd.f32 %v1984_v20, %v1983_v47  ;;  %v2059_v43 = vsel %vm1972_vm10, %v5837_v23, 0.0  ;;  %v2613_v35 = vpop.eup %2612  ;;  %v5848_v30 = vld [vmem:[#allocation40_spill] sm:$0xff] }
 0x398   :  { %v1945_v34 = vsub.f32 %v1913_v49, %v1663_v42  ;;  %v1374_v47 = vadd.f32 %v5838_v3, %v5809_v18  ;;  %v4943_v20 = vadd.f32 %v1869_v52, %v5839_v7  ;;  %v2615_v18 = vpop.eup %2614  ;;  %v1871_v10 = vmul.f32 0.6931472, %v2613_v35 }
 0x399   :  { %vm5842_vm15 = vcmp.eq.s32.totalorder %v3191_v40, %v5841_v27 }
 0x39a   :  { %v2057_v15 = vsel %vm1972_vm10, %v1945_v34, 0.0  ;;  %2618 = vlog2.f32 %v1374_v47  ;;  %v1552_v25 = vsel %vm5842_vm15, %v5812_v16, 0.0  ;;  %v4970_v3 = vadd.f32 %v1871_v10, %v5844_v32  ;;  %v5845_v47 = vld [vmem:[#allocation121_spill] sm:$0xff] }
 0x39b   :  { %v2058_v28 = vadd.f32 %v2057_v15, %v2056_v2  ;;  %1714 = vadd.xlane.f32.xlu1 %v1651_v36  ;;  %v1861_v36 = vmul.f32 0.6931472, %v2615_v18  ;;  %v1990_v16 = vsel %vm1972_vm10, %v1821_v0, 0.0  ;;  %2620 = vlog2.f32 %v1503_v53  ;;  %v5846_v18 = vld [vmem:[#allocation61_spill] sm:$0xff] }
 0x39c   :  { %1704 = vadd.xlane.f32.xlu0 %v1646_v46  ;;  %v5843_v46 = vsub.f32 %v4826_v13, %v4830_v63  ;;  %v2065_v0 = vsel %vm1972_vm10, %v1949_v4, 0.0 }
 0x39d   :  { %v2060_v2 = vadd.f32 %v2059_v43, %v2058_v28  ;;  %v1916_v7 = vadd.f32 %v1861_v36, %v5811_v50  ;;  %v1649_v50 = vsel %vm1073_vm11, %v5813_v11, 0.0  ;;  %vm5849_vm11 = vcmp.eq.s32.totalorder %v3191_v40, %v5848_v30 }
 0x39e   :  { %v4949_v5 = vpop.xlane.xlu1 %1580  ;;  %v4951_v49 = vpop.xlane.xlu2 %1676  ;;  %v1988_v23 = vsel %vm1972_vm10, %v5843_v46, 0.0  ;;  %v1555_v26 = vsel %vm5849_vm11, %v5833_v57, 0.0  ;;  %v1507_v46 = vadd.f32 %v4563_v48, %v5836_v14 }
 0x39f   :  { %v1824_v42 = vsub.f32 %v4940_v9, %v4949_v5  ;;  %v1952_v34 = vsub.f32 %v4943_v20, %v4951_v49  ;;  %v1571_v24 = vpop.xlane.xlu0 %1570  ;;  %v2062_v52 = vadd.f32 %v2061_v45, %v2060_v2  ;;  %v2617_v2 = vpop.eup %2616 }
 0x3a0   :  { %v1819_v15 = vsub.f32 %v1787_v12, %v1571_v24  ;;  %v2619_v9 = vpop.eup %2618  ;;  %v1747_v5 = vmul.f32 0.6931472, %v2617_v2  ;;  %v1377_v24 = vadd.f32 %v5846_v18, %v5828_v37 }
 0x3a1   :  { %v1737_v12 = vmul.f32 0.6931472, %v2619_v9  ;;  %v2621_v36 = vpop.eup %2620  ;;  %v1996_v53 = vsel %vm1972_vm10, %v1824_v42, 0.0  ;;  %v5851_v42 = vld [vmem:[#allocation73_spill] sm:$0xff] }
 0x3a2   :  { %v1986_v28 = vsel %vm1972_vm10, %v1819_v15, 0.0  ;;  %2622 = vlog2.f32 %v1377_v24 }
 0x3a3   :  { %v1987_v31 = vadd.f32 %v1986_v28, %v1985_v22  ;;  %v4973_v22 = vadd.f32 %v1745_v39, %v5845_v47  ;;  %v5847_v39 = vld [vmem:[#allocation115_spill] sm:$0xff]  ;;  %v1790_v11 = vadd.f32 %v1737_v12, %v5830_v51  ;;  %v1506_v51 = vadd.f32 %v4561_v33, %v4355_v1 }
 0x3a4   :  { %1612 = vadd.xlane.f32.xlu0 %v1552_v25  ;;  %v4997_v10 = vadd.f32 %v1747_v5, %v5847_v39 }
 0x3a5   :  { %v1989_v43 = vadd.f32 %v1988_v23, %v1987_v31  ;;  %v1867_v31 = vmul.f32 0.6931472, %v2621_v36  ;;  %2624 = vlog2.f32 %v1506_v51 }
 0x3a6   :  { %v1679_v13 = vpop.xlane.xlu1 %1678  ;;  %v4979_v63 = vpop.xlane.xlu2 %1584  ;;  %2626 = vlog2.f32 %v1507_v46 }
 0x3a7   :  { %v1953_v41 = vsub.f32 %v4970_v3, %v1679_v13  ;;  %v1826_v55 = vsub.f32 %v4973_v22, %v4979_v63  ;;  %v1669_v35 = vpop.xlane.xlu0 %1668  ;;  %v1991_v44 = vadd.f32 %v1990_v16, %v1989_v43  ;;  %v1919_v40 = vadd.f32 %v1867_v31, %v5831_v54  ;;  %v5850_v3 = vld [vmem:[#allocation22_spill] sm:$0xff]  ;;  %v5852_v54 = vld [vmem:[#allocation129_spill] sm:$0xff]  ;;  %v5853_v13 = vld [vmem:[#allocation83_spill] sm:$0xff] }
 0x3a8   :  { %v1948_v45 = vsub.f32 %v1916_v7, %v1669_v35  ;;  %v2623_v57 = vpop.eup %2622  ;;  %v1508_v1 = vadd.f32 %v4644_v59, %v5850_v3  ;;  %v1380_v16 = vadd.f32 %v5851_v42, %v5850_v3  ;;  %v2071_v59 = vsel %vm1972_vm10, %v1952_v34, 0.0  ;;  %v5855_v31 = vld [vmem:[#allocation21_spill] sm:$0xff]  ;;  %v5860_v3 = vld [vmem:[#allocation68_spill] sm:$0xff] }
 0x3a9   :  { %v1381_v7 = vadd.f32 %v5853_v13, %v5852_v54 }
 0x3aa   :  { %v2063_v61 = vsel %vm1972_vm10, %v1948_v45, 0.0  ;;  %2628 = vlog2.f32 %v1508_v1 }
 0x3ab   :  { %v2064_v58 = vadd.f32 %v2063_v61, %v2062_v52  ;;  %v2067_v52 = vsel %vm1972_vm10, %v1950_v6, 0.0  ;;  %v1994_v6 = vsel %vm1972_vm10, %v1823_v17, 0.0  ;;  %v1743_v17 = vmul.f32 0.6931472, %v2623_v57  ;;  %v2625_v35 = vpop.eup %2624  ;;  %v5854_v61 = vld [vmem:[#allocation125_spill] sm:$0xff] }
 0x3ac   :  { %1710 = vadd.xlane.f32.xlu0 %v1649_v50  ;;  %v2627_v12 = vpop.eup %2626  ;;  %2630 = vlog2.f32 %v1380_v16  ;;  %v1873_v34 = vmul.f32 0.6931472, %v2625_v35 }
 0x3ad   :  { %v2066_v15 = vadd.f32 %v2065_v0, %v2064_v58  ;;  %v1793_v5 = vadd.f32 %v1743_v17, %v5844_v32  ;;  %v1382_v58 = vadd.f32 %v4459_v29, %v5854_v61  ;;  %2632 = vlog2.f32 %v1381_v7 }
 0x3ae   :  { %v1587_v62 = vpop.xlane.xlu1 %1586  ;;  %v5005_v60 = vpop.xlane.xlu2 %1682  ;;  %v1875_v18 = vmul.f32 0.6931472, %v2627_v12  ;;  %v1509_v32 = vadd.f32 %v4579_v8, %v5852_v54  ;;  %v2000_v29 = vsel %vm1972_vm10, %v1826_v55, 0.0  ;;  %v5863_v54 = vld [vmem:[#allocation20_spill] sm:$0xff] }
 0x3af   :  { %v1827_v19 = vsub.f32 %v4997_v10, %v1587_v62  ;;  %v1577_v4 = vpop.xlane.xlu0 %1576  ;;  %v2068_v28 = vadd.f32 %v2067_v52, %v2066_v15  ;;  %2634 = vlog2.f32 %v1382_v58  ;;  %v1510_v52 = vadd.f32 %v4581_v38, %v5854_v61  ;;  %v5857_v38 = vld [vmem:[#allocation69_spill] sm:$0xff] }
 0x3b0   :  { %v1822_v37 = vsub.f32 %v1790_v11, %v1577_v4  ;;  %v2629_v49 = vpop.eup %2628  ;;  %v1923_v4 = vadd.f32 %v1875_v18, %v5847_v39  ;;  %2636 = vlog2.f32 %v1509_v32 }
 0x3b1   :  { %v1877_v10 = vmul.f32 0.6931472, %v2629_v49  ;;  %v2002_v36 = vsel %vm1972_vm10, %v1827_v19, 0.0  ;;  %2638 = vlog2.f32 %v1510_v52 }
 0x3b2   :  { %v1992_v27 = vsel %vm1972_vm10, %v1822_v37, 0.0  ;;  %v2631_v11 = vpop.eup %2630  ;;  %v1922_v37 = vadd.f32 %v1873_v34, %v5845_v47  ;;  %v1955_v55 = vsub.f32 %v1923_v4, %v5005_v60  ;;  %v5859_v60 = vld [vmem:[#allocation134_spill] sm:$0xff]  ;;  %v5865_v34 = vld [vmem:[#allocation88_spill] sm:$0xff] }
 0x3b3   :  { %v1993_v25 = vadd.f32 %v1992_v27, %v1991_v44  ;;  %v2073_v44 = vsel %vm1972_vm10, %v1953_v41, 0.0  ;;  %v2633_v8 = vpop.eup %2632  ;;  %v5856_v27 = vld [vmem:[#allocation12_spill] sm:$0xff]  ;;  %v1924_v30 = vadd.f32 %v1877_v10, %v5857_v38  ;;  %v1749_v19 = vmul.f32 0.6931472, %v2631_v11 }
 0x3b4   :  { %1618 = vadd.xlane.f32.xlu0 %v1555_v26  ;;  %v1751_v39 = vmul.f32 0.6931472, %v2633_v8  ;;  %v2077_v57 = vsel %vm1972_vm10, %v1955_v55, 0.0  ;;  %v1384_v1 = vadd.f32 %v5860_v3, %v5859_v60  ;;  %v1512_v18 = vadd.f32 %v5865_v34, %v5859_v60  ;;  %v5867_v4 = vld [vmem:[#allocation24_spill] sm:$0xff] }
 0x3b5   :  { %v1995_v23 = vadd.f32 %v1994_v6, %v1993_v25  ;;  %v1511_v25 = vadd.f32 %v5856_v27, %v5855_v31  ;;  %v2635_v51 = vpop.eup %2634  ;;  %v1796_v42 = vadd.f32 %v1749_v19, %v5857_v38 }
 0x3b6   :  { %v5021_v43 = vpop.xlane.xlu1 %1684  ;;  %v5026_v56 = vpop.xlane.xlu2 %1590 }
 0x3b7   :  { %v1675_v33 = vpop.xlane.xlu0 %1674  ;;  %v1997_v2 = vadd.f32 %v1996_v53, %v1995_v23  ;;  %v1956_v6 = vsub.f32 %v1924_v30, %v5021_v43  ;;  %2640 = vlog2.f32 %v1511_v25  ;;  %v5858_v23 = vld [vmem:[#allocation64_spill] sm:$0xff]  ;;  %v5861_v43 = vld [vmem:[#allocation78_spill] sm:$0xff] }
 0x3b8   :  { %v1951_v21 = vsub.f32 %v1919_v40, %v1675_v33  ;;  %v1383_v53 = vadd.f32 %v5858_v23, %v5855_v31  ;;  %v1753_v40 = vmul.f32 0.6931472, %v2635_v51  ;;  %v5871_v51 = vld [vmem:[#allocation14_spill] sm:$0xff]  ;;  %v5872_v23 = vld [vmem:[#allocation132_spill] sm:$0xff] }
 0x3b9   :  { %v2079_v17 = vsel %vm1972_vm10, %v1956_v6, 0.0 }
 0x3ba   :  { %v2069_v48 = vsel %vm1972_vm10, %v1951_v21, 0.0  ;;  %v2637_v21 = vpop.eup %2636  ;;  %2642 = vlog2.f32 %v1383_v53  ;;  %v5873_v53 = vld [vmem:[#allocation10_spill] sm:$0xff] }
 0x3bb   :  { %v2070_v14 = vadd.f32 %v2069_v48, %v2068_v28  ;;  %v1797_v48 = vadd.f32 %v1751_v39, %v5861_v43  ;;  %v2639_v16 = vpop.eup %2638  ;;  %2644 = vlog2.f32 %v1384_v1  ;;  %v1879_v58 = vmul.f32 0.6931472, %v2637_v21  ;;  %v5876_v21 = vld [vmem:[#allocation127_spill] sm:$0xff] }
 0x3bd   :  { %v2072_v9 = vadd.f32 %v2071_v59, %v2070_v14  ;;  %v5862_v59 = vld [vmem:[#allocation126_spill] sm:$0xff]  ;;  %v1829_v35 = vsub.f32 %v1797_v48, %v5026_v56  ;;  %v2641_v61 = vpop.eup %2640  ;;  %v5866_v56 = vld [vmem:[#allocation80_spill] sm:$0xff]  ;;  %v1925_v11 = vadd.f32 %v1879_v58, %v5861_v43 }
 0x3be   :  { %v5038_v45 = vpop.xlane.xlu1 %1592  ;;  %v5044_v41 = vpop.xlane.xlu2 %1688  ;;  %v1385_v13 = vadd.f32 %v5863_v54, %v5862_v59  ;;  %v1513_v32 = vadd.f32 %v5866_v56, %v5862_v59 }
 0x3bf   :  { %v1583_v50 = vpop.xlane.xlu0 %1582  ;;  %v2074_v0 = vadd.f32 %v2073_v44, %v2072_v9  ;;  %v5864_v44 = vld [vmem:[#allocation79_spill] sm:$0xff] }
 0x3c0   :  { %v1825_v20 = vsub.f32 %v1793_v5, %v1583_v50  ;;  %v1798_v5 = vadd.f32 %v1753_v40, %v5864_v44  ;;  %v1881_v50 = vmul.f32 0.6931472, %v2639_v16  ;;  %2646 = vlog2.f32 %v1385_v13 }
 0x3c1   :  { %2648 = vlog2.f32 %v1512_v18  ;;  %v1516_v40 = vadd.f32 %v5873_v53, %v5872_v23 }
 0x3c2   :  { %v1998_v24 = vsel %vm1972_vm10, %v1825_v20, 0.0  ;;  %2650 = vlog2.f32 %v1513_v32 }
 0x3c3   :  { %v1999_v15 = vadd.f32 %v1998_v24, %v1997_v2  ;;  %v1883_v24 = vmul.f32 0.6931472, %v2641_v61 }
 0x3c5   :  { %v2001_v62 = vadd.f32 %v2000_v29, %v1999_v15  ;;  %v2006_v15 = vsel %vm1972_vm10, %v1829_v35, 0.0  ;;  %v2643_v29 = vpop.eup %2642 }
 0x3c6   :  { %v5056_v28 = vpop.xlane.xlu1 %1690  ;;  %v5070_v33 = vpop.xlane.xlu2 %1596  ;;  %v1755_v39 = vmul.f32 0.6931472, %v2643_v29 }
 0x3c7   :  { %v1681_v22 = vpop.xlane.xlu0 %1680  ;;  %v2003_v63 = vadd.f32 %v2002_v36, %v2001_v62  ;;  %v1926_v62 = vadd.f32 %v1881_v50, %v5864_v44  ;;  %v2645_v36 = vpop.eup %2644  ;;  %v5878_v44 = vld [vmem:[#allocation87_spill] sm:$0xff] }
 0x3c8   :  { %v1954_v26 = vsub.f32 %v1922_v37, %v1681_v22  ;;  %v5868_v37 = vld [vmem:[#allocation31_spill] sm:$0xff]  ;;  %v2647_v30 = vpop.eup %2646  ;;  %v1757_v6 = vmul.f32 0.6931472, %v2645_v36 }
 0x3c9   :  { %v1514_v8 = vadd.f32 %v5868_v37, %v5867_v4  ;;  %v1958_v22 = vsub.f32 %v1926_v62, %v5044_v41  ;;  %v5874_v41 = vld [vmem:[#allocation74_spill] sm:$0xff]  ;;  %v1759_v3 = vmul.f32 0.6931472, %v2647_v30  ;;  %v2649_v48 = vpop.eup %2648 }
 0x3ca   :  { %v2075_v47 = vsel %vm1972_vm10, %v1954_v26, 0.0  ;;  %v5870_v26 = vld [vmem:[#allocation136_spill] sm:$0xff]  ;;  %v1386_v60 = vadd.f32 %v5874_v41, %v5867_v4  ;;  %v2651_v13 = vpop.eup %2650  ;;  %v1885_v50 = vmul.f32 0.6931472, %v2649_v48 }
 0x3cb   :  { %v2076_v46 = vadd.f32 %v2075_v47, %v2074_v0  ;;  %v1830_v0 = vsub.f32 %v1798_v5, %v5038_v45  ;;  %v1515_v19 = vadd.f32 %v5871_v51, %v5870_v26  ;;  %2652 = vlog2.f32 %v1514_v8  ;;  %v5881_v51 = vld [vmem:[#allocation94_spill] sm:$0xff] }
 0x3cc   :  { %v2083_v1 = vsel %vm1972_vm10, %v1958_v22, 0.0  ;;  %v1801_v5 = vadd.f32 %v1759_v3, %v5878_v44  ;;  %v5880_v22 = vld [vmem:[#allocation101_spill] sm:$0xff] }
 0x3cd   :  { %v2078_v2 = vadd.f32 %v2077_v57, %v2076_v46  ;;  %v2008_v52 = vsel %vm1972_vm10, %v1830_v0, 0.0  ;;  %2654 = vlog2.f32 %v1515_v19  ;;  %v1887_v0 = vmul.f32 0.6931472, %v2651_v13 }
 0x3ce   :  { %v5074_v14 = vpop.xlane.xlu1 %1598  ;;  %v5095_v31 = vpop.xlane.xlu2 %1694  ;;  %2656 = vlog2.f32 %v1516_v40  ;;  %v5882_v40 = vld [vmem:[#allocation98_spill] sm:$0xff] }
 0x3cf   :  { %v1589_v7 = vpop.xlane.xlu0 %1588  ;;  %v2080_v9 = vadd.f32 %v2079_v17, %v2078_v2  ;;  %v5875_v2 = vld [vmem:[#allocation43_spill] sm:$0xff]  ;;  %2658 = vlog2.f32 %v1386_v60 }
 0x3d0   :  { %v1828_v12 = vsub.f32 %v1796_v42, %v1589_v7  ;;  %v1517_v17 = vadd.f32 %v5876_v21, %v5875_v2  ;;  %v5877_v42 = vld [vmem:[#allocation89_spill] sm:$0xff]  ;;  %v5884_v21 = vld [vmem:[#allocation104_spill] sm:$0xff] }
 0x3d1   :  { %v1800_v16 = vadd.f32 %v1757_v6, %v5877_v42  ;;  %v2653_v61 = vpop.eup %2652 }
 0x3d2   :  { %v2004_v20 = vsel %vm1972_vm10, %v1828_v12, 0.0  ;;  %2660 = vlog2.f32 %v1517_v17 }
 0x3d3   :  { %v2005_v49 = vadd.f32 %v2004_v20, %v2003_v63  ;;  %v5869_v63 = vld [vmem:[#allocation96_spill] sm:$0xff]  ;;  %v1832_v35 = vsub.f32 %v1800_v16, %v5070_v33  ;;  %v1833_v20 = vsub.f32 %v1801_v5, %v5074_v14  ;;  %v2655_v34 = vpop.eup %2654  ;;  %v1928_v14 = vadd.f32 %v1885_v50, %v5877_v42  ;;  %v5885_v5 = vld [vmem:[#allocation9_spill] sm:$0xff]  ;;  %v5886_v50 = vld [vmem:[#allocation58_spill] sm:$0xff] }
 0x3d4   :  { %v1927_v55 = vadd.f32 %v1883_v24, %v5869_v63  ;;  %v1799_v54 = vadd.f32 %v1755_v39, %v5869_v63  ;;  %v1889_v24 = vmul.f32 0.6931472, %v2653_v61  ;;  %v2657_v56 = vpop.eup %2656  ;;  %v5879_v33 = vld [vmem:[#allocation8_spill] sm:$0xff] }
 0x3d5   :  { %v2007_v10 = vadd.f32 %v2006_v15, %v2005_v49  ;;  %v2012_v15 = vsel %vm1972_vm10, %v1832_v35, 0.0  ;;  %v1387_v32 = vadd.f32 %v5879_v33, %v5870_v26  ;;  %v2659_v29 = vpop.eup %2658  ;;  %v2014_v62 = vsel %vm1972_vm10, %v1833_v20, 0.0 }
 0x3d6   :  { %v5090_v45 = vpop.xlane.xlu1 %1696  ;;  %v1959_v47 = vsub.f32 %v1927_v55, %v5056_v28  ;;  %v5115_v58 = vpop.xlane.xlu2 %1486  ;;  %v1930_v63 = vadd.f32 %v1889_v24, %v5880_v22 }
 0x3d7   :  { %v1687_v27 = vpop.xlane.xlu0 %1686  ;;  %v2009_v25 = vadd.f32 %v2008_v52, %v2007_v10  ;;  %v1891_v52 = vmul.f32 0.6931472, %v2655_v34  ;;  %2662 = vlog2.f32 %v1387_v32 }
 0x3d8   :  { %v1957_v38 = vsub.f32 %v1925_v11, %v1687_v27  ;;  %v2085_v28 = vsel %vm1972_vm10, %v1959_v47, 0.0  ;;  %v1929_v11 = vadd.f32 %v1887_v0, %v5878_v44  ;;  %v2661_v4 = vpop.eup %2660  ;;  %v1893_v27 = vmul.f32 0.6931472, %v2657_v56  ;;  %v5887_v0 = vld [vmem:[#allocation82_spill] sm:$0xff] }
 0x3d9   :  { %v1895_v30 = vmul.f32 0.6931472, %v2661_v4  ;;  %v1962_v26 = vsub.f32 %v1930_v63, %v5090_v45  ;;  %v1931_v19 = vadd.f32 %v1891_v52, %v5881_v51  ;;  %v1390_v20 = vadd.f32 %v5887_v0, %v5886_v50  ;;  %v5889_v56 = vld [vmem:[#allocation46_spill] sm:$0xff] }
 0x3da   :  { %v2081_v46 = vsel %vm1972_vm10, %v1957_v38, 0.0  ;;  %v1761_v38 = vmul.f32 0.6931472, %v2659_v29 }
 0x3db   :  { %v2082_v57 = vadd.f32 %v2081_v46, %v2080_v9  ;;  %v2091_v3 = vsel %vm1972_vm10, %v1962_v26, 0.0  ;;  %v1933_v17 = vadd.f32 %v1895_v30, %v5884_v21 }
 0x3dd   :  { %v2084_v43 = vadd.f32 %v2083_v1, %v2082_v57  ;;  %v5883_v57 = vld [vmem:[#allocation34_spill] sm:$0xff]  ;;  %v2663_v48 = vpop.eup %2662 }
 0x3de   :  { %v1699_v59 = vpop.xlane.xlu1 %1698  ;;  %v5130_v6 = vpop.xlane.xlu2 %1488  ;;  %v1388_v41 = vadd.f32 %v5883_v57, %v5872_v23  ;;  %v5896_v57 = vld [vmem:[#allocation15_spill] sm:$0xff] }
 0x3df   :  { %v1595_v7 = vpop.xlane.xlu0 %1594  ;;  %v2086_v9 = vadd.f32 %v2085_v28, %v2084_v43  ;;  %v1963_v53 = vsub.f32 %v1931_v19, %v1699_v59  ;;  %v1802_v43 = vadd.f32 %v1761_v38, %v5880_v22 }
 0x3e0   :  { %v1831_v12 = vsub.f32 %v1799_v54, %v1595_v7  ;;  %2664 = vlog2.f32 %v1388_v41  ;;  %v1763_v7 = vmul.f32 0.6931472, %v2663_v48  ;;  %v5899_v48 = vld [vmem:[#allocation60_spill] sm:$0xff] }
 0x3e1   :  { %v2093_v16 = vsel %vm1972_vm10, %v1963_v53, 0.0 }
 0x3e2   :  { %v2010_v49 = vsel %vm1972_vm10, %v1831_v12, 0.0  ;;  %v1389_v12 = vadd.f32 %v5885_v5, %v5875_v2 }
 0x3e3   :  { %v2011_v18 = vadd.f32 %v2010_v49, %v2009_v25  ;;  %v1961_v25 = vsub.f32 %v1929_v11, %v5095_v31  ;;  %v1932_v31 = vadd.f32 %v1893_v27, %v5882_v40  ;;  %v5892_v27 = vld [vmem:[#allocation54_spill] sm:$0xff] }
 0x3e4   :  { %2666 = vlog2.f32 %v1389_v12 }
 0x3e5   :  { %v2013_v10 = vadd.f32 %v2012_v15, %v2011_v18  ;;  %v2089_v46 = vsel %vm1972_vm10, %v1961_v25, 0.0  ;;  %v1803_v18 = vadd.f32 %v1763_v7, %v5881_v51  ;;  %v5888_v15 = vld [vmem:[#allocation137_spill] sm:$0xff]  ;;  %2668 = vlog2.f32 %v1390_v20  ;;  %v5893_v25 = vld [vmem:[#allocation130_spill] sm:$0xff] }
 0x3e6   :  { %v1701_v36 = vpop.xlane.xlu1 %1700  ;;  %v5147_v49 = vpop.xlane.xlu2 %1490  ;;  %v1391_v33 = vadd.f32 %v5889_v56, %v5888_v15  ;;  %v1520_v22 = vadd.f32 %v5893_v25, %v5892_v27 }
 0x3e7   :  { %v1693_v37 = vpop.xlane.xlu0 %1692  ;;  %v2015_v8 = vadd.f32 %v2014_v62, %v2013_v10  ;;  %v1964_v1 = vsub.f32 %v1932_v31, %v1701_v36  ;;  %v2665_v24 = vpop.eup %2664  ;;  %v5890_v62 = vld [vmem:[#allocation11_spill] sm:$0xff]  ;;  %v5891_v36 = vld [vmem:[#allocation25_spill] sm:$0xff] }
 0x3e8   :  { %v1960_v55 = vsub.f32 %v1928_v14, %v1693_v37  ;;  %v1765_v2 = vmul.f32 0.6931472, %v2665_v24  ;;  %2670 = vlog2.f32 %v1391_v33  ;;  %v1518_v11 = vadd.f32 %v5890_v62, %v5886_v50  ;;  %v5895_v31 = vld [vmem:[#allocation75_spill] sm:$0xff]  ;;  %v5902_v62 = vld [vmem:[#allocation108_spill] sm:$0xff] }
 0x3e9   :  { %v2095_v23 = vsel %vm1972_vm10, %v1964_v1, 0.0  ;;  %v1519_v14 = vadd.f32 %v5891_v36, %v5888_v15  ;;  %v1393_v41 = vadd.f32 %v5896_v57, %v5895_v31  ;;  %v1521_v50 = vadd.f32 %v5115_v58, %v5895_v31 }
 0x3ea   :  { %v2087_v39 = vsel %vm1972_vm10, %v1960_v55, 0.0  ;;  %v2667_v4 = vpop.eup %2666  ;;  %v1804_v37 = vadd.f32 %v1765_v2, %v5882_v40  ;;  %2672 = vlog2.f32 %v1518_v11 }
 0x3eb   :  { %v2088_v47 = vadd.f32 %v2087_v39, %v2086_v9  ;;  %2674 = vlog2.f32 %v1519_v14  ;;  %v1767_v51 = vmul.f32 0.6931472, %v2667_v4 }
 0x3ec   :  { %2676 = vlog2.f32 %v1520_v22 }
 0x3ed   :  { %v2090_v60 = vadd.f32 %v2089_v46, %v2088_v47  ;;  %v5894_v46 = vld [vmem:[#allocation93_spill] sm:$0xff] }
 0x3ee   :  { %v1703_v45 = vpop.xlane.xlu1 %1702  ;;  %v1609_v63 = vpop.xlane.xlu2 %1608  ;;  %v1392_v53 = vadd.f32 %v5894_v46, %v5892_v27 }
 0x3ef   :  { %v2092_v28 = vadd.f32 %v2091_v3, %v2090_v60  ;;  %v1601_v42 = vpop.xlane.xlu0 %1600  ;;  %v1965_v59 = vsub.f32 %v1933_v17, %v1703_v45  ;;  %v5897_v3 = vld [vmem:[#allocation105_spill] sm:$0xff]  ;;  %v1805_v45 = vadd.f32 %v1767_v51, %v5884_v21 }
 0x3f0   :  { %v1834_v54 = vsub.f32 %v1802_v43, %v1601_v42  ;;  %v5898_v43 = vld [vmem:[#allocation53_spill] sm:$0xff]  ;;  %2678 = vlog2.f32 %v1392_v53 }
 0x3f1   :  { %v2094_v13 = vadd.f32 %v2093_v16, %v2092_v28  ;;  %v2097_v61 = vsel %vm1972_vm10, %v1965_v59, 0.0  ;;  %v1394_v28 = vadd.f32 %v5899_v48, %v5898_v43  ;;  %v5900_v59 = vld [vmem:[#allocation110_spill] sm:$0xff]  ;;  %2680 = vlog2.f32 %v1393_v41 }
 0x3f2   :  { %v2016_v9 = vsel %vm1972_vm10, %v1834_v54, 0.0  ;;  %v1522_v20 = vadd.f32 %v5130_v6, %v5898_v43 }
 0x3f3   :  { %v2096_v35 = vadd.f32 %v2095_v23, %v2094_v13  ;;  %v2017_v44 = vadd.f32 %v2016_v9, %v2015_v8  ;;  %v2669_v8 = vpop.eup %2668  ;;  %2682 = vlog2.f32 %v1394_v28 }
 0x3f4   :  { %v2671_v30 = vpop.eup %2670  ;;  %v1769_v19 = vmul.f32 0.6931472, %v2669_v8  ;;  %2684 = vlog2.f32 %v1521_v50 }
 0x3f5   :  { %v5149_v34 = vadd.f32 %v2097_v61, %v2096_v35  ;;  %v1771_v40 = vmul.f32 0.6931472, %v2671_v30  ;;  %v2673_v60 = vpop.eup %2672  ;;  %2686 = vlog2.f32 %v1522_v20 }
 0x3f6   :  { %v1611_v26 = vpop.xlane.xlu1 %1610  ;;  %v1806_v1 = vadd.f32 %v1769_v19, %v5897_v3  ;;  %v2675_v17 = vpop.eup %2674  ;;  %v1897_v9 = vmul.f32 0.6931472, %v2673_v60  ;;  %v5904_v19 = vld [vmem:[#allocation119_spill] sm:$0xff] }
 0x3f7   :  { %v1603_v32 = vpop.xlane.xlu0 %1602  ;;  %v1807_v54 = vadd.f32 %v1771_v40, %v5900_v59  ;;  %v2677_v7 = vpop.eup %2676  ;;  %v1899_v35 = vmul.f32 0.6931472, %v2675_v17 }
 0x3f8   :  { %v1835_v10 = vsub.f32 %v1803_v18, %v1603_v32  ;;  %v1838_v16 = vsub.f32 %v1806_v1, %v1609_v63  ;;  %v1707_v23 = vpop.xlane.xlu2 %1706  ;;  %v1901_v61 = vmul.f32 0.6931472, %v2677_v7  ;;  %v2679_v24 = vpop.eup %2678  ;;  %v1934_v33 = vadd.f32 %v1897_v9, %v5897_v3  ;;  %v5903_v63 = vld [vmem:[#allocation13_spill] sm:$0xff] }
 0x3f9   :  { %v1935_v56 = vadd.f32 %v1899_v35, %v5900_v59  ;;  %v2681_v32 = vpop.eup %2680  ;;  %v1773_v14 = vmul.f32 0.6931472, %v2679_v24 }
 0x3fa   :  { %v2018_v29 = vsel %vm1972_vm10, %v1835_v10, 0.0  ;;  %v2024_v0 = vsel %vm1972_vm10, %v1838_v16, 0.0  ;;  %v5901_v10 = vld [vmem:[#allocation65_spill] sm:$0xff]  ;;  %v1936_v11 = vadd.f32 %v1901_v61, %v5902_v62  ;;  %v2683_v6 = vpop.eup %2682  ;;  %v1775_v4 = vmul.f32 0.6931472, %v2681_v32 }
 0x3fb   :  { %v2019_v52 = vadd.f32 %v2018_v29, %v2017_v44  ;;  %v1839_v44 = vsub.f32 %v1807_v54, %v1611_v26  ;;  %v1523_v2 = vadd.f32 %v5147_v49, %v5901_v10  ;;  %v1967_v58 = vsub.f32 %v1935_v56, %v1707_v23  ;;  %v2685_v26 = vpop.eup %2684 }
 0x3fc   :  { %v1777_v22 = vmul.f32 0.6931472, %v2683_v6  ;;  %v2687_v46 = vpop.eup %2686  ;;  %v1903_v3 = vmul.f32 0.6931472, %v2685_v26 }
 0x3fd   :  { %v2026_v15 = vsel %vm1972_vm10, %v1839_v44, 0.0  ;;  %2688 = vlog2.f32 %v1523_v2  ;;  %v2101_v49 = vsel %vm1972_vm10, %v1967_v58, 0.0  ;;  %v1905_v1 = vmul.f32 0.6931472, %v2687_v46 }
 0x3fe   :  { %v1709_v21 = vpop.xlane.xlu1 %1708 }
 0x3ff   :  { %v1605_v55 = vpop.xlane.xlu0 %1604 }
 0x400   :  { %v1836_v38 = vsub.f32 %v1804_v37, %v1605_v55  ;;  %v1968_v37 = vsub.f32 %v1936_v11, %v1709_v21  ;;  %v1615_v27 = vpop.xlane.xlu2 %1614  ;;  %v1395_v55 = vadd.f32 %v5903_v63, %v5901_v10 }
 0x402   :  { %v2020_v39 = vsel %vm1972_vm10, %v1836_v38, 0.0  ;;  %v2103_v51 = vsel %vm1972_vm10, %v1968_v37, 0.0  ;;  %2690 = vlog2.f32 %v1395_v55 }
 0x403   :  { %v2021_v47 = vadd.f32 %v2020_v39, %v2019_v52  ;;  %v1809_v39 = vadd.f32 %v1775_v4, %v5904_v19  ;;  %v2689_v60 = vpop.eup %2688 }
 0x404   :  { %v1907_v48 = vmul.f32 0.6931472, %v2689_v60 }
 0x405   :  { %v1841_v31 = vsub.f32 %v1809_v39, %v1615_v27 }
 0x406   :  { %v1617_v38 = vpop.xlane.xlu1 %1616 }
 0x407   :  { %v1607_v42 = vpop.xlane.xlu0 %1606  ;;  %v2030_v28 = vsel %vm1972_vm10, %v1841_v31, 0.0 }
 0x408   :  { %v1837_v13 = vsub.f32 %v1805_v45, %v1607_v42  ;;  %v1713_v42 = vpop.xlane.xlu2 %1712  ;;  %v2691_v7 = vpop.eup %2690 }
 0x409   :  { %v1779_v61 = vmul.f32 0.6931472, %v2691_v7 }
 0x40a   :  { %v2022_v5 = vsel %vm1972_vm10, %v1837_v13, 0.0  ;;  %v1937_v13 = vadd.f32 %v1903_v3, %v5904_v19 }
 0x40b   :  { %v2023_v12 = vadd.f32 %v2022_v5, %v2021_v47  ;;  %v1808_v47 = vadd.f32 %v1773_v14, %v5902_v62  ;;  %v5906_v5 = vld [vmem:[#allocation114_spill] sm:$0xff] }
 0x40c   :  { %v1939_v21 = vadd.f32 %v1907_v48, %v5906_v5  ;;  %v1811_v56 = vadd.f32 %v1779_v61, %v5906_v5 }
 0x40d   :  { %v2025_v18 = vadd.f32 %v2024_v0, %v2023_v12 }
 0x40e   :  { %v1715_v23 = vpop.xlane.xlu1 %1714 }
 0x40f   :  { %v1705_v29 = vpop.xlane.xlu0 %1704  ;;  %v2027_v52 = vadd.f32 %v2026_v15, %v2025_v18  ;;  %v1971_v50 = vsub.f32 %v1939_v21, %v1715_v23 }
 0x410   :  { %v1966_v36 = vsub.f32 %v1934_v33, %v1705_v29 }
 0x411   :  { %v2109_v15 = vsel %vm1972_vm10, %v1971_v50, 0.0 }
 0x412   :  { %v2099_v8 = vsel %vm1972_vm10, %v1966_v36, 0.0 }
 0x413   :  { %v2100_v25 = vadd.f32 %v2099_v8, %v5149_v34  ;;  %v5905_v34 = vld [vmem:[#allocation113_spill] sm:$0xff] }
 0x414   :  { %v1810_v57 = vadd.f32 %v1777_v22, %v5905_v34  ;;  %v1938_v54 = vadd.f32 %v1905_v1, %v5905_v34 }
 0x415   :  { %v2102_v30 = vadd.f32 %v2101_v49, %v2100_v25 }
 0x416   :  { %v1842_v45 = vsub.f32 %v1810_v57, %v1617_v38  ;;  %v1970_v44 = vsub.f32 %v1938_v54, %v1713_v42 }
 0x417   :  { %v1613_v53 = vpop.xlane.xlu0 %1612  ;;  %v2104_v40 = vadd.f32 %v2103_v51, %v2102_v30 }
 0x418   :  { %v1840_v41 = vsub.f32 %v1808_v47, %v1613_v53  ;;  %v2032_v59 = vsel %vm1972_vm10, %v1842_v45, 0.0  ;;  %v2107_v18 = vsel %vm1972_vm10, %v1970_v44, 0.0 }
 0x41a   :  { %v2028_v17 = vsel %vm1972_vm10, %v1840_v41, 0.0 }
 0x41b   :  { %v2029_v43 = vadd.f32 %v2028_v17, %v2027_v52 }
 0x41d   :  { %v2031_v16 = vadd.f32 %v2030_v28, %v2029_v43 }
 0x41f   :  { %v1711_v9 = vpop.xlane.xlu0 %1710  ;;  %v2033_v35 = vadd.f32 %v2032_v59, %v2031_v16 }
 0x420   :  { %v1969_v12 = vsub.f32 %v1937_v13, %v1711_v9 }
 0x422   :  { %v2105_v0 = vsel %vm1972_vm10, %v1969_v12, 0.0 }
 0x423   :  { %v2106_v20 = vadd.f32 %v2105_v0, %v2104_v40 }
 0x425   :  { %v2108_v24 = vadd.f32 %v2107_v18, %v2106_v20 }
 0x427   :  { %v1619_v33 = vpop.xlane.xlu0 %1618  ;;  %v2110_v32 = vadd.f32 %v2109_v15, %v2108_v24 }
 0x428   :  { %v1843_v10 = vsub.f32 %v1811_v56, %v1619_v33 }
 0x429   :  { %2111 = vadd.xlane.f32.xlu0 %v2110_v32 }
 0x42a   :  { %v2034_v2 = vsel %vm1972_vm10, %v1843_v10, 0.0  ;;  %vm2046_vm10 = vcmask 0  }
 0x42b   :  { %v2035_v29 = vadd.f32 %v2034_v2, %v2033_v35 }
 0x42d   :  { %2036 = vadd.xlane.f32.xlu2 %v2035_v29 }
 0x49c   :  { %v2112_v52 = vpop.xlane.xlu0 %2111 }
 0x49d   :  { %v2113_v58 = vrot.slane %v2112_v52, 4 }
 0x49f   :  { %v2114_v62 = vadd.f32 %v2113_v58, %v2112_v52 }
 0x4a0   :  { %v2037_v11 = vpop.xlane.xlu2 %2036 }
 0x4a1   :  { %v2115_v36 = vrot.slane %v2114_v62, 2  ;;  %v2038_v6 = vrot.slane %v2037_v11, 4 }
 0x4a3   :  { %v2039_v14 = vadd.f32 %v2038_v6, %v2037_v11  ;;  %v2116_v4 = vadd.f32 %v2115_v36, %v2114_v62 }
 0x4a5   :  { %v2040_v37 = vrot.slane %v2039_v14, 2  ;;  %v2117_v27 = vrot.slane %v2116_v4, 1 }
 0x4a7   :  { %v2041_v8 = vadd.f32 %v2040_v37, %v2039_v14  ;;  %v2118_v49 = vadd.f32 %v2117_v27, %v2116_v4 }
 0x4a9   :  { %v2042_v25 = vrot.slane %v2041_v8, 1 }
 0x4ab   :  { %v2043_v22 = vadd.f32 %v2042_v25, %v2041_v8 }
 0x4ad   :  { %2489 = vpush %v2043_v22 }
 0x4ae   :  { %2491 = vpush %v2118_v49 }
 0x4de   :  { %s2490_s8 = spop %2489 }
 0x4df   :  { %v2045_v63 = vstv %s2490_s8  ;;  %s2492_s9 = spop %2491 }
 0x4e0   :  { %2047 = vst.msk [vmem:[#allocation2] sm:$0x1] %vm2046_vm10, %v2045_v63  ;;  %v2120_v55 = vstv %s2492_s9 }
 0x4e1   :  { %2121 = vst.msk [vmem:[#allocation4] sm:$0x1] %vm2046_vm10, %v2120_v55  ;;  %2132 = dma.vmem_to_hbm [thread:$0]  %s2128_s24, 16, %s2130_s2, [#allocation3]  }
 0x4e2   :  { %2143 = dma.vmem_to_hbm [thread:$0]  %s2139_s27, 16, %s2141_s30, [#allocation5]  }
 0x4e3   :  { %2740 = dma.done.wait [#allocation3], 16  }
 0x4e4   :  { %2741 = vsyncadd [#allocation3], 4294967280 }
 0x4e5   :  { %2742 = dma.done.wait [#allocation5], 16  }
 0x4e6   :  { %2743 = vsyncadd [#allocation5], 4294967280 }
 0x4e7   :  { %2152 = vsyncpa [#allocation3], 1 }
 0x4e8   :  { %2153 = vsyncpa [#allocation5], 1 }

</bundles_post_ra>
